<compile_context>
chip_gen: v7x
topology: tpu7x:2x2x1
jax: 0.10.0
libtpu: 0.0.40
codegen_flags: <defaults>
</compile_context>

<pallas_src>
import jax
import jax.numpy as jnp
from jax.experimental import pallas as pl
from jax.experimental.pallas import tpu as pltpu


# ----------------------------- padding helpers ------------------------------

def _round_up(x, m):
    return (x + m - 1) // m * m


def _pad_last(a, size, pad_to):
    if pad_to == size:
        return a
    pads = [(0, 0)] * (a.ndim - 1) + [(0, pad_to - size)]
    return jnp.pad(a, pads)


def _pad_axis(a, axis, size, pad_to):
    if pad_to == size:
        return a
    pads = [(0, 0)] * a.ndim
    pads[axis] = (0, pad_to - size)
    return jnp.pad(a, pads)


def _pad_gate_cols(w, H, H_pad, n_gates):
    """[..., n_gates*H] -> [..., n_gates*H_pad]; each gate block zero-padded."""
    lead = w.shape[:-1]
    w = w.reshape(*lead, n_gates, H)
    w = _pad_last(w, H, H_pad)
    return w.reshape(*lead, n_gates * H_pad)


# --------------------------------- kernel -----------------------------------

def make_gru_seq_kernel(num_layers: int, h_pad: int, t_chunk: int):
    """Kernel running t_chunk timesteps per grid step (grid over chunks).

    Ref order:
      inputs : gx0 (per-chunk), h0, wh0, bh0, [W_fused_l, b_fused_l]*(L-1)
      outputs: h_top (per-chunk), h_final
      scratch: h_state (L, B_pad, H_pad) f32
    """
    n_fused = num_layers - 1

    def kernel(*refs):
        gx0_ref = refs[0]                       # [t_chunk, B_pad, 3*Hp]
        h0_ref = refs[1]                        # [L, B_pad, Hp]
        wh0_ref = refs[2]                       # [Hp, 3*Hp]
        bh0_ref = refs[3]                       # [1, 3*Hp]
        fused = refs[4:4 + 2 * n_fused]
        htop_ref = refs[4 + 2 * n_fused]        # [t_chunk, B_pad, Hp]
        hfin_ref = refs[5 + 2 * n_fused]        # [L, B_pad, Hp]
        h_scr = refs[6 + 2 * n_fused]           # VMEM [L, B_pad, Hp] f32

        Hp = h_pad
        c = pl.program_id(0)

        @pl.when(c == 0)
        def _():
            h_scr[...] = h0_ref[...].astype(jnp.float32)

        for tt in range(t_chunk):               # static unroll within chunk
            # ---- layer 0: x-projection precomputed (hoisted); one recurrent
            #      [B,Hp] x [Hp,3Hp] matmul per step.
            gx = gx0_ref[tt]                    # [B_pad, 3*Hp] (includes bx0)
            h_prev = h_scr[0]
            gh = jnp.dot(h_prev, wh0_ref[...],
                         preferred_element_type=jnp.float32) + bh0_ref[...]
            r = jax.nn.sigmoid(gx[:, 0:Hp] + gh[:, 0:Hp])
            z = jax.nn.sigmoid(gx[:, Hp:2 * Hp] + gh[:, Hp:2 * Hp])
            n = jnp.tanh(gx[:, 2 * Hp:3 * Hp] + r * gh[:, 2 * Hp:3 * Hp])
            h_new = (1.0 - z) * n + z * h_prev
            h_scr[0] = h_new
            x = h_new

            # ---- layers 1..L-1: single fused matmul per layer.
            #      g columns: [ r(x+h)+b | z(x+h)+b | n_x + bx_n | n_h + bh_n ]
            for l in range(1, num_layers):
                w_ref = fused[2 * (l - 1)]
                b_ref = fused[2 * (l - 1) + 1]
                h_prev = h_scr[l]
                xh = jnp.concatenate([x, h_prev], axis=1)    # [B_pad, 2*Hp]
                g = jnp.dot(xh, w_ref[...],
                            preferred_element_type=jnp.float32) + b_ref[...]
                r = jax.nn.sigmoid(g[:, 0:Hp])
                z = jax.nn.sigmoid(g[:, Hp:2 * Hp])
                n = jnp.tanh(g[:, 2 * Hp:3 * Hp] + r * g[:, 3 * Hp:4 * Hp])
                h_new = (1.0 - z) * n + z * h_prev
                h_scr[l] = h_new
                x = h_new

            htop_ref[tt] = x.astype(htop_ref.dtype)

        # write final hidden state only once, on the last chunk
        @pl.when(c == pl.num_programs(0) - 1)
        def _():
            hfin_ref[...] = h_scr[...].astype(hfin_ref.dtype)

    return kernel


# -------------------------------- wrapper ------------------------------------

def rnn_forward(tokens, processed_cnn_features, initial_hidden_state,
                params, is_train=True):
    """JAX/Pallas equivalent of RNN.forward (intended semantics)."""
    del processed_cnn_features  # unused in the reference forward as well
    if not is_train:
        # TODO(synk): autoregressive decode (is_train=False) feeds argmax tokens
        # back; the reference stub does not implement it either.
        raise NotImplementedError

    emb_table = params["embedding"]          # [V, E]
    layer_ws = params["layers"]              # list of (wx, wh, bx, bh), gates r,z,n
    w_out, b_out = params["output"]          # [H, V], [1, V]

    B, S = tokens.shape
    L, _, H = initial_hidden_state.shape
    V = w_out.shape[1]
    f32 = jnp.float32

    # hardware-friendly padded sizes
    B_pad = _round_up(B, 8)                  # sublanes
    H_pad = _round_up(H, 128)                # lanes -> gate slices lane-aligned
    G3, G4 = 3 * H_pad, 4 * H_pad

    # time chunking (amortize per-grid-step overhead; recurrence is serial)
    t_chunk = 1
    for cand in (16, 8, 4, 2, 1):
        if S % cand == 0:
            t_chunk = cand
            break
    n_chunks = S // t_chunk

    # ---- glue + hoisted GEMMs (plain JAX, MXU-efficient) --------------------
    # time-major gather directly (no [B,S,E] transpose pass)
    embeddings = jnp.take(emb_table, tokens.T, axis=0).astype(f32)   # [S, B, E]
    embeddings = _pad_axis(embeddings, 1, B, B_pad)                  # [S, B_pad, E]

    wx0, wh0, bx0, bh0 = (a.astype(f32) for a in layer_ws[0])
    wx0_p = _pad_gate_cols(wx0, H, H_pad, 3)                         # [E, 3Hp]
    bx0_p = _pad_gate_cols(bx0, H, H_pad, 3)                         # [1, 3Hp]
    # layer-0 input projection hoisted: one big GEMM over all timesteps
    gx0 = jnp.einsum("sbe,ef->sbf", embeddings, wx0_p) + bx0_p       # [S, B_pad, 3Hp]

    wh0_p = _pad_axis(_pad_gate_cols(wh0, H, H_pad, 3), 0, H, H_pad)  # [Hp, 3Hp]
    bh0_p = _pad_gate_cols(bh0, H, H_pad, 3)                          # [1, 3Hp]

    # fused weights for layers 1..L-1
    fused_flat = []
    for l in range(1, L):
        wx, wh, bx, bh = (a.astype(f32) for a in layer_ws[l])
        wx_r, wx_z, wx_n = wx[:, :H], wx[:, H:2 * H], wx[:, 2 * H:]
        wh_r, wh_z, wh_n = wh[:, :H], wh[:, H:2 * H], wh[:, 2 * H:]
        zcol = jnp.zeros((H, H), f32)
        w_top = jnp.concatenate(
            [_pad_last(wx_r, H, H_pad), _pad_last(wx_z, H, H_pad),
             _pad_last(wx_n, H, H_pad), _pad_last(zcol, H, H_pad)], axis=1)
        w_bot = jnp.concatenate(
            [_pad_last(wh_r, H, H_pad), _pad_last(wh_z, H, H_pad),
             _pad_last(zcol, H, H_pad), _pad_last(wh_n, H, H_pad)], axis=1)
        w_fused = jnp.concatenate(
            [_pad_axis(w_top, 0, H, H_pad), _pad_axis(w_bot, 0, H, H_pad)],
            axis=0)                                                   # [2Hp, 4Hp]
        bx_r, bx_z, bx_n = bx[:, :H], bx[:, H:2 * H], bx[:, 2 * H:]
        bh_r, bh_z, bh_n = bh[:, :H], bh[:, H:2 * H], bh[:, 2 * H:]
        b_fused = jnp.concatenate(
            [_pad_last(bx_r + bh_r, H, H_pad), _pad_last(bx_z + bh_z, H, H_pad),
             _pad_last(bx_n, H, H_pad), _pad_last(bh_n, H, H_pad)], axis=1)
        fused_flat += [w_fused, b_fused]

    h0_p = _pad_axis(_pad_axis(initial_hidden_state.astype(f32), 1, B, B_pad),
                     2, H, H_pad)                                     # [L, B_pad, Hp]

    kernel = make_gru_seq_kernel(L, H_pad, t_chunk)

    in_specs = [
        pl.BlockSpec((t_chunk, B_pad, G3), lambda c: (c, 0, 0)),  # gx0 per chunk
        pl.BlockSpec((L, B_pad, H_pad), lambda c: (0, 0, 0)),     # initial hidden
        pl.BlockSpec((H_pad, G3), lambda c: (0, 0)),              # wh0
        pl.BlockSpec((1, G3), lambda c: (0, 0)),                  # bh0
    ]
    for _ in range(L - 1):
        in_specs.append(pl.BlockSpec((2 * H_pad, G4), lambda c: (0, 0)))
        in_specs.append(pl.BlockSpec((1, G4), lambda c: (0, 0)))

    out_specs = [
        pl.BlockSpec((t_chunk, B_pad, H_pad), lambda c: (c, 0, 0)),  # h_top
        pl.BlockSpec((L, B_pad, H_pad), lambda c: (0, 0, 0)),        # h_final
    ]
    out_shape = [
        jax.ShapeDtypeStruct((S, B_pad, H_pad), f32),
        jax.ShapeDtypeStruct((L, B_pad, H_pad), f32),
    ]

    # explicit VMEM budget (sized from actual residents with generous headroom)
    def _nbytes(shape):
        n = 1
        for d in shape:
            n *= int(d)
        return 4 * n
    est = (2 * _nbytes((t_chunk, B_pad, G3))
           + 2 * _nbytes((L, B_pad, H_pad))
           + 2 * (_nbytes((H_pad, G3)) + _nbytes((8, G3)))
           + 2 * (L - 1) * (_nbytes((2 * H_pad, G4)) + _nbytes((8, G4)))
           + 2 * _nbytes((t_chunk, B_pad, H_pad))
           + 2 * _nbytes((L, B_pad, H_pad))
           + _nbytes((L, B_pad, H_pad)))
    vmem_limit = min(max(4 * est, 32 * 1024 * 1024), 64 * 1024 * 1024)

    h_top_p, h_fin_p = pl.pallas_call(
        kernel,
        out_shape=out_shape,
        grid_spec=pltpu.PrefetchScalarGridSpec(
            num_scalar_prefetch=0,
            grid=(n_chunks,),
            in_specs=in_specs,
            out_specs=out_specs,
            scratch_shapes=[pltpu.VMEM((L, B_pad, H_pad), f32)],
        ),
        compiler_params=pltpu.CompilerParams(
            dimension_semantics=("arbitrary",),   # recurrent over time chunks
            vmem_limit_bytes=vmem_limit,
        ),
    )(gx0, h0_p, wh0_p, bh0_p, *fused_flat)

    # hoisted output projection: one big GEMM straight into the consumer
    # layout [B, S, V] (== torch.stack(logits_sequence, dim=1))
    h_top = h_top_p[:, :B, :H]                                      # [S, B, H]
    logits = jnp.einsum("sbh,hv->bsv", h_top, w_out.astype(f32)) + b_out.astype(f32)
    h_final = h_fin_p[:, :B, :H]
    return logits, h_final


# ------------------------------ pure-JAX reference ---------------------------

def rnn_forward_ref(tokens, initial_hidden_state, params):
    emb_table = params["embedding"]
    layer_ws = params["layers"]
    w_out, b_out = params["output"]
    B, S = tokens.shape
    L, _, H = initial_hidden_state.shape
    embeddings = jnp.take(emb_table, tokens, axis=0)  # [B, S, E]

    h = [initial_hidden_state[l] for l in range(L)]
    logits_seq = []
    for t in range(S):
        x = embeddings[:, t, :]
        for l, (wx, wh, bx, bh) in enumerate(layer_ws):
            gx = x @ wx + bx
            gh = h[l] @ wh + bh
            r = jax.nn.sigmoid(gx[:, :H] + gh[:, :H])
            z = jax.nn.sigmoid(gx[:, H:2 * H] + gh[:, H:2 * H])
            n = jnp.tanh(gx[:, 2 * H:] + r * gh[:, 2 * H:])
            h[l] = (1.0 - z) * n + z * h[l]
            x = h[l]
        logits_seq.append(x @ w_out + b_out)
    logits = jnp.stack(logits_seq, axis=1)
    return logits, jnp.stack(h, axis=0)


if __name__ == "__main__":
    B, S = 2, 8           # batch, truncated_backpropagation_length
    E = 16                # input_size (embedding dim)
    H = 32                # hidden_state_size
    L = 2                 # num_rnn_layers
    V = 64                # vocabulary_size

    key = jax.random.PRNGKey(0)
    ks = jax.random.split(key, 6 + 4 * L)

    tokens = jax.random.randint(ks[0], (B, S), 0, V, dtype=jnp.int32)
    processed_cnn_features = jax.random.normal(ks[1], (B, H), jnp.float32)
    initial_hidden_state = 0.1 * jax.random.normal(ks[2], (L, B, H), jnp.float32)

    emb_table = 0.1 * jax.random.normal(ks[3], (V, E), jnp.float32)
    layers = []
    for l in range(L):
        in_dim = E if l == 0 else H
        k0, k1, k2, k3 = jax.random.split(ks[4 + l], 4)
        wx = 0.1 * jax.random.normal(k0, (in_dim, 3 * H), jnp.float32)
        wh = 0.1 * jax.random.normal(k1, (H, 3 * H), jnp.float32)
        bx = 0.1 * jax.random.normal(k2, (1, 3 * H), jnp.float32)
        bh = 0.1 * jax.random.normal(k3, (1, 3 * H), jnp.float32)
        layers.append((wx, wh, bx, bh))
    w_out = 0.1 * jax.random.normal(ks[4 + L], (H, V), jnp.float32)
    b_out = 0.1 * jax.random.normal(ks[5 + L], (1, V), jnp.float32)

    params = {"embedding": emb_table, "layers": layers, "output": (w_out, b_out)}

    logits, h_final = rnn_forward(tokens, processed_cnn_features,
                                  initial_hidden_state, params, is_train=True)
    jax.block_until_ready((logits, h_final))

    # validate against pure-JAX reference
    ref_logits, ref_h = rnn_forward_ref(tokens, initial_hidden_state, params)
    assert logits.shape == (B, S, V) and h_final.shape == (L, B, H)
    assert jnp.allclose(logits, ref_logits, atol=1e-3, rtol=1e-3)
    assert jnp.allclose(h_final, ref_h, atol=1e-3, rtol=1e-3)

    print("KERNEL_OK")
</pallas_src>

<mosaic_0001>
module attributes {stable_mosaic.version = 11 : i64} {
  func.func @kernel(%arg0: i32, %arg1: memref<8x8x384xf32, #tpu.memory_space<vmem>>, %arg2: memref<2x8x128xf32, #tpu.memory_space<vmem>>, %arg3: memref<128x384xf32, #tpu.memory_space<vmem>>, %arg4: memref<1x384xf32, #tpu.memory_space<vmem>>, %arg5: memref<256x512xf32, #tpu.memory_space<vmem>>, %arg6: memref<1x512xf32, #tpu.memory_space<vmem>>, %arg7: memref<8x8x128xf32, #tpu.memory_space<vmem>>, %arg8: memref<2x8x128xf32, #tpu.memory_space<vmem>>, %arg9: memref<2x8x128xf32, #tpu.memory_space<vmem>>) attributes {dimension_semantics = [#tpu.dimension_semantics<arbitrary>], iteration_bounds = array<i64: 1>, scalar_prefetch = 0 : i64, scratch_operands = 1 : i64, tpu.core_type = #tpu.core_type<tc>, window_params = [{transform_indices = @transform_0, window_bounds = array<i64: 8, 8, 384>}, {pipeline_mode = #tpu.pipeline_mode<synchronous>, transform_indices = @transform_1, window_bounds = array<i64: 2, 8, 128>}, {pipeline_mode = #tpu.pipeline_mode<synchronous>, transform_indices = @transform_2, window_bounds = array<i64: 128, 384>}, {pipeline_mode = #tpu.pipeline_mode<synchronous>, transform_indices = @transform_3, window_bounds = array<i64: 1, 384>}, {pipeline_mode = #tpu.pipeline_mode<synchronous>, transform_indices = @transform_4, window_bounds = array<i64: 256, 512>}, {pipeline_mode = #tpu.pipeline_mode<synchronous>, transform_indices = @transform_5, window_bounds = array<i64: 1, 512>}, {transform_indices = @transform_6, window_bounds = array<i64: 8, 8, 128>}, {pipeline_mode = #tpu.pipeline_mode<synchronous>, transform_indices = @transform_7, window_bounds = array<i64: 2, 8, 128>}]} {
    %c0_i32 = arith.constant 0 : i32
    %0 = arith.cmpi eq, %arg0, %c0_i32 : i32
    %1 = arith.extui %0 : i1 to i32
    %c0_i32_0 = arith.constant 0 : i32
    %2 = arith.cmpi ne, %1, %c0_i32_0 : i32
    scf.if %2 {
      %c0_266 = arith.constant 0 : index
      %c0_267 = arith.constant 0 : index
      %c0_268 = arith.constant 0 : index
      %598 = vector.load %arg2[%c0_266, %c0_267, %c0_268] : memref<2x8x128xf32, #tpu.memory_space<vmem>>, vector<2x8x128xf32>
      %c0_269 = arith.constant 0 : index
      %c0_270 = arith.constant 0 : index
      %c0_271 = arith.constant 0 : index
      %599 = vector.load %arg9[%c0_269, %c0_270, %c0_271] : memref<2x8x128xf32, #tpu.memory_space<vmem>>, vector<2x8x128xf32>
      tpu.vector_store %arg9[%c0_269, %c0_270, %c0_271], %598 {strides = array<i32>} : memref<2x8x128xf32, #tpu.memory_space<vmem>>, vector<2x8x128xf32>,
    } else {
    }
    %c0 = arith.constant 0 : index
    %c0_1 = arith.constant 0 : index
    %c0_2 = arith.constant 0 : index
    %3 = vector.load %arg1[%c0, %c0_1, %c0_2] : memref<8x8x384xf32, #tpu.memory_space<vmem>>, vector<1x8x384xf32>
    %4 = vector.shape_cast %3 : vector<1x8x384xf32> to vector<8x384xf32>
    %c0_3 = arith.constant 0 : index
    %c0_4 = arith.constant 0 : index
    %c0_5 = arith.constant 0 : index
    %5 = vector.load %arg9[%c0_3, %c0_4, %c0_5] : memref<2x8x128xf32, #tpu.memory_space<vmem>>, vector<1x8x128xf32>
    %6 = vector.shape_cast %5 : vector<1x8x128xf32> to vector<8x128xf32>
    %c0_6 = arith.constant 0 : index
    %c0_7 = arith.constant 0 : index
    %7 = vector.load %arg3[%c0_6, %c0_7] : memref<128x384xf32, #tpu.memory_space<vmem>>, vector<128x384xf32>
    %cst = arith.constant dense<0.000000e+00> : vector<8x384xf32>
    %8 = tpu.matmul %6, %7, %cst {dimension_numbers = #tpu.dot_dimension_numbers<[1], [0], [0], [1], [0, 0, 1, 1], [], []>} : vector<8x128xf32>, vector<128x384xf32>, vector<8x384xf32> -> vector<8x384xf32>
    %c0_8 = arith.constant 0 : index
    %c0_9 = arith.constant 0 : index
    %9 = vector.load %arg4[%c0_8, %c0_9] : memref<1x384xf32, #tpu.memory_space<vmem>>, vector<1x384xf32>
    %10 = vector.broadcast %9 : vector<1x384xf32> to vector<8x384xf32>
    %11 = arith.addf %8, %10 : vector<8x384xf32>
    %12 = vector.extract_strided_slice %4 {offsets = [0, 0], sizes = [8, 128], strides = [1, 1]} : vector<8x384xf32> to vector<8x128xf32>
    %13 = vector.extract_strided_slice %11 {offsets = [0, 0], sizes = [8, 128], strides = [1, 1]} : vector<8x384xf32> to vector<8x128xf32>
    %14 = arith.addf %12, %13 : vector<8x128xf32>
    %15 = arith.negf %14 : vector<8x128xf32>
    %16 = math.exp %15 : vector<8x128xf32>
    %cst_10 = arith.constant 1.000000e+00 : f32
    %17 = vector.broadcast %cst_10 : f32 to vector<8x128xf32>
    %18 = arith.addf %17, %16 : vector<8x128xf32>
    %19 = arith.divf %17, %18 : vector<8x128xf32>
    %20 = vector.extract_strided_slice %4 {offsets = [0, 128], sizes = [8, 128], strides = [1, 1]} : vector<8x384xf32> to vector<8x128xf32>
    %21 = vector.extract_strided_slice %11 {offsets = [0, 128], sizes = [8, 128], strides = [1, 1]} : vector<8x384xf32> to vector<8x128xf32>
    %22 = arith.addf %20, %21 : vector<8x128xf32>
    %23 = arith.negf %22 : vector<8x128xf32>
    %24 = math.exp %23 : vector<8x128xf32>
    %cst_11 = arith.constant 1.000000e+00 : f32
    %25 = vector.broadcast %cst_11 : f32 to vector<8x128xf32>
    %26 = arith.addf %25, %24 : vector<8x128xf32>
    %27 = arith.divf %25, %26 : vector<8x128xf32>
    %28 = vector.extract_strided_slice %4 {offsets = [0, 256], sizes = [8, 128], strides = [1, 1]} : vector<8x384xf32> to vector<8x128xf32>
    %29 = vector.extract_strided_slice %11 {offsets = [0, 256], sizes = [8, 128], strides = [1, 1]} : vector<8x384xf32> to vector<8x128xf32>
    %30 = arith.mulf %19, %29 : vector<8x128xf32>
    %31 = arith.addf %28, %30 : vector<8x128xf32>
    %32 = math.tanh %31 : vector<8x128xf32>
    %cst_12 = arith.constant 1.000000e+00 : f32
    %33 = vector.broadcast %cst_12 : f32 to vector<8x128xf32>
    %34 = arith.subf %33, %27 : vector<8x128xf32>
    %35 = arith.mulf %34, %32 : vector<8x128xf32>
    %36 = arith.mulf %27, %6 : vector<8x128xf32>
    %37 = arith.addf %35, %36 : vector<8x128xf32>
    %c0_13 = arith.constant 0 : index
    %c0_14 = arith.constant 0 : index
    %c0_15 = arith.constant 0 : index
    %38 = vector.load %arg9[%c0_13, %c0_14, %c0_15] : memref<2x8x128xf32, #tpu.memory_space<vmem>>, vector<1x8x128xf32>
    %39 = vector.shape_cast %38 : vector<1x8x128xf32> to vector<8x128xf32>
    %40 = vector.shape_cast %37 : vector<8x128xf32> to vector<1x8x128xf32>
    tpu.vector_store %arg9[%c0_13, %c0_14, %c0_15], %40 {strides = array<i32>} : memref<2x8x128xf32, #tpu.memory_space<vmem>>, vector<1x8x128xf32>,
    %c1 = arith.constant 1 : index
    %c0_16 = arith.constant 0 : index
    %c0_17 = arith.constant 0 : index
    %41 = vector.load %arg9[%c1, %c0_16, %c0_17] : memref<2x8x128xf32, #tpu.memory_space<vmem>>, vector<1x8x128xf32>
    %42 = vector.shape_cast %41 : vector<1x8x128xf32> to vector<8x128xf32>
    %43 = tpu.concatenate %37, %42 in 1 : vector<8x128xf32>, vector<8x128xf32> -> vector<8x256xf32>
    %c0_18 = arith.constant 0 : index
    %c0_19 = arith.constant 0 : index
    %44 = vector.load %arg5[%c0_18, %c0_19] : memref<256x512xf32, #tpu.memory_space<vmem>>, vector<256x512xf32>
    %cst_20 = arith.constant dense<0.000000e+00> : vector<8x512xf32>
    %45 = tpu.matmul %43, %44, %cst_20 {dimension_numbers = #tpu.dot_dimension_numbers<[1], [0], [0], [1], [0, 0, 1, 1], [], []>} : vector<8x256xf32>, vector<256x512xf32>, vector<8x512xf32> -> vector<8x512xf32>
    %c0_21 = arith.constant 0 : index
    %c0_22 = arith.constant 0 : index
    %46 = vector.load %arg6[%c0_21, %c0_22] : memref<1x512xf32, #tpu.memory_space<vmem>>, vector<1x512xf32>
    %47 = vector.broadcast %46 : vector<1x512xf32> to vector<8x512xf32>
    %48 = arith.addf %45, %47 : vector<8x512xf32>
    %49 = vector.extract_strided_slice %48 {offsets = [0, 0], sizes = [8, 128], strides = [1, 1]} : vector<8x512xf32> to vector<8x128xf32>
    %50 = arith.negf %49 : vector<8x128xf32>
    %51 = math.exp %50 : vector<8x128xf32>
    %cst_23 = arith.constant 1.000000e+00 : f32
    %52 = vector.broadcast %cst_23 : f32 to vector<8x128xf32>
    %53 = arith.addf %52, %51 : vector<8x128xf32>
    %54 = arith.divf %52, %53 : vector<8x128xf32>
    %55 = vector.extract_strided_slice %48 {offsets = [0, 128], sizes = [8, 128], strides = [1, 1]} : vector<8x512xf32> to vector<8x128xf32>
    %56 = arith.negf %55 : vector<8x128xf32>
    %57 = math.exp %56 : vector<8x128xf32>
    %cst_24 = arith.constant 1.000000e+00 : f32
    %58 = vector.broadcast %cst_24 : f32 to vector<8x128xf32>
    %59 = arith.addf %58, %57 : vector<8x128xf32>
    %60 = arith.divf %58, %59 : vector<8x128xf32>
    %61 = vector.extract_strided_slice %48 {offsets = [0, 256], sizes = [8, 128], strides = [1, 1]} : vector<8x512xf32> to vector<8x128xf32>
    %62 = vector.extract_strided_slice %48 {offsets = [0, 384], sizes = [8, 128], strides = [1, 1]} : vector<8x512xf32> to vector<8x128xf32>
    %63 = arith.mulf %54, %62 : vector<8x128xf32>
    %64 = arith.addf %61, %63 : vector<8x128xf32>
    %65 = math.tanh %64 : vector<8x128xf32>
    %cst_25 = arith.constant 1.000000e+00 : f32
    %66 = vector.broadcast %cst_25 : f32 to vector<8x128xf32>
    %67 = arith.subf %66, %60 : vector<8x128xf32>
    %68 = arith.mulf %67, %65 : vector<8x128xf32>
    %69 = arith.mulf %60, %42 : vector<8x128xf32>
    %70 = arith.addf %68, %69 : vector<8x128xf32>
    %c1_26 = arith.constant 1 : index
    %c0_27 = arith.constant 0 : index
    %c0_28 = arith.constant 0 : index
    %71 = vector.load %arg9[%c1_26, %c0_27, %c0_28] : memref<2x8x128xf32, #tpu.memory_space<vmem>>, vector<1x8x128xf32>
    %72 = vector.shape_cast %71 : vector<1x8x128xf32> to vector<8x128xf32>
    %73 = vector.shape_cast %70 : vector<8x128xf32> to vector<1x8x128xf32>
    tpu.vector_store %arg9[%c1_26, %c0_27, %c0_28], %73 {strides = array<i32>} : memref<2x8x128xf32, #tpu.memory_space<vmem>>, vector<1x8x128xf32>,
    %c0_29 = arith.constant 0 : index
    %c0_30 = arith.constant 0 : index
    %c0_31 = arith.constant 0 : index
    %74 = vector.load %arg7[%c0_29, %c0_30, %c0_31] : memref<8x8x128xf32, #tpu.memory_space<vmem>>, vector<1x8x128xf32>
    %75 = vector.shape_cast %74 : vector<1x8x128xf32> to vector<8x128xf32>
    %76 = vector.shape_cast %70 : vector<8x128xf32> to vector<1x8x128xf32>
    tpu.vector_store %arg7[%c0_29, %c0_30, %c0_31], %76 {strides = array<i32>} : memref<8x8x128xf32, #tpu.memory_space<vmem>>, vector<1x8x128xf32>,
    %c1_32 = arith.constant 1 : index
    %c0_33 = arith.constant 0 : index
    %c0_34 = arith.constant 0 : index
    %77 = vector.load %arg1[%c1_32, %c0_33, %c0_34] : memref<8x8x384xf32, #tpu.memory_space<vmem>>, vector<1x8x384xf32>
    %78 = vector.shape_cast %77 : vector<1x8x384xf32> to vector<8x384xf32>
    %c0_35 = arith.constant 0 : index
    %c0_36 = arith.constant 0 : index
    %c0_37 = arith.constant 0 : index
    %79 = vector.load %arg9[%c0_35, %c0_36, %c0_37] : memref<2x8x128xf32, #tpu.memory_space<vmem>>, vector<1x8x128xf32>
    %80 = vector.shape_cast %79 : vector<1x8x128xf32> to vector<8x128xf32>
    %c0_38 = arith.constant 0 : index
    %c0_39 = arith.constant 0 : index
    %81 = vector.load %arg3[%c0_38, %c0_39] : memref<128x384xf32, #tpu.memory_space<vmem>>, vector<128x384xf32>
    %cst_40 = arith.constant dense<0.000000e+00> : vector<8x384xf32>
    %82 = tpu.matmul %80, %81, %cst_40 {dimension_numbers = #tpu.dot_dimension_numbers<[1], [0], [0], [1], [0, 0, 1, 1], [], []>} : vector<8x128xf32>, vector<128x384xf32>, vector<8x384xf32> -> vector<8x384xf32>
    %c0_41 = arith.constant 0 : index
    %c0_42 = arith.constant 0 : index
    %83 = vector.load %arg4[%c0_41, %c0_42] : memref<1x384xf32, #tpu.memory_space<vmem>>, vector<1x384xf32>
    %84 = vector.broadcast %83 : vector<1x384xf32> to vector<8x384xf32>
    %85 = arith.addf %82, %84 : vector<8x384xf32>
    %86 = vector.extract_strided_slice %78 {offsets = [0, 0], sizes = [8, 128], strides = [1, 1]} : vector<8x384xf32> to vector<8x128xf32>
    %87 = vector.extract_strided_slice %85 {offsets = [0, 0], sizes = [8, 128], strides = [1, 1]} : vector<8x384xf32> to vector<8x128xf32>
    %88 = arith.addf %86, %87 : vector<8x128xf32>
    %89 = arith.negf %88 : vector<8x128xf32>
    %90 = math.exp %89 : vector<8x128xf32>
    %cst_43 = arith.constant 1.000000e+00 : f32
    %91 = vector.broadcast %cst_43 : f32 to vector<8x128xf32>
    %92 = arith.addf %91, %90 : vector<8x128xf32>
    %93 = arith.divf %91, %92 : vector<8x128xf32>
    %94 = vector.extract_strided_slice %78 {offsets = [0, 128], sizes = [8, 128], strides = [1, 1]} : vector<8x384xf32> to vector<8x128xf32>
    %95 = vector.extract_strided_slice %85 {offsets = [0, 128], sizes = [8, 128], strides = [1, 1]} : vector<8x384xf32> to vector<8x128xf32>
    %96 = arith.addf %94, %95 : vector<8x128xf32>
    %97 = arith.negf %96 : vector<8x128xf32>
    %98 = math.exp %97 : vector<8x128xf32>
    %cst_44 = arith.constant 1.000000e+00 : f32
    %99 = vector.broadcast %cst_44 : f32 to vector<8x128xf32>
    %100 = arith.addf %99, %98 : vector<8x128xf32>
    %101 = arith.divf %99, %100 : vector<8x128xf32>
    %102 = vector.extract_strided_slice %78 {offsets = [0, 256], sizes = [8, 128], strides = [1, 1]} : vector<8x384xf32> to vector<8x128xf32>
    %103 = vector.extract_strided_slice %85 {offsets = [0, 256], sizes = [8, 128], strides = [1, 1]} : vector<8x384xf32> to vector<8x128xf32>
    %104 = arith.mulf %93, %103 : vector<8x128xf32>
    %105 = arith.addf %102, %104 : vector<8x128xf32>
    %106 = math.tanh %105 : vector<8x128xf32>
    %cst_45 = arith.constant 1.000000e+00 : f32
    %107 = vector.broadcast %cst_45 : f32 to vector<8x128xf32>
    %108 = arith.subf %107, %101 : vector<8x128xf32>
    %109 = arith.mulf %108, %106 : vector<8x128xf32>
    %110 = arith.mulf %101, %80 : vector<8x128xf32>
    %111 = arith.addf %109, %110 : vector<8x128xf32>
    %c0_46 = arith.constant 0 : index
    %c0_47 = arith.constant 0 : index
    %c0_48 = arith.constant 0 : index
    %112 = vector.load %arg9[%c0_46, %c0_47, %c0_48] : memref<2x8x128xf32, #tpu.memory_space<vmem>>, vector<1x8x128xf32>
    %113 = vector.shape_cast %112 : vector<1x8x128xf32> to vector<8x128xf32>
    %114 = vector.shape_cast %111 : vector<8x128xf32> to vector<1x8x128xf32>
    tpu.vector_store %arg9[%c0_46, %c0_47, %c0_48], %114 {strides = array<i32>} : memref<2x8x128xf32, #tpu.memory_space<vmem>>, vector<1x8x128xf32>,
    %c1_49 = arith.constant 1 : index
    %c0_50 = arith.constant 0 : index
    %c0_51 = arith.constant 0 : index
    %115 = vector.load %arg9[%c1_49, %c0_50, %c0_51] : memref<2x8x128xf32, #tpu.memory_space<vmem>>, vector<1x8x128xf32>
    %116 = vector.shape_cast %115 : vector<1x8x128xf32> to vector<8x128xf32>
    %117 = tpu.concatenate %111, %116 in 1 : vector<8x128xf32>, vector<8x128xf32> -> vector<8x256xf32>
    %c0_52 = arith.constant 0 : index
    %c0_53 = arith.constant 0 : index
    %118 = vector.load %arg5[%c0_52, %c0_53] : memref<256x512xf32, #tpu.memory_space<vmem>>, vector<256x512xf32>
    %cst_54 = arith.constant dense<0.000000e+00> : vector<8x512xf32>
    %119 = tpu.matmul %117, %118, %cst_54 {dimension_numbers = #tpu.dot_dimension_numbers<[1], [0], [0], [1], [0, 0, 1, 1], [], []>} : vector<8x256xf32>, vector<256x512xf32>, vector<8x512xf32> -> vector<8x512xf32>
    %c0_55 = arith.constant 0 : index
    %c0_56 = arith.constant 0 : index
    %120 = vector.load %arg6[%c0_55, %c0_56] : memref<1x512xf32, #tpu.memory_space<vmem>>, vector<1x512xf32>
    %121 = vector.broadcast %120 : vector<1x512xf32> to vector<8x512xf32>
    %122 = arith.addf %119, %121 : vector<8x512xf32>
    %123 = vector.extract_strided_slice %122 {offsets = [0, 0], sizes = [8, 128], strides = [1, 1]} : vector<8x512xf32> to vector<8x128xf32>
    %124 = arith.negf %123 : vector<8x128xf32>
    %125 = math.exp %124 : vector<8x128xf32>
    %cst_57 = arith.constant 1.000000e+00 : f32
    %126 = vector.broadcast %cst_57 : f32 to vector<8x128xf32>
    %127 = arith.addf %126, %125 : vector<8x128xf32>
    %128 = arith.divf %126, %127 : vector<8x128xf32>
    %129 = vector.extract_strided_slice %122 {offsets = [0, 128], sizes = [8, 128], strides = [1, 1]} : vector<8x512xf32> to vector<8x128xf32>
    %130 = arith.negf %129 : vector<8x128xf32>
    %131 = math.exp %130 : vector<8x128xf32>
    %cst_58 = arith.constant 1.000000e+00 : f32
    %132 = vector.broadcast %cst_58 : f32 to vector<8x128xf32>
    %133 = arith.addf %132, %131 : vector<8x128xf32>
    %134 = arith.divf %132, %133 : vector<8x128xf32>
    %135 = vector.extract_strided_slice %122 {offsets = [0, 256], sizes = [8, 128], strides = [1, 1]} : vector<8x512xf32> to vector<8x128xf32>
    %136 = vector.extract_strided_slice %122 {offsets = [0, 384], sizes = [8, 128], strides = [1, 1]} : vector<8x512xf32> to vector<8x128xf32>
    %137 = arith.mulf %128, %136 : vector<8x128xf32>
    %138 = arith.addf %135, %137 : vector<8x128xf32>
    %139 = math.tanh %138 : vector<8x128xf32>
    %cst_59 = arith.constant 1.000000e+00 : f32
    %140 = vector.broadcast %cst_59 : f32 to vector<8x128xf32>
    %141 = arith.subf %140, %134 : vector<8x128xf32>
    %142 = arith.mulf %141, %139 : vector<8x128xf32>
    %143 = arith.mulf %134, %116 : vector<8x128xf32>
    %144 = arith.addf %142, %143 : vector<8x128xf32>
    %c1_60 = arith.constant 1 : index
    %c0_61 = arith.constant 0 : index
    %c0_62 = arith.constant 0 : index
    %145 = vector.load %arg9[%c1_60, %c0_61, %c0_62] : memref<2x8x128xf32, #tpu.memory_space<vmem>>, vector<1x8x128xf32>
    %146 = vector.shape_cast %145 : vector<1x8x128xf32> to vector<8x128xf32>
    %147 = vector.shape_cast %144 : vector<8x128xf32> to vector<1x8x128xf32>
    tpu.vector_store %arg9[%c1_60, %c0_61, %c0_62], %147 {strides = array<i32>} : memref<2x8x128xf32, #tpu.memory_space<vmem>>, vector<1x8x128xf32>,
    %c1_63 = arith.constant 1 : index
    %c0_64 = arith.constant 0 : index
    %c0_65 = arith.constant 0 : index
    %148 = vector.load %arg7[%c1_63, %c0_64, %c0_65] : memref<8x8x128xf32, #tpu.memory_space<vmem>>, vector<1x8x128xf32>
    %149 = vector.shape_cast %148 : vector<1x8x128xf32> to vector<8x128xf32>
    %150 = vector.shape_cast %144 : vector<8x128xf32> to vector<1x8x128xf32>
    tpu.vector_store %arg7[%c1_63, %c0_64, %c0_65], %150 {strides = array<i32>} : memref<8x8x128xf32, #tpu.memory_space<vmem>>, vector<1x8x128xf32>,
    %c2 = arith.constant 2 : index
    %c0_66 = arith.constant 0 : index
    %c0_67 = arith.constant 0 : index
    %151 = vector.load %arg1[%c2, %c0_66, %c0_67] : memref<8x8x384xf32, #tpu.memory_space<vmem>>, vector<1x8x384xf32>
    %152 = vector.shape_cast %151 : vector<1x8x384xf32> to vector<8x384xf32>
    %c0_68 = arith.constant 0 : index
    %c0_69 = arith.constant 0 : index
    %c0_70 = arith.constant 0 : index
    %153 = vector.load %arg9[%c0_68, %c0_69, %c0_70] : memref<2x8x128xf32, #tpu.memory_space<vmem>>, vector<1x8x128xf32>
    %154 = vector.shape_cast %153 : vector<1x8x128xf32> to vector<8x128xf32>
    %c0_71 = arith.constant 0 : index
    %c0_72 = arith.constant 0 : index
    %155 = vector.load %arg3[%c0_71, %c0_72] : memref<128x384xf32, #tpu.memory_space<vmem>>, vector<128x384xf32>
    %cst_73 = arith.constant dense<0.000000e+00> : vector<8x384xf32>
    %156 = tpu.matmul %154, %155, %cst_73 {dimension_numbers = #tpu.dot_dimension_numbers<[1], [0], [0], [1], [0, 0, 1, 1], [], []>} : vector<8x128xf32>, vector<128x384xf32>, vector<8x384xf32> -> vector<8x384xf32>
    %c0_74 = arith.constant 0 : index
    %c0_75 = arith.constant 0 : index
    %157 = vector.load %arg4[%c0_74, %c0_75] : memref<1x384xf32, #tpu.memory_space<vmem>>, vector<1x384xf32>
    %158 = vector.broadcast %157 : vector<1x384xf32> to vector<8x384xf32>
    %159 = arith.addf %156, %158 : vector<8x384xf32>
    %160 = vector.extract_strided_slice %152 {offsets = [0, 0], sizes = [8, 128], strides = [1, 1]} : vector<8x384xf32> to vector<8x128xf32>
    %161 = vector.extract_strided_slice %159 {offsets = [0, 0], sizes = [8, 128], strides = [1, 1]} : vector<8x384xf32> to vector<8x128xf32>
    %162 = arith.addf %160, %161 : vector<8x128xf32>
    %163 = arith.negf %162 : vector<8x128xf32>
    %164 = math.exp %163 : vector<8x128xf32>
    %cst_76 = arith.constant 1.000000e+00 : f32
    %165 = vector.broadcast %cst_76 : f32 to vector<8x128xf32>
    %166 = arith.addf %165, %164 : vector<8x128xf32>
    %167 = arith.divf %165, %166 : vector<8x128xf32>
    %168 = vector.extract_strided_slice %152 {offsets = [0, 128], sizes = [8, 128], strides = [1, 1]} : vector<8x384xf32> to vector<8x128xf32>
    %169 = vector.extract_strided_slice %159 {offsets = [0, 128], sizes = [8, 128], strides = [1, 1]} : vector<8x384xf32> to vector<8x128xf32>
    %170 = arith.addf %168, %169 : vector<8x128xf32>
    %171 = arith.negf %170 : vector<8x128xf32>
    %172 = math.exp %171 : vector<8x128xf32>
    %cst_77 = arith.constant 1.000000e+00 : f32
    %173 = vector.broadcast %cst_77 : f32 to vector<8x128xf32>
    %174 = arith.addf %173, %172 : vector<8x128xf32>
    %175 = arith.divf %173, %174 : vector<8x128xf32>
    %176 = vector.extract_strided_slice %152 {offsets = [0, 256], sizes = [8, 128], strides = [1, 1]} : vector<8x384xf32> to vector<8x128xf32>
    %177 = vector.extract_strided_slice %159 {offsets = [0, 256], sizes = [8, 128], strides = [1, 1]} : vector<8x384xf32> to vector<8x128xf32>
    %178 = arith.mulf %167, %177 : vector<8x128xf32>
    %179 = arith.addf %176, %178 : vector<8x128xf32>
    %180 = math.tanh %179 : vector<8x128xf32>
    %cst_78 = arith.constant 1.000000e+00 : f32
    %181 = vector.broadcast %cst_78 : f32 to vector<8x128xf32>
    %182 = arith.subf %181, %175 : vector<8x128xf32>
    %183 = arith.mulf %182, %180 : vector<8x128xf32>
    %184 = arith.mulf %175, %154 : vector<8x128xf32>
    %185 = arith.addf %183, %184 : vector<8x128xf32>
    %c0_79 = arith.constant 0 : index
    %c0_80 = arith.constant 0 : index
    %c0_81 = arith.constant 0 : index
    %186 = vector.load %arg9[%c0_79, %c0_80, %c0_81] : memref<2x8x128xf32, #tpu.memory_space<vmem>>, vector<1x8x128xf32>
    %187 = vector.shape_cast %186 : vector<1x8x128xf32> to vector<8x128xf32>
    %188 = vector.shape_cast %185 : vector<8x128xf32> to vector<1x8x128xf32>
    tpu.vector_store %arg9[%c0_79, %c0_80, %c0_81], %188 {strides = array<i32>} : memref<2x8x128xf32, #tpu.memory_space<vmem>>, vector<1x8x128xf32>,
    %c1_82 = arith.constant 1 : index
    %c0_83 = arith.constant 0 : index
    %c0_84 = arith.constant 0 : index
    %189 = vector.load %arg9[%c1_82, %c0_83, %c0_84] : memref<2x8x128xf32, #tpu.memory_space<vmem>>, vector<1x8x128xf32>
    %190 = vector.shape_cast %189 : vector<1x8x128xf32> to vector<8x128xf32>
    %191 = tpu.concatenate %185, %190 in 1 : vector<8x128xf32>, vector<8x128xf32> -> vector<8x256xf32>
    %c0_85 = arith.constant 0 : index
    %c0_86 = arith.constant 0 : index
    %192 = vector.load %arg5[%c0_85, %c0_86] : memref<256x512xf32, #tpu.memory_space<vmem>>, vector<256x512xf32>
    %cst_87 = arith.constant dense<0.000000e+00> : vector<8x512xf32>
    %193 = tpu.matmul %191, %192, %cst_87 {dimension_numbers = #tpu.dot_dimension_numbers<[1], [0], [0], [1], [0, 0, 1, 1], [], []>} : vector<8x256xf32>, vector<256x512xf32>, vector<8x512xf32> -> vector<8x512xf32>
    %c0_88 = arith.constant 0 : index
    %c0_89 = arith.constant 0 : index
    %194 = vector.load %arg6[%c0_88, %c0_89] : memref<1x512xf32, #tpu.memory_space<vmem>>, vector<1x512xf32>
    %195 = vector.broadcast %194 : vector<1x512xf32> to vector<8x512xf32>
    %196 = arith.addf %193, %195 : vector<8x512xf32>
    %197 = vector.extract_strided_slice %196 {offsets = [0, 0], sizes = [8, 128], strides = [1, 1]} : vector<8x512xf32> to vector<8x128xf32>
    %198 = arith.negf %197 : vector<8x128xf32>
    %199 = math.exp %198 : vector<8x128xf32>
    %cst_90 = arith.constant 1.000000e+00 : f32
    %200 = vector.broadcast %cst_90 : f32 to vector<8x128xf32>
    %201 = arith.addf %200, %199 : vector<8x128xf32>
    %202 = arith.divf %200, %201 : vector<8x128xf32>
    %203 = vector.extract_strided_slice %196 {offsets = [0, 128], sizes = [8, 128], strides = [1, 1]} : vector<8x512xf32> to vector<8x128xf32>
    %204 = arith.negf %203 : vector<8x128xf32>
    %205 = math.exp %204 : vector<8x128xf32>
    %cst_91 = arith.constant 1.000000e+00 : f32
    %206 = vector.broadcast %cst_91 : f32 to vector<8x128xf32>
    %207 = arith.addf %206, %205 : vector<8x128xf32>
    %208 = arith.divf %206, %207 : vector<8x128xf32>
    %209 = vector.extract_strided_slice %196 {offsets = [0, 256], sizes = [8, 128], strides = [1, 1]} : vector<8x512xf32> to vector<8x128xf32>
    %210 = vector.extract_strided_slice %196 {offsets = [0, 384], sizes = [8, 128], strides = [1, 1]} : vector<8x512xf32> to vector<8x128xf32>
    %211 = arith.mulf %202, %210 : vector<8x128xf32>
    %212 = arith.addf %209, %211 : vector<8x128xf32>
    %213 = math.tanh %212 : vector<8x128xf32>
    %cst_92 = arith.constant 1.000000e+00 : f32
    %214 = vector.broadcast %cst_92 : f32 to vector<8x128xf32>
    %215 = arith.subf %214, %208 : vector<8x128xf32>
    %216 = arith.mulf %215, %213 : vector<8x128xf32>
    %217 = arith.mulf %208, %190 : vector<8x128xf32>
    %218 = arith.addf %216, %217 : vector<8x128xf32>
    %c1_93 = arith.constant 1 : index
    %c0_94 = arith.constant 0 : index
    %c0_95 = arith.constant 0 : index
    %219 = vector.load %arg9[%c1_93, %c0_94, %c0_95] : memref<2x8x128xf32, #tpu.memory_space<vmem>>, vector<1x8x128xf32>
    %220 = vector.shape_cast %219 : vector<1x8x128xf32> to vector<8x128xf32>
    %221 = vector.shape_cast %218 : vector<8x128xf32> to vector<1x8x128xf32>
    tpu.vector_store %arg9[%c1_93, %c0_94, %c0_95], %221 {strides = array<i32>} : memref<2x8x128xf32, #tpu.memory_space<vmem>>, vector<1x8x128xf32>,
    %c2_96 = arith.constant 2 : index
    %c0_97 = arith.constant 0 : index
    %c0_98 = arith.constant 0 : index
    %222 = vector.load %arg7[%c2_96, %c0_97, %c0_98] : memref<8x8x128xf32, #tpu.memory_space<vmem>>, vector<1x8x128xf32>
    %223 = vector.shape_cast %222 : vector<1x8x128xf32> to vector<8x128xf32>
    %224 = vector.shape_cast %218 : vector<8x128xf32> to vector<1x8x128xf32>
    tpu.vector_store %arg7[%c2_96, %c0_97, %c0_98], %224 {strides = array<i32>} : memref<8x8x128xf32, #tpu.memory_space<vmem>>, vector<1x8x128xf32>,
    %c3 = arith.constant 3 : index
    %c0_99 = arith.constant 0 : index
    %c0_100 = arith.constant 0 : index
    %225 = vector.load %arg1[%c3, %c0_99, %c0_100] : memref<8x8x384xf32, #tpu.memory_space<vmem>>, vector<1x8x384xf32>
    %226 = vector.shape_cast %225 : vector<1x8x384xf32> to vector<8x384xf32>
    %c0_101 = arith.constant 0 : index
    %c0_102 = arith.constant 0 : index
    %c0_103 = arith.constant 0 : index
    %227 = vector.load %arg9[%c0_101, %c0_102, %c0_103] : memref<2x8x128xf32, #tpu.memory_space<vmem>>, vector<1x8x128xf32>
    %228 = vector.shape_cast %227 : vector<1x8x128xf32> to vector<8x128xf32>
    %c0_104 = arith.constant 0 : index
    %c0_105 = arith.constant 0 : index
    %229 = vector.load %arg3[%c0_104, %c0_105] : memref<128x384xf32, #tpu.memory_space<vmem>>, vector<128x384xf32>
    %cst_106 = arith.constant dense<0.000000e+00> : vector<8x384xf32>
    %230 = tpu.matmul %228, %229, %cst_106 {dimension_numbers = #tpu.dot_dimension_numbers<[1], [0], [0], [1], [0, 0, 1, 1], [], []>} : vector<8x128xf32>, vector<128x384xf32>, vector<8x384xf32> -> vector<8x384xf32>
    %c0_107 = arith.constant 0 : index
    %c0_108 = arith.constant 0 : index
    %231 = vector.load %arg4[%c0_107, %c0_108] : memref<1x384xf32, #tpu.memory_space<vmem>>, vector<1x384xf32>
    %232 = vector.broadcast %231 : vector<1x384xf32> to vector<8x384xf32>
    %233 = arith.addf %230, %232 : vector<8x384xf32>
    %234 = vector.extract_strided_slice %226 {offsets = [0, 0], sizes = [8, 128], strides = [1, 1]} : vector<8x384xf32> to vector<8x128xf32>
    %235 = vector.extract_strided_slice %233 {offsets = [0, 0], sizes = [8, 128], strides = [1, 1]} : vector<8x384xf32> to vector<8x128xf32>
    %236 = arith.addf %234, %235 : vector<8x128xf32>
    %237 = arith.negf %236 : vector<8x128xf32>
    %238 = math.exp %237 : vector<8x128xf32>
    %cst_109 = arith.constant 1.000000e+00 : f32
    %239 = vector.broadcast %cst_109 : f32 to vector<8x128xf32>
    %240 = arith.addf %239, %238 : vector<8x128xf32>
    %241 = arith.divf %239, %240 : vector<8x128xf32>
    %242 = vector.extract_strided_slice %226 {offsets = [0, 128], sizes = [8, 128], strides = [1, 1]} : vector<8x384xf32> to vector<8x128xf32>
    %243 = vector.extract_strided_slice %233 {offsets = [0, 128], sizes = [8, 128], strides = [1, 1]} : vector<8x384xf32> to vector<8x128xf32>
    %244 = arith.addf %242, %243 : vector<8x128xf32>
    %245 = arith.negf %244 : vector<8x128xf32>
    %246 = math.exp %245 : vector<8x128xf32>
    %cst_110 = arith.constant 1.000000e+00 : f32
    %247 = vector.broadcast %cst_110 : f32 to vector<8x128xf32>
    %248 = arith.addf %247, %246 : vector<8x128xf32>
    %249 = arith.divf %247, %248 : vector<8x128xf32>
    %250 = vector.extract_strided_slice %226 {offsets = [0, 256], sizes = [8, 128], strides = [1, 1]} : vector<8x384xf32> to vector<8x128xf32>
    %251 = vector.extract_strided_slice %233 {offsets = [0, 256], sizes = [8, 128], strides = [1, 1]} : vector<8x384xf32> to vector<8x128xf32>
    %252 = arith.mulf %241, %251 : vector<8x128xf32>
    %253 = arith.addf %250, %252 : vector<8x128xf32>
    %254 = math.tanh %253 : vector<8x128xf32>
    %cst_111 = arith.constant 1.000000e+00 : f32
    %255 = vector.broadcast %cst_111 : f32 to vector<8x128xf32>
    %256 = arith.subf %255, %249 : vector<8x128xf32>
    %257 = arith.mulf %256, %254 : vector<8x128xf32>
    %258 = arith.mulf %249, %228 : vector<8x128xf32>
    %259 = arith.addf %257, %258 : vector<8x128xf32>
    %c0_112 = arith.constant 0 : index
    %c0_113 = arith.constant 0 : index
    %c0_114 = arith.constant 0 : index
    %260 = vector.load %arg9[%c0_112, %c0_113, %c0_114] : memref<2x8x128xf32, #tpu.memory_space<vmem>>, vector<1x8x128xf32>
    %261 = vector.shape_cast %260 : vector<1x8x128xf32> to vector<8x128xf32>
    %262 = vector.shape_cast %259 : vector<8x128xf32> to vector<1x8x128xf32>
    tpu.vector_store %arg9[%c0_112, %c0_113, %c0_114], %262 {strides = array<i32>} : memref<2x8x128xf32, #tpu.memory_space<vmem>>, vector<1x8x128xf32>,
    %c1_115 = arith.constant 1 : index
    %c0_116 = arith.constant 0 : index
    %c0_117 = arith.constant 0 : index
    %263 = vector.load %arg9[%c1_115, %c0_116, %c0_117] : memref<2x8x128xf32, #tpu.memory_space<vmem>>, vector<1x8x128xf32>
    %264 = vector.shape_cast %263 : vector<1x8x128xf32> to vector<8x128xf32>
    %265 = tpu.concatenate %259, %264 in 1 : vector<8x128xf32>, vector<8x128xf32> -> vector<8x256xf32>
    %c0_118 = arith.constant 0 : index
    %c0_119 = arith.constant 0 : index
    %266 = vector.load %arg5[%c0_118, %c0_119] : memref<256x512xf32, #tpu.memory_space<vmem>>, vector<256x512xf32>
    %cst_120 = arith.constant dense<0.000000e+00> : vector<8x512xf32>
    %267 = tpu.matmul %265, %266, %cst_120 {dimension_numbers = #tpu.dot_dimension_numbers<[1], [0], [0], [1], [0, 0, 1, 1], [], []>} : vector<8x256xf32>, vector<256x512xf32>, vector<8x512xf32> -> vector<8x512xf32>
    %c0_121 = arith.constant 0 : index
    %c0_122 = arith.constant 0 : index
    %268 = vector.load %arg6[%c0_121, %c0_122] : memref<1x512xf32, #tpu.memory_space<vmem>>, vector<1x512xf32>
    %269 = vector.broadcast %268 : vector<1x512xf32> to vector<8x512xf32>
    %270 = arith.addf %267, %269 : vector<8x512xf32>
    %271 = vector.extract_strided_slice %270 {offsets = [0, 0], sizes = [8, 128], strides = [1, 1]} : vector<8x512xf32> to vector<8x128xf32>
    %272 = arith.negf %271 : vector<8x128xf32>
    %273 = math.exp %272 : vector<8x128xf32>
    %cst_123 = arith.constant 1.000000e+00 : f32
    %274 = vector.broadcast %cst_123 : f32 to vector<8x128xf32>
    %275 = arith.addf %274, %273 : vector<8x128xf32>
    %276 = arith.divf %274, %275 : vector<8x128xf32>
    %277 = vector.extract_strided_slice %270 {offsets = [0, 128], sizes = [8, 128], strides = [1, 1]} : vector<8x512xf32> to vector<8x128xf32>
    %278 = arith.negf %277 : vector<8x128xf32>
    %279 = math.exp %278 : vector<8x128xf32>
    %cst_124 = arith.constant 1.000000e+00 : f32
    %280 = vector.broadcast %cst_124 : f32 to vector<8x128xf32>
    %281 = arith.addf %280, %279 : vector<8x128xf32>
    %282 = arith.divf %280, %281 : vector<8x128xf32>
    %283 = vector.extract_strided_slice %270 {offsets = [0, 256], sizes = [8, 128], strides = [1, 1]} : vector<8x512xf32> to vector<8x128xf32>
    %284 = vector.extract_strided_slice %270 {offsets = [0, 384], sizes = [8, 128], strides = [1, 1]} : vector<8x512xf32> to vector<8x128xf32>
    %285 = arith.mulf %276, %284 : vector<8x128xf32>
    %286 = arith.addf %283, %285 : vector<8x128xf32>
    %287 = math.tanh %286 : vector<8x128xf32>
    %cst_125 = arith.constant 1.000000e+00 : f32
    %288 = vector.broadcast %cst_125 : f32 to vector<8x128xf32>
    %289 = arith.subf %288, %282 : vector<8x128xf32>
    %290 = arith.mulf %289, %287 : vector<8x128xf32>
    %291 = arith.mulf %282, %264 : vector<8x128xf32>
    %292 = arith.addf %290, %291 : vector<8x128xf32>
    %c1_126 = arith.constant 1 : index
    %c0_127 = arith.constant 0 : index
    %c0_128 = arith.constant 0 : index
    %293 = vector.load %arg9[%c1_126, %c0_127, %c0_128] : memref<2x8x128xf32, #tpu.memory_space<vmem>>, vector<1x8x128xf32>
    %294 = vector.shape_cast %293 : vector<1x8x128xf32> to vector<8x128xf32>
    %295 = vector.shape_cast %292 : vector<8x128xf32> to vector<1x8x128xf32>
    tpu.vector_store %arg9[%c1_126, %c0_127, %c0_128], %295 {strides = array<i32>} : memref<2x8x128xf32, #tpu.memory_space<vmem>>, vector<1x8x128xf32>,
    %c3_129 = arith.constant 3 : index
    %c0_130 = arith.constant 0 : index
    %c0_131 = arith.constant 0 : index
    %296 = vector.load %arg7[%c3_129, %c0_130, %c0_131] : memref<8x8x128xf32, #tpu.memory_space<vmem>>, vector<1x8x128xf32>
    %297 = vector.shape_cast %296 : vector<1x8x128xf32> to vector<8x128xf32>
    %298 = vector.shape_cast %292 : vector<8x128xf32> to vector<1x8x128xf32>
    tpu.vector_store %arg7[%c3_129, %c0_130, %c0_131], %298 {strides = array<i32>} : memref<8x8x128xf32, #tpu.memory_space<vmem>>, vector<1x8x128xf32>,
    %c4 = arith.constant 4 : index
    %c0_132 = arith.constant 0 : index
    %c0_133 = arith.constant 0 : index
    %299 = vector.load %arg1[%c4, %c0_132, %c0_133] : memref<8x8x384xf32, #tpu.memory_space<vmem>>, vector<1x8x384xf32>
    %300 = vector.shape_cast %299 : vector<1x8x384xf32> to vector<8x384xf32>
    %c0_134 = arith.constant 0 : index
    %c0_135 = arith.constant 0 : index
    %c0_136 = arith.constant 0 : index
    %301 = vector.load %arg9[%c0_134, %c0_135, %c0_136] : memref<2x8x128xf32, #tpu.memory_space<vmem>>, vector<1x8x128xf32>
    %302 = vector.shape_cast %301 : vector<1x8x128xf32> to vector<8x128xf32>
    %c0_137 = arith.constant 0 : index
    %c0_138 = arith.constant 0 : index
    %303 = vector.load %arg3[%c0_137, %c0_138] : memref<128x384xf32, #tpu.memory_space<vmem>>, vector<128x384xf32>
    %cst_139 = arith.constant dense<0.000000e+00> : vector<8x384xf32>
    %304 = tpu.matmul %302, %303, %cst_139 {dimension_numbers = #tpu.dot_dimension_numbers<[1], [0], [0], [1], [0, 0, 1, 1], [], []>} : vector<8x128xf32>, vector<128x384xf32>, vector<8x384xf32> -> vector<8x384xf32>
    %c0_140 = arith.constant 0 : index
    %c0_141 = arith.constant 0 : index
    %305 = vector.load %arg4[%c0_140, %c0_141] : memref<1x384xf32, #tpu.memory_space<vmem>>, vector<1x384xf32>
    %306 = vector.broadcast %305 : vector<1x384xf32> to vector<8x384xf32>
    %307 = arith.addf %304, %306 : vector<8x384xf32>
    %308 = vector.extract_strided_slice %300 {offsets = [0, 0], sizes = [8, 128], strides = [1, 1]} : vector<8x384xf32> to vector<8x128xf32>
    %309 = vector.extract_strided_slice %307 {offsets = [0, 0], sizes = [8, 128], strides = [1, 1]} : vector<8x384xf32> to vector<8x128xf32>
    %310 = arith.addf %308, %309 : vector<8x128xf32>
    %311 = arith.negf %310 : vector<8x128xf32>
    %312 = math.exp %311 : vector<8x128xf32>
    %cst_142 = arith.constant 1.000000e+00 : f32
    %313 = vector.broadcast %cst_142 : f32 to vector<8x128xf32>
    %314 = arith.addf %313, %312 : vector<8x128xf32>
    %315 = arith.divf %313, %314 : vector<8x128xf32>
    %316 = vector.extract_strided_slice %300 {offsets = [0, 128], sizes = [8, 128], strides = [1, 1]} : vector<8x384xf32> to vector<8x128xf32>
    %317 = vector.extract_strided_slice %307 {offsets = [0, 128], sizes = [8, 128], strides = [1, 1]} : vector<8x384xf32> to vector<8x128xf32>
    %318 = arith.addf %316, %317 : vector<8x128xf32>
    %319 = arith.negf %318 : vector<8x128xf32>
    %320 = math.exp %319 : vector<8x128xf32>
    %cst_143 = arith.constant 1.000000e+00 : f32
    %321 = vector.broadcast %cst_143 : f32 to vector<8x128xf32>
    %322 = arith.addf %321, %320 : vector<8x128xf32>
    %323 = arith.divf %321, %322 : vector<8x128xf32>
    %324 = vector.extract_strided_slice %300 {offsets = [0, 256], sizes = [8, 128], strides = [1, 1]} : vector<8x384xf32> to vector<8x128xf32>
    %325 = vector.extract_strided_slice %307 {offsets = [0, 256], sizes = [8, 128], strides = [1, 1]} : vector<8x384xf32> to vector<8x128xf32>
    %326 = arith.mulf %315, %325 : vector<8x128xf32>
    %327 = arith.addf %324, %326 : vector<8x128xf32>
    %328 = math.tanh %327 : vector<8x128xf32>
    %cst_144 = arith.constant 1.000000e+00 : f32
    %329 = vector.broadcast %cst_144 : f32 to vector<8x128xf32>
    %330 = arith.subf %329, %323 : vector<8x128xf32>
    %331 = arith.mulf %330, %328 : vector<8x128xf32>
    %332 = arith.mulf %323, %302 : vector<8x128xf32>
    %333 = arith.addf %331, %332 : vector<8x128xf32>
    %c0_145 = arith.constant 0 : index
    %c0_146 = arith.constant 0 : index
    %c0_147 = arith.constant 0 : index
    %334 = vector.load %arg9[%c0_145, %c0_146, %c0_147] : memref<2x8x128xf32, #tpu.memory_space<vmem>>, vector<1x8x128xf32>
    %335 = vector.shape_cast %334 : vector<1x8x128xf32> to vector<8x128xf32>
    %336 = vector.shape_cast %333 : vector<8x128xf32> to vector<1x8x128xf32>
    tpu.vector_store %arg9[%c0_145, %c0_146, %c0_147], %336 {strides = array<i32>} : memref<2x8x128xf32, #tpu.memory_space<vmem>>, vector<1x8x128xf32>,
    %c1_148 = arith.constant 1 : index
    %c0_149 = arith.constant 0 : index
    %c0_150 = arith.constant 0 : index
    %337 = vector.load %arg9[%c1_148, %c0_149, %c0_150] : memref<2x8x128xf32, #tpu.memory_space<vmem>>, vector<1x8x128xf32>
    %338 = vector.shape_cast %337 : vector<1x8x128xf32> to vector<8x128xf32>
    %339 = tpu.concatenate %333, %338 in 1 : vector<8x128xf32>, vector<8x128xf32> -> vector<8x256xf32>
    %c0_151 = arith.constant 0 : index
    %c0_152 = arith.constant 0 : index
    %340 = vector.load %arg5[%c0_151, %c0_152] : memref<256x512xf32, #tpu.memory_space<vmem>>, vector<256x512xf32>
    %cst_153 = arith.constant dense<0.000000e+00> : vector<8x512xf32>
    %341 = tpu.matmul %339, %340, %cst_153 {dimension_numbers = #tpu.dot_dimension_numbers<[1], [0], [0], [1], [0, 0, 1, 1], [], []>} : vector<8x256xf32>, vector<256x512xf32>, vector<8x512xf32> -> vector<8x512xf32>
    %c0_154 = arith.constant 0 : index
    %c0_155 = arith.constant 0 : index
    %342 = vector.load %arg6[%c0_154, %c0_155] : memref<1x512xf32, #tpu.memory_space<vmem>>, vector<1x512xf32>
    %343 = vector.broadcast %342 : vector<1x512xf32> to vector<8x512xf32>
    %344 = arith.addf %341, %343 : vector<8x512xf32>
    %345 = vector.extract_strided_slice %344 {offsets = [0, 0], sizes = [8, 128], strides = [1, 1]} : vector<8x512xf32> to vector<8x128xf32>
    %346 = arith.negf %345 : vector<8x128xf32>
    %347 = math.exp %346 : vector<8x128xf32>
    %cst_156 = arith.constant 1.000000e+00 : f32
    %348 = vector.broadcast %cst_156 : f32 to vector<8x128xf32>
    %349 = arith.addf %348, %347 : vector<8x128xf32>
    %350 = arith.divf %348, %349 : vector<8x128xf32>
    %351 = vector.extract_strided_slice %344 {offsets = [0, 128], sizes = [8, 128], strides = [1, 1]} : vector<8x512xf32> to vector<8x128xf32>
    %352 = arith.negf %351 : vector<8x128xf32>
    %353 = math.exp %352 : vector<8x128xf32>
    %cst_157 = arith.constant 1.000000e+00 : f32
    %354 = vector.broadcast %cst_157 : f32 to vector<8x128xf32>
    %355 = arith.addf %354, %353 : vector<8x128xf32>
    %356 = arith.divf %354, %355 : vector<8x128xf32>
    %357 = vector.extract_strided_slice %344 {offsets = [0, 256], sizes = [8, 128], strides = [1, 1]} : vector<8x512xf32> to vector<8x128xf32>
    %358 = vector.extract_strided_slice %344 {offsets = [0, 384], sizes = [8, 128], strides = [1, 1]} : vector<8x512xf32> to vector<8x128xf32>
    %359 = arith.mulf %350, %358 : vector<8x128xf32>
    %360 = arith.addf %357, %359 : vector<8x128xf32>
    %361 = math.tanh %360 : vector<8x128xf32>
    %cst_158 = arith.constant 1.000000e+00 : f32
    %362 = vector.broadcast %cst_158 : f32 to vector<8x128xf32>
    %363 = arith.subf %362, %356 : vector<8x128xf32>
    %364 = arith.mulf %363, %361 : vector<8x128xf32>
    %365 = arith.mulf %356, %338 : vector<8x128xf32>
    %366 = arith.addf %364, %365 : vector<8x128xf32>
    %c1_159 = arith.constant 1 : index
    %c0_160 = arith.constant 0 : index
    %c0_161 = arith.constant 0 : index
    %367 = vector.load %arg9[%c1_159, %c0_160, %c0_161] : memref<2x8x128xf32, #tpu.memory_space<vmem>>, vector<1x8x128xf32>
    %368 = vector.shape_cast %367 : vector<1x8x128xf32> to vector<8x128xf32>
    %369 = vector.shape_cast %366 : vector<8x128xf32> to vector<1x8x128xf32>
    tpu.vector_store %arg9[%c1_159, %c0_160, %c0_161], %369 {strides = array<i32>} : memref<2x8x128xf32, #tpu.memory_space<vmem>>, vector<1x8x128xf32>,
    %c4_162 = arith.constant 4 : index
    %c0_163 = arith.constant 0 : index
    %c0_164 = arith.constant 0 : index
    %370 = vector.load %arg7[%c4_162, %c0_163, %c0_164] : memref<8x8x128xf32, #tpu.memory_space<vmem>>, vector<1x8x128xf32>
    %371 = vector.shape_cast %370 : vector<1x8x128xf32> to vector<8x128xf32>
    %372 = vector.shape_cast %366 : vector<8x128xf32> to vector<1x8x128xf32>
    tpu.vector_store %arg7[%c4_162, %c0_163, %c0_164], %372 {strides = array<i32>} : memref<8x8x128xf32, #tpu.memory_space<vmem>>, vector<1x8x128xf32>,
    %c5 = arith.constant 5 : index
    %c0_165 = arith.constant 0 : index
    %c0_166 = arith.constant 0 : index
    %373 = vector.load %arg1[%c5, %c0_165, %c0_166] : memref<8x8x384xf32, #tpu.memory_space<vmem>>, vector<1x8x384xf32>
    %374 = vector.shape_cast %373 : vector<1x8x384xf32> to vector<8x384xf32>
    %c0_167 = arith.constant 0 : index
    %c0_168 = arith.constant 0 : index
    %c0_169 = arith.constant 0 : index
    %375 = vector.load %arg9[%c0_167, %c0_168, %c0_169] : memref<2x8x128xf32, #tpu.memory_space<vmem>>, vector<1x8x128xf32>
    %376 = vector.shape_cast %375 : vector<1x8x128xf32> to vector<8x128xf32>
    %c0_170 = arith.constant 0 : index
    %c0_171 = arith.constant 0 : index
    %377 = vector.load %arg3[%c0_170, %c0_171] : memref<128x384xf32, #tpu.memory_space<vmem>>, vector<128x384xf32>
    %cst_172 = arith.constant dense<0.000000e+00> : vector<8x384xf32>
    %378 = tpu.matmul %376, %377, %cst_172 {dimension_numbers = #tpu.dot_dimension_numbers<[1], [0], [0], [1], [0, 0, 1, 1], [], []>} : vector<8x128xf32>, vector<128x384xf32>, vector<8x384xf32> -> vector<8x384xf32>
    %c0_173 = arith.constant 0 : index
    %c0_174 = arith.constant 0 : index
    %379 = vector.load %arg4[%c0_173, %c0_174] : memref<1x384xf32, #tpu.memory_space<vmem>>, vector<1x384xf32>
    %380 = vector.broadcast %379 : vector<1x384xf32> to vector<8x384xf32>
    %381 = arith.addf %378, %380 : vector<8x384xf32>
    %382 = vector.extract_strided_slice %374 {offsets = [0, 0], sizes = [8, 128], strides = [1, 1]} : vector<8x384xf32> to vector<8x128xf32>
    %383 = vector.extract_strided_slice %381 {offsets = [0, 0], sizes = [8, 128], strides = [1, 1]} : vector<8x384xf32> to vector<8x128xf32>
    %384 = arith.addf %382, %383 : vector<8x128xf32>
    %385 = arith.negf %384 : vector<8x128xf32>
    %386 = math.exp %385 : vector<8x128xf32>
    %cst_175 = arith.constant 1.000000e+00 : f32
    %387 = vector.broadcast %cst_175 : f32 to vector<8x128xf32>
    %388 = arith.addf %387, %386 : vector<8x128xf32>
    %389 = arith.divf %387, %388 : vector<8x128xf32>
    %390 = vector.extract_strided_slice %374 {offsets = [0, 128], sizes = [8, 128], strides = [1, 1]} : vector<8x384xf32> to vector<8x128xf32>
    %391 = vector.extract_strided_slice %381 {offsets = [0, 128], sizes = [8, 128], strides = [1, 1]} : vector<8x384xf32> to vector<8x128xf32>
    %392 = arith.addf %390, %391 : vector<8x128xf32>
    %393 = arith.negf %392 : vector<8x128xf32>
    %394 = math.exp %393 : vector<8x128xf32>
    %cst_176 = arith.constant 1.000000e+00 : f32
    %395 = vector.broadcast %cst_176 : f32 to vector<8x128xf32>
    %396 = arith.addf %395, %394 : vector<8x128xf32>
    %397 = arith.divf %395, %396 : vector<8x128xf32>
    %398 = vector.extract_strided_slice %374 {offsets = [0, 256], sizes = [8, 128], strides = [1, 1]} : vector<8x384xf32> to vector<8x128xf32>
    %399 = vector.extract_strided_slice %381 {offsets = [0, 256], sizes = [8, 128], strides = [1, 1]} : vector<8x384xf32> to vector<8x128xf32>
    %400 = arith.mulf %389, %399 : vector<8x128xf32>
    %401 = arith.addf %398, %400 : vector<8x128xf32>
    %402 = math.tanh %401 : vector<8x128xf32>
    %cst_177 = arith.constant 1.000000e+00 : f32
    %403 = vector.broadcast %cst_177 : f32 to vector<8x128xf32>
    %404 = arith.subf %403, %397 : vector<8x128xf32>
    %405 = arith.mulf %404, %402 : vector<8x128xf32>
    %406 = arith.mulf %397, %376 : vector<8x128xf32>
    %407 = arith.addf %405, %406 : vector<8x128xf32>
    %c0_178 = arith.constant 0 : index
    %c0_179 = arith.constant 0 : index
    %c0_180 = arith.constant 0 : index
    %408 = vector.load %arg9[%c0_178, %c0_179, %c0_180] : memref<2x8x128xf32, #tpu.memory_space<vmem>>, vector<1x8x128xf32>
    %409 = vector.shape_cast %408 : vector<1x8x128xf32> to vector<8x128xf32>
    %410 = vector.shape_cast %407 : vector<8x128xf32> to vector<1x8x128xf32>
    tpu.vector_store %arg9[%c0_178, %c0_179, %c0_180], %410 {strides = array<i32>} : memref<2x8x128xf32, #tpu.memory_space<vmem>>, vector<1x8x128xf32>,
    %c1_181 = arith.constant 1 : index
    %c0_182 = arith.constant 0 : index
    %c0_183 = arith.constant 0 : index
    %411 = vector.load %arg9[%c1_181, %c0_182, %c0_183] : memref<2x8x128xf32, #tpu.memory_space<vmem>>, vector<1x8x128xf32>
    %412 = vector.shape_cast %411 : vector<1x8x128xf32> to vector<8x128xf32>
    %413 = tpu.concatenate %407, %412 in 1 : vector<8x128xf32>, vector<8x128xf32> -> vector<8x256xf32>
    %c0_184 = arith.constant 0 : index
    %c0_185 = arith.constant 0 : index
    %414 = vector.load %arg5[%c0_184, %c0_185] : memref<256x512xf32, #tpu.memory_space<vmem>>, vector<256x512xf32>
    %cst_186 = arith.constant dense<0.000000e+00> : vector<8x512xf32>
    %415 = tpu.matmul %413, %414, %cst_186 {dimension_numbers = #tpu.dot_dimension_numbers<[1], [0], [0], [1], [0, 0, 1, 1], [], []>} : vector<8x256xf32>, vector<256x512xf32>, vector<8x512xf32> -> vector<8x512xf32>
    %c0_187 = arith.constant 0 : index
    %c0_188 = arith.constant 0 : index
    %416 = vector.load %arg6[%c0_187, %c0_188] : memref<1x512xf32, #tpu.memory_space<vmem>>, vector<1x512xf32>
    %417 = vector.broadcast %416 : vector<1x512xf32> to vector<8x512xf32>
    %418 = arith.addf %415, %417 : vector<8x512xf32>
    %419 = vector.extract_strided_slice %418 {offsets = [0, 0], sizes = [8, 128], strides = [1, 1]} : vector<8x512xf32> to vector<8x128xf32>
    %420 = arith.negf %419 : vector<8x128xf32>
    %421 = math.exp %420 : vector<8x128xf32>
    %cst_189 = arith.constant 1.000000e+00 : f32
    %422 = vector.broadcast %cst_189 : f32 to vector<8x128xf32>
    %423 = arith.addf %422, %421 : vector<8x128xf32>
    %424 = arith.divf %422, %423 : vector<8x128xf32>
    %425 = vector.extract_strided_slice %418 {offsets = [0, 128], sizes = [8, 128], strides = [1, 1]} : vector<8x512xf32> to vector<8x128xf32>
    %426 = arith.negf %425 : vector<8x128xf32>
    %427 = math.exp %426 : vector<8x128xf32>
    %cst_190 = arith.constant 1.000000e+00 : f32
    %428 = vector.broadcast %cst_190 : f32 to vector<8x128xf32>
    %429 = arith.addf %428, %427 : vector<8x128xf32>
    %430 = arith.divf %428, %429 : vector<8x128xf32>
    %431 = vector.extract_strided_slice %418 {offsets = [0, 256], sizes = [8, 128], strides = [1, 1]} : vector<8x512xf32> to vector<8x128xf32>
    %432 = vector.extract_strided_slice %418 {offsets = [0, 384], sizes = [8, 128], strides = [1, 1]} : vector<8x512xf32> to vector<8x128xf32>
    %433 = arith.mulf %424, %432 : vector<8x128xf32>
    %434 = arith.addf %431, %433 : vector<8x128xf32>
    %435 = math.tanh %434 : vector<8x128xf32>
    %cst_191 = arith.constant 1.000000e+00 : f32
    %436 = vector.broadcast %cst_191 : f32 to vector<8x128xf32>
    %437 = arith.subf %436, %430 : vector<8x128xf32>
    %438 = arith.mulf %437, %435 : vector<8x128xf32>
    %439 = arith.mulf %430, %412 : vector<8x128xf32>
    %440 = arith.addf %438, %439 : vector<8x128xf32>
    %c1_192 = arith.constant 1 : index
    %c0_193 = arith.constant 0 : index
    %c0_194 = arith.constant 0 : index
    %441 = vector.load %arg9[%c1_192, %c0_193, %c0_194] : memref<2x8x128xf32, #tpu.memory_space<vmem>>, vector<1x8x128xf32>
    %442 = vector.shape_cast %441 : vector<1x8x128xf32> to vector<8x128xf32>
    %443 = vector.shape_cast %440 : vector<8x128xf32> to vector<1x8x128xf32>
    tpu.vector_store %arg9[%c1_192, %c0_193, %c0_194], %443 {strides = array<i32>} : memref<2x8x128xf32, #tpu.memory_space<vmem>>, vector<1x8x128xf32>,
    %c5_195 = arith.constant 5 : index
    %c0_196 = arith.constant 0 : index
    %c0_197 = arith.constant 0 : index
    %444 = vector.load %arg7[%c5_195, %c0_196, %c0_197] : memref<8x8x128xf32, #tpu.memory_space<vmem>>, vector<1x8x128xf32>
    %445 = vector.shape_cast %444 : vector<1x8x128xf32> to vector<8x128xf32>
    %446 = vector.shape_cast %440 : vector<8x128xf32> to vector<1x8x128xf32>
    tpu.vector_store %arg7[%c5_195, %c0_196, %c0_197], %446 {strides = array<i32>} : memref<8x8x128xf32, #tpu.memory_space<vmem>>, vector<1x8x128xf32>,
    %c6 = arith.constant 6 : index
    %c0_198 = arith.constant 0 : index
    %c0_199 = arith.constant 0 : index
    %447 = vector.load %arg1[%c6, %c0_198, %c0_199] : memref<8x8x384xf32, #tpu.memory_space<vmem>>, vector<1x8x384xf32>
    %448 = vector.shape_cast %447 : vector<1x8x384xf32> to vector<8x384xf32>
    %c0_200 = arith.constant 0 : index
    %c0_201 = arith.constant 0 : index
    %c0_202 = arith.constant 0 : index
    %449 = vector.load %arg9[%c0_200, %c0_201, %c0_202] : memref<2x8x128xf32, #tpu.memory_space<vmem>>, vector<1x8x128xf32>
    %450 = vector.shape_cast %449 : vector<1x8x128xf32> to vector<8x128xf32>
    %c0_203 = arith.constant 0 : index
    %c0_204 = arith.constant 0 : index
    %451 = vector.load %arg3[%c0_203, %c0_204] : memref<128x384xf32, #tpu.memory_space<vmem>>, vector<128x384xf32>
    %cst_205 = arith.constant dense<0.000000e+00> : vector<8x384xf32>
    %452 = tpu.matmul %450, %451, %cst_205 {dimension_numbers = #tpu.dot_dimension_numbers<[1], [0], [0], [1], [0, 0, 1, 1], [], []>} : vector<8x128xf32>, vector<128x384xf32>, vector<8x384xf32> -> vector<8x384xf32>
    %c0_206 = arith.constant 0 : index
    %c0_207 = arith.constant 0 : index
    %453 = vector.load %arg4[%c0_206, %c0_207] : memref<1x384xf32, #tpu.memory_space<vmem>>, vector<1x384xf32>
    %454 = vector.broadcast %453 : vector<1x384xf32> to vector<8x384xf32>
    %455 = arith.addf %452, %454 : vector<8x384xf32>
    %456 = vector.extract_strided_slice %448 {offsets = [0, 0], sizes = [8, 128], strides = [1, 1]} : vector<8x384xf32> to vector<8x128xf32>
    %457 = vector.extract_strided_slice %455 {offsets = [0, 0], sizes = [8, 128], strides = [1, 1]} : vector<8x384xf32> to vector<8x128xf32>
    %458 = arith.addf %456, %457 : vector<8x128xf32>
    %459 = arith.negf %458 : vector<8x128xf32>
    %460 = math.exp %459 : vector<8x128xf32>
    %cst_208 = arith.constant 1.000000e+00 : f32
    %461 = vector.broadcast %cst_208 : f32 to vector<8x128xf32>
    %462 = arith.addf %461, %460 : vector<8x128xf32>
    %463 = arith.divf %461, %462 : vector<8x128xf32>
    %464 = vector.extract_strided_slice %448 {offsets = [0, 128], sizes = [8, 128], strides = [1, 1]} : vector<8x384xf32> to vector<8x128xf32>
    %465 = vector.extract_strided_slice %455 {offsets = [0, 128], sizes = [8, 128], strides = [1, 1]} : vector<8x384xf32> to vector<8x128xf32>
    %466 = arith.addf %464, %465 : vector<8x128xf32>
    %467 = arith.negf %466 : vector<8x128xf32>
    %468 = math.exp %467 : vector<8x128xf32>
    %cst_209 = arith.constant 1.000000e+00 : f32
    %469 = vector.broadcast %cst_209 : f32 to vector<8x128xf32>
    %470 = arith.addf %469, %468 : vector<8x128xf32>
    %471 = arith.divf %469, %470 : vector<8x128xf32>
    %472 = vector.extract_strided_slice %448 {offsets = [0, 256], sizes = [8, 128], strides = [1, 1]} : vector<8x384xf32> to vector<8x128xf32>
    %473 = vector.extract_strided_slice %455 {offsets = [0, 256], sizes = [8, 128], strides = [1, 1]} : vector<8x384xf32> to vector<8x128xf32>
    %474 = arith.mulf %463, %473 : vector<8x128xf32>
    %475 = arith.addf %472, %474 : vector<8x128xf32>
    %476 = math.tanh %475 : vector<8x128xf32>
    %cst_210 = arith.constant 1.000000e+00 : f32
    %477 = vector.broadcast %cst_210 : f32 to vector<8x128xf32>
    %478 = arith.subf %477, %471 : vector<8x128xf32>
    %479 = arith.mulf %478, %476 : vector<8x128xf32>
    %480 = arith.mulf %471, %450 : vector<8x128xf32>
    %481 = arith.addf %479, %480 : vector<8x128xf32>
    %c0_211 = arith.constant 0 : index
    %c0_212 = arith.constant 0 : index
    %c0_213 = arith.constant 0 : index
    %482 = vector.load %arg9[%c0_211, %c0_212, %c0_213] : memref<2x8x128xf32, #tpu.memory_space<vmem>>, vector<1x8x128xf32>
    %483 = vector.shape_cast %482 : vector<1x8x128xf32> to vector<8x128xf32>
    %484 = vector.shape_cast %481 : vector<8x128xf32> to vector<1x8x128xf32>
    tpu.vector_store %arg9[%c0_211, %c0_212, %c0_213], %484 {strides = array<i32>} : memref<2x8x128xf32, #tpu.memory_space<vmem>>, vector<1x8x128xf32>,
    %c1_214 = arith.constant 1 : index
    %c0_215 = arith.constant 0 : index
    %c0_216 = arith.constant 0 : index
    %485 = vector.load %arg9[%c1_214, %c0_215, %c0_216] : memref<2x8x128xf32, #tpu.memory_space<vmem>>, vector<1x8x128xf32>
    %486 = vector.shape_cast %485 : vector<1x8x128xf32> to vector<8x128xf32>
    %487 = tpu.concatenate %481, %486 in 1 : vector<8x128xf32>, vector<8x128xf32> -> vector<8x256xf32>
    %c0_217 = arith.constant 0 : index
    %c0_218 = arith.constant 0 : index
    %488 = vector.load %arg5[%c0_217, %c0_218] : memref<256x512xf32, #tpu.memory_space<vmem>>, vector<256x512xf32>
    %cst_219 = arith.constant dense<0.000000e+00> : vector<8x512xf32>
    %489 = tpu.matmul %487, %488, %cst_219 {dimension_numbers = #tpu.dot_dimension_numbers<[1], [0], [0], [1], [0, 0, 1, 1], [], []>} : vector<8x256xf32>, vector<256x512xf32>, vector<8x512xf32> -> vector<8x512xf32>
    %c0_220 = arith.constant 0 : index
    %c0_221 = arith.constant 0 : index
    %490 = vector.load %arg6[%c0_220, %c0_221] : memref<1x512xf32, #tpu.memory_space<vmem>>, vector<1x512xf32>
    %491 = vector.broadcast %490 : vector<1x512xf32> to vector<8x512xf32>
    %492 = arith.addf %489, %491 : vector<8x512xf32>
    %493 = vector.extract_strided_slice %492 {offsets = [0, 0], sizes = [8, 128], strides = [1, 1]} : vector<8x512xf32> to vector<8x128xf32>
    %494 = arith.negf %493 : vector<8x128xf32>
    %495 = math.exp %494 : vector<8x128xf32>
    %cst_222 = arith.constant 1.000000e+00 : f32
    %496 = vector.broadcast %cst_222 : f32 to vector<8x128xf32>
    %497 = arith.addf %496, %495 : vector<8x128xf32>
    %498 = arith.divf %496, %497 : vector<8x128xf32>
    %499 = vector.extract_strided_slice %492 {offsets = [0, 128], sizes = [8, 128], strides = [1, 1]} : vector<8x512xf32> to vector<8x128xf32>
    %500 = arith.negf %499 : vector<8x128xf32>
    %501 = math.exp %500 : vector<8x128xf32>
    %cst_223 = arith.constant 1.000000e+00 : f32
    %502 = vector.broadcast %cst_223 : f32 to vector<8x128xf32>
    %503 = arith.addf %502, %501 : vector<8x128xf32>
    %504 = arith.divf %502, %503 : vector<8x128xf32>
    %505 = vector.extract_strided_slice %492 {offsets = [0, 256], sizes = [8, 128], strides = [1, 1]} : vector<8x512xf32> to vector<8x128xf32>
    %506 = vector.extract_strided_slice %492 {offsets = [0, 384], sizes = [8, 128], strides = [1, 1]} : vector<8x512xf32> to vector<8x128xf32>
    %507 = arith.mulf %498, %506 : vector<8x128xf32>
    %508 = arith.addf %505, %507 : vector<8x128xf32>
    %509 = math.tanh %508 : vector<8x128xf32>
    %cst_224 = arith.constant 1.000000e+00 : f32
    %510 = vector.broadcast %cst_224 : f32 to vector<8x128xf32>
    %511 = arith.subf %510, %504 : vector<8x128xf32>
    %512 = arith.mulf %511, %509 : vector<8x128xf32>
    %513 = arith.mulf %504, %486 : vector<8x128xf32>
    %514 = arith.addf %512, %513 : vector<8x128xf32>
    %c1_225 = arith.constant 1 : index
    %c0_226 = arith.constant 0 : index
    %c0_227 = arith.constant 0 : index
    %515 = vector.load %arg9[%c1_225, %c0_226, %c0_227] : memref<2x8x128xf32, #tpu.memory_space<vmem>>, vector<1x8x128xf32>
    %516 = vector.shape_cast %515 : vector<1x8x128xf32> to vector<8x128xf32>
    %517 = vector.shape_cast %514 : vector<8x128xf32> to vector<1x8x128xf32>
    tpu.vector_store %arg9[%c1_225, %c0_226, %c0_227], %517 {strides = array<i32>} : memref<2x8x128xf32, #tpu.memory_space<vmem>>, vector<1x8x128xf32>,
    %c6_228 = arith.constant 6 : index
    %c0_229 = arith.constant 0 : index
    %c0_230 = arith.constant 0 : index
    %518 = vector.load %arg7[%c6_228, %c0_229, %c0_230] : memref<8x8x128xf32, #tpu.memory_space<vmem>>, vector<1x8x128xf32>
    %519 = vector.shape_cast %518 : vector<1x8x128xf32> to vector<8x128xf32>
    %520 = vector.shape_cast %514 : vector<8x128xf32> to vector<1x8x128xf32>
    tpu.vector_store %arg7[%c6_228, %c0_229, %c0_230], %520 {strides = array<i32>} : memref<8x8x128xf32, #tpu.memory_space<vmem>>, vector<1x8x128xf32>,
    %c7 = arith.constant 7 : index
    %c0_231 = arith.constant 0 : index
    %c0_232 = arith.constant 0 : index
    %521 = vector.load %arg1[%c7, %c0_231, %c0_232] : memref<8x8x384xf32, #tpu.memory_space<vmem>>, vector<1x8x384xf32>
    %522 = vector.shape_cast %521 : vector<1x8x384xf32> to vector<8x384xf32>
    %c0_233 = arith.constant 0 : index
    %c0_234 = arith.constant 0 : index
    %c0_235 = arith.constant 0 : index
    %523 = vector.load %arg9[%c0_233, %c0_234, %c0_235] : memref<2x8x128xf32, #tpu.memory_space<vmem>>, vector<1x8x128xf32>
    %524 = vector.shape_cast %523 : vector<1x8x128xf32> to vector<8x128xf32>
    %c0_236 = arith.constant 0 : index
    %c0_237 = arith.constant 0 : index
    %525 = vector.load %arg3[%c0_236, %c0_237] : memref<128x384xf32, #tpu.memory_space<vmem>>, vector<128x384xf32>
    %cst_238 = arith.constant dense<0.000000e+00> : vector<8x384xf32>
    %526 = tpu.matmul %524, %525, %cst_238 {dimension_numbers = #tpu.dot_dimension_numbers<[1], [0], [0], [1], [0, 0, 1, 1], [], []>} : vector<8x128xf32>, vector<128x384xf32>, vector<8x384xf32> -> vector<8x384xf32>
    %c0_239 = arith.constant 0 : index
    %c0_240 = arith.constant 0 : index
    %527 = vector.load %arg4[%c0_239, %c0_240] : memref<1x384xf32, #tpu.memory_space<vmem>>, vector<1x384xf32>
    %528 = vector.broadcast %527 : vector<1x384xf32> to vector<8x384xf32>
    %529 = arith.addf %526, %528 : vector<8x384xf32>
    %530 = vector.extract_strided_slice %522 {offsets = [0, 0], sizes = [8, 128], strides = [1, 1]} : vector<8x384xf32> to vector<8x128xf32>
    %531 = vector.extract_strided_slice %529 {offsets = [0, 0], sizes = [8, 128], strides = [1, 1]} : vector<8x384xf32> to vector<8x128xf32>
    %532 = arith.addf %530, %531 : vector<8x128xf32>
    %533 = arith.negf %532 : vector<8x128xf32>
    %534 = math.exp %533 : vector<8x128xf32>
    %cst_241 = arith.constant 1.000000e+00 : f32
    %535 = vector.broadcast %cst_241 : f32 to vector<8x128xf32>
    %536 = arith.addf %535, %534 : vector<8x128xf32>
    %537 = arith.divf %535, %536 : vector<8x128xf32>
    %538 = vector.extract_strided_slice %522 {offsets = [0, 128], sizes = [8, 128], strides = [1, 1]} : vector<8x384xf32> to vector<8x128xf32>
    %539 = vector.extract_strided_slice %529 {offsets = [0, 128], sizes = [8, 128], strides = [1, 1]} : vector<8x384xf32> to vector<8x128xf32>
    %540 = arith.addf %538, %539 : vector<8x128xf32>
    %541 = arith.negf %540 : vector<8x128xf32>
    %542 = math.exp %541 : vector<8x128xf32>
    %cst_242 = arith.constant 1.000000e+00 : f32
    %543 = vector.broadcast %cst_242 : f32 to vector<8x128xf32>
    %544 = arith.addf %543, %542 : vector<8x128xf32>
    %545 = arith.divf %543, %544 : vector<8x128xf32>
    %546 = vector.extract_strided_slice %522 {offsets = [0, 256], sizes = [8, 128], strides = [1, 1]} : vector<8x384xf32> to vector<8x128xf32>
    %547 = vector.extract_strided_slice %529 {offsets = [0, 256], sizes = [8, 128], strides = [1, 1]} : vector<8x384xf32> to vector<8x128xf32>
    %548 = arith.mulf %537, %547 : vector<8x128xf32>
    %549 = arith.addf %546, %548 : vector<8x128xf32>
    %550 = math.tanh %549 : vector<8x128xf32>
    %cst_243 = arith.constant 1.000000e+00 : f32
    %551 = vector.broadcast %cst_243 : f32 to vector<8x128xf32>
    %552 = arith.subf %551, %545 : vector<8x128xf32>
    %553 = arith.mulf %552, %550 : vector<8x128xf32>
    %554 = arith.mulf %545, %524 : vector<8x128xf32>
    %555 = arith.addf %553, %554 : vector<8x128xf32>
    %c0_244 = arith.constant 0 : index
    %c0_245 = arith.constant 0 : index
    %c0_246 = arith.constant 0 : index
    %556 = vector.load %arg9[%c0_244, %c0_245, %c0_246] : memref<2x8x128xf32, #tpu.memory_space<vmem>>, vector<1x8x128xf32>
    %557 = vector.shape_cast %556 : vector<1x8x128xf32> to vector<8x128xf32>
    %558 = vector.shape_cast %555 : vector<8x128xf32> to vector<1x8x128xf32>
    tpu.vector_store %arg9[%c0_244, %c0_245, %c0_246], %558 {strides = array<i32>} : memref<2x8x128xf32, #tpu.memory_space<vmem>>, vector<1x8x128xf32>,
    %c1_247 = arith.constant 1 : index
    %c0_248 = arith.constant 0 : index
    %c0_249 = arith.constant 0 : index
    %559 = vector.load %arg9[%c1_247, %c0_248, %c0_249] : memref<2x8x128xf32, #tpu.memory_space<vmem>>, vector<1x8x128xf32>
    %560 = vector.shape_cast %559 : vector<1x8x128xf32> to vector<8x128xf32>
    %561 = tpu.concatenate %555, %560 in 1 : vector<8x128xf32>, vector<8x128xf32> -> vector<8x256xf32>
    %c0_250 = arith.constant 0 : index
    %c0_251 = arith.constant 0 : index
    %562 = vector.load %arg5[%c0_250, %c0_251] : memref<256x512xf32, #tpu.memory_space<vmem>>, vector<256x512xf32>
    %cst_252 = arith.constant dense<0.000000e+00> : vector<8x512xf32>
    %563 = tpu.matmul %561, %562, %cst_252 {dimension_numbers = #tpu.dot_dimension_numbers<[1], [0], [0], [1], [0, 0, 1, 1], [], []>} : vector<8x256xf32>, vector<256x512xf32>, vector<8x512xf32> -> vector<8x512xf32>
    %c0_253 = arith.constant 0 : index
    %c0_254 = arith.constant 0 : index
    %564 = vector.load %arg6[%c0_253, %c0_254] : memref<1x512xf32, #tpu.memory_space<vmem>>, vector<1x512xf32>
    %565 = vector.broadcast %564 : vector<1x512xf32> to vector<8x512xf32>
    %566 = arith.addf %563, %565 : vector<8x512xf32>
    %567 = vector.extract_strided_slice %566 {offsets = [0, 0], sizes = [8, 128], strides = [1, 1]} : vector<8x512xf32> to vector<8x128xf32>
    %568 = arith.negf %567 : vector<8x128xf32>
    %569 = math.exp %568 : vector<8x128xf32>
    %cst_255 = arith.constant 1.000000e+00 : f32
    %570 = vector.broadcast %cst_255 : f32 to vector<8x128xf32>
    %571 = arith.addf %570, %569 : vector<8x128xf32>
    %572 = arith.divf %570, %571 : vector<8x128xf32>
    %573 = vector.extract_strided_slice %566 {offsets = [0, 128], sizes = [8, 128], strides = [1, 1]} : vector<8x512xf32> to vector<8x128xf32>
    %574 = arith.negf %573 : vector<8x128xf32>
    %575 = math.exp %574 : vector<8x128xf32>
    %cst_256 = arith.constant 1.000000e+00 : f32
    %576 = vector.broadcast %cst_256 : f32 to vector<8x128xf32>
    %577 = arith.addf %576, %575 : vector<8x128xf32>
    %578 = arith.divf %576, %577 : vector<8x128xf32>
    %579 = vector.extract_strided_slice %566 {offsets = [0, 256], sizes = [8, 128], strides = [1, 1]} : vector<8x512xf32> to vector<8x128xf32>
    %580 = vector.extract_strided_slice %566 {offsets = [0, 384], sizes = [8, 128], strides = [1, 1]} : vector<8x512xf32> to vector<8x128xf32>
    %581 = arith.mulf %572, %580 : vector<8x128xf32>
    %582 = arith.addf %579, %581 : vector<8x128xf32>
    %583 = math.tanh %582 : vector<8x128xf32>
    %cst_257 = arith.constant 1.000000e+00 : f32
    %584 = vector.broadcast %cst_257 : f32 to vector<8x128xf32>
    %585 = arith.subf %584, %578 : vector<8x128xf32>
    %586 = arith.mulf %585, %583 : vector<8x128xf32>
    %587 = arith.mulf %578, %560 : vector<8x128xf32>
    %588 = arith.addf %586, %587 : vector<8x128xf32>
    %c1_258 = arith.constant 1 : index
    %c0_259 = arith.constant 0 : index
    %c0_260 = arith.constant 0 : index
    %589 = vector.load %arg9[%c1_258, %c0_259, %c0_260] : memref<2x8x128xf32, #tpu.memory_space<vmem>>, vector<1x8x128xf32>
    %590 = vector.shape_cast %589 : vector<1x8x128xf32> to vector<8x128xf32>
    %591 = vector.shape_cast %588 : vector<8x128xf32> to vector<1x8x128xf32>
    tpu.vector_store %arg9[%c1_258, %c0_259, %c0_260], %591 {strides = array<i32>} : memref<2x8x128xf32, #tpu.memory_space<vmem>>, vector<1x8x128xf32>,
    %c7_261 = arith.constant 7 : index
    %c0_262 = arith.constant 0 : index
    %c0_263 = arith.constant 0 : index
    %592 = vector.load %arg7[%c7_261, %c0_262, %c0_263] : memref<8x8x128xf32, #tpu.memory_space<vmem>>, vector<1x8x128xf32>
    %593 = vector.shape_cast %592 : vector<1x8x128xf32> to vector<8x128xf32>
    %594 = vector.shape_cast %588 : vector<8x128xf32> to vector<1x8x128xf32>
    tpu.vector_store %arg7[%c7_261, %c0_262, %c0_263], %594 {strides = array<i32>} : memref<8x8x128xf32, #tpu.memory_space<vmem>>, vector<1x8x128xf32>,
    %c0_i32_264 = arith.constant 0 : i32
    %595 = arith.cmpi eq, %arg0, %c0_i32_264 : i32
    %596 = arith.extui %595 : i1 to i32
    %c0_i32_265 = arith.constant 0 : i32
    %597 = arith.cmpi ne, %596, %c0_i32_265 : i32
    scf.if %597 {
      %c0_266 = arith.constant 0 : index
      %c0_267 = arith.constant 0 : index
      %c0_268 = arith.constant 0 : index
      %598 = vector.load %arg9[%c0_266, %c0_267, %c0_268] : memref<2x8x128xf32, #tpu.memory_space<vmem>>, vector<2x8x128xf32>
      %c0_269 = arith.constant 0 : index
      %c0_270 = arith.constant 0 : index
      %c0_271 = arith.constant 0 : index
      %599 = vector.load %arg8[%c0_269, %c0_270, %c0_271] : memref<2x8x128xf32, #tpu.memory_space<vmem>>, vector<2x8x128xf32>
      tpu.vector_store %arg8[%c0_269, %c0_270, %c0_271], %598 {strides = array<i32>} : memref<2x8x128xf32, #tpu.memory_space<vmem>>, vector<2x8x128xf32>,
    } else {
    }
    return
  }
  func.func @transform_0(%arg0: i32) -> (i32, i32, i32) {
    %c0_i32 = arith.constant 0 : i32
    %c0_i32_0 = arith.constant 0 : i32
    %c0_i32_1 = arith.constant 0 : i32
    return %arg0, %c0_i32, %c0_i32_0 : i32, i32, i32
  }
  func.func @transform_1(%arg0: i32) -> (i32, i32, i32) {
    %c0_i32 = arith.constant 0 : i32
    %c0_i32_0 = arith.constant 0 : i32
    %c0_i32_1 = arith.constant 0 : i32
    %c0_i32_2 = arith.constant 0 : i32
    return %c0_i32, %c0_i32_0, %c0_i32_1 : i32, i32, i32
  }
  func.func @transform_2(%arg0: i32) -> (i32, i32) {
    %c0_i32 = arith.constant 0 : i32
    %c0_i32_0 = arith.constant 0 : i32
    %c0_i32_1 = arith.constant 0 : i32
    return %c0_i32, %c0_i32_0 : i32, i32
  }
  func.func @transform_3(%arg0: i32) -> (i32, i32) {
    %c0_i32 = arith.constant 0 : i32
    %c0_i32_0 = arith.constant 0 : i32
    %c0_i32_1 = arith.constant 0 : i32
    return %c0_i32, %c0_i32_0 : i32, i32
  }
  func.func @transform_4(%arg0: i32) -> (i32, i32) {
    %c0_i32 = arith.constant 0 : i32
    %c0_i32_0 = arith.constant 0 : i32
    %c0_i32_1 = arith.constant 0 : i32
    return %c0_i32, %c0_i32_0 : i32, i32
  }
  func.func @transform_5(%arg0: i32) -> (i32, i32) {
    %c0_i32 = arith.constant 0 : i32
    %c0_i32_0 = arith.constant 0 : i32
    %c0_i32_1 = arith.constant 0 : i32
    return %c0_i32, %c0_i32_0 : i32, i32
  }
  func.func @transform_6(%arg0: i32) -> (i32, i32, i32) {
    %c0_i32 = arith.constant 0 : i32
    %c0_i32_0 = arith.constant 0 : i32
    %c0_i32_1 = arith.constant 0 : i32
    return %arg0, %c0_i32, %c0_i32_0 : i32, i32, i32
  }
  func.func @transform_7(%arg0: i32) -> (i32, i32, i32) {
    %c0_i32 = arith.constant 0 : i32
    %c0_i32_0 = arith.constant 0 : i32
    %c0_i32_1 = arith.constant 0 : i32
    %c0_i32_2 = arith.constant 0 : i32
    return %c0_i32, %c0_i32_0, %c0_i32_1 : i32, i32, i32
  }
}

</mosaic_0001>

<bundles_post_ra>
// kernel: tpu_custom_call.1
= control target key start
LH: loop header
LB: loop body
LE: loop exit
PB: predicated region body
PF: predicated region fallthrough
CT: control target
= control target key end

     0   :  { %13 = vsyncpa [#allocation4], 0  ;;  %s8611_s0 = inlined_call_operand.hbm [shape: f32[8,8,384], index: 0, kind: input, shape index: {}]   ;;  %s8612_s1 = inlined_call_operand.hbm [shape: f32[2,8,128], index: 1, kind: input, shape index: {}]   ;;  %s8613_s2 = inlined_call_operand.hbm [shape: f32[128,384], index: 2, kind: input, shape index: {}]   ;;  %s8614_s3 = inlined_call_operand.vmem [shape: f32[1,384], index: 3, kind: input, shape index: {}]   ;;  %s8615_s4 = inlined_call_operand.hbm [shape: f32[256,512], index: 4, kind: input, shape index: {}]   ;;  %s8616_s5 = inlined_call_operand.vmem [shape: f32[1,512], index: 5, kind: input, shape index: {}]   ;;  %s8617_s6 = inlined_call_operand.hbm [shape: f32[8,8,128], index: 6, kind: output, shape index: {0}]   ;;  %s8618_s7 = inlined_call_operand.hbm [shape: f32[2,8,128], index: 7, kind: output, shape index: {1}]  }
   0x1   :  { %14 = vsyncpa [#allocation7], 0 }
   0x2   :  { %15 = vsyncpa [#allocation10], 0 }
   0x3   :  { %16 = vsyncpa [#allocation5], 0 }
   0x4   :  { %17 = vsyncpa [#allocation13], 0  ;;  %s6752_s24 = smov [#allocation6]   ;;  %s6610_s28 = scalar_lea.hbm %s8612_s1, 256 }
   0x5   :  { %s35_s25 = sshll.u32 %s6752_s24, 4  ;;  %p6611_p0 = scmp.ne.s32.totalorder %s8612_s1, %s6610_s28  ;;  %s36_s25 = int_to_ptr.vmem [resolvable:$true] %s35_s25 }
   0x6   :  { %p6614_p1 = scmp.lt.u32.totalorder %s6610_s28, %s8612_s1 }
   0x8   :  { %p6616_p2 = pnand %p6614_p1, %p6611_p0 }
   0xa   :  { %6619 = shalt.err (!%p6616_p2)
}
   0xb   :  { %s6620_s10 = scalar_lea.vmem %s36_s25, 256  ;;  %p6625_p4 = scmp.lt.s32.totalorder %s36_s25, %s36_s25 }
   0xc   :  { %p6621_p3 = scmp.ne.s32.totalorder %s36_s25, %s6620_s10  ;;  %p6626_p5 = scmp.lt.s32.totalorder %s6620_s10, %s6620_s10 }
   0xe   :  { %p6627_p6 = por %p6626_p5, %p6625_p4 }
  0x10   :  { %p6628_p7 = pnand %p6627_p6, %p6621_p3 }
  0x12   :  { %6631 = shalt.err (!%p6628_p7)
}
  0x13   :  { %s6753_s11 = smov 128   ;;  %s6754_s12 = smov 8  }
  0x14   :  { %41 = dma.hbm_to_vmem [thread:$0]  %s8612_s1, 256, %s36_s25, [#allocation7], %s6753_s11, %s6753_s11, %s6754_s12  }
  0x15   :  { %s6755_s15 = smov [#allocation3]   ;;  %s6632_s19 = scalar_lea.hbm %s8611_s0, 3072 }
  0x16   :  { %s23_s16 = sshll.u32 %s6755_s15, 4  ;;  %p6633_p8 = scmp.ne.s32.totalorder %s8611_s0, %s6632_s19  ;;  %s24_s16 = int_to_ptr.vmem [resolvable:$true] %s23_s16 }
  0x17   :  { %p6636_p9 = scmp.lt.u32.totalorder %s6632_s19, %s8611_s0 }
  0x19   :  { %p6638_p10 = pnand %p6636_p9, %p6633_p8 }
  0x1b   :  { %6641 = shalt.err (!%p6638_p10)
}
  0x1c   :  { %s6642_s24 = scalar_lea.vmem %s24_s16, 3072  ;;  %p6647_p12 = scmp.lt.s32.totalorder %s24_s16, %s24_s16 }
  0x1d   :  { %p6643_p11 = scmp.ne.s32.totalorder %s24_s16, %s6642_s24  ;;  %p6648_p13 = scmp.lt.s32.totalorder %s6642_s24, %s6642_s24 }
  0x1f   :  { %p6649_p0 = por %p6648_p13, %p6647_p12 }
  0x21   :  { %p6650_p1 = pnand %p6649_p0, %p6643_p11 }
  0x23   :  { %6653 = shalt.err (!%p6650_p1)
}
  0x24   :  { %s6756_s1 = smov 384   ;;  %s6757_s25 = smov 24  }
  0x25   :  { %29 = dma.hbm_to_vmem [thread:$0]  %s8611_s0, 3072, %s24_s16, [#allocation4], %s6756_s1, %s6756_s1, %s6757_s25  }
  0x26   :  { %s6758_s28 = smov [#allocation8]   ;;  %s6759_s30 = smov [#allocation9]  }
  0x27   :  { %s47_s29 = sshll.u32 %s6758_s28, 4  ;;  %s61_s8 = sshll.u32 %s6759_s30, 4  ;;  %s48_s29 = int_to_ptr.vmem [resolvable:$true] %s47_s29  ;;  %s6834_s8 = int_to_ptr.vmem [resolvable:$true] %s61_s8 }
  0x28   :  { %s6654_s13 = scalar_lea.hbm %s8613_s2, 6144 }
  0x29   :  { %p6655_p2 = scmp.ne.s32.totalorder %s8613_s2, %s6654_s13  ;;  %p6658_p3 = scmp.lt.u32.totalorder %s6654_s13, %s8613_s2 }
  0x2b   :  { %p6660_p4 = pnand %p6658_p3, %p6655_p2 }
  0x2d   :  { %6663 = shalt.err (!%p6660_p4)
}
  0x2e   :  { %s6664_s0 = scalar_lea.vmem %s48_s29, 6144  ;;  %p6669_p6 = scmp.lt.s32.totalorder %s48_s29, %s48_s29 }
  0x2f   :  { %p6665_p5 = scmp.ne.s32.totalorder %s48_s29, %s6664_s0  ;;  %p6670_p7 = scmp.lt.s32.totalorder %s6664_s0, %s6664_s0 }
  0x31   :  { %p6671_p8 = por %p6670_p7, %p6669_p6 }
  0x33   :  { %p6672_p9 = pnand %p6671_p8, %p6665_p5 }
  0x35   :  { %6675 = shalt.err (!%p6672_p9)
}
  0x36   :  { %53 = dma.hbm_to_vmem [thread:$0]  %s8613_s2, 6144, %s48_s29, [#allocation7], %s6756_s1, %s6756_s1, %s6757_s25  }
  0x37   :  { %s6676_s22 = scalar_lea.hbm %s8615_s4, 16384 }
  0x38   :  { %p6677_p10 = scmp.ne.s32.totalorder %s8615_s4, %s6676_s22  ;;  %p6680_p11 = scmp.lt.u32.totalorder %s6676_s22, %s8615_s4 }
  0x3a   :  { %p6682_p12 = pnand %p6680_p11, %p6677_p10 }
  0x3c   :  { %6685 = shalt.err (!%p6682_p12)
}
  0x3d   :  { %s6686_s28 = scalar_lea.vmem %s6834_s8, 16384  ;;  %p6691_p0 = scmp.lt.s32.totalorder %s6834_s8, %s6834_s8 }
  0x3e   :  { %p6687_p13 = scmp.ne.s32.totalorder %s6834_s8, %s6686_s28  ;;  %p6692_p1 = scmp.lt.s32.totalorder %s6686_s28, %s6686_s28 }
  0x40   :  { %p6693_p2 = por %p6692_p1, %p6691_p0 }
  0x42   :  { %p6694_p3 = pnand %p6693_p2, %p6687_p13 }
  0x44   :  { %6697 = shalt.err (!%p6694_p3)
}
  0x45   :  { %s6760_s2 = smov 512   ;;  %s6761_s1 = smov 32  }
  0x46   :  { %67 = dma.hbm_to_vmem [thread:$0]  %s8615_s4, 16384, %s6834_s8, [#allocation10], %s6760_s2, %s6760_s2, %s6761_s1  }
  0x47   :  { %6742 = dma.done.wait [#allocation4], 3072  }
  0x48   :  { %6743 = vsyncadd [#allocation4], 4294964224 }
  0x49   :  { %6744 = dma.done.wait [#allocation7], 6400  }
  0x4a   :  { %6745 = vsyncadd [#allocation7], 4294960896 }
  0x4b   :  { %6746 = dma.done.wait [#allocation10], 16384  }
  0x4c   :  { %6747 = vsyncadd [#allocation10], 4294950912  ;;  %v8621_v0 = vmov 0.0|0.0   ;;  %v8619_v1 = vmov 0.0   ;;  %vm6764_vm0 = vmmov 0   ;;  %v95_v2 = vld [vmem:[#allocation8 + $0x8] sm:$0xff] }
  0x4d   :  { %4995 = vmatprep.subr.bf16.mxu1 %v8621_v0  ;;  %223 = vmatprep.mubr.f32.mxu0 %v8619_v1  ;;  %v98_v3 = vld [vmem:[#allocation8 + $0x20] sm:$0xff]  ;;  %v97_v6 = vld [vmem:[#allocation8 + $0x18] sm:$0xff]  ;;  %v104_v8 = vld [vmem:[#allocation8 + $0x50] sm:$0xff]  ;;  %s6766_s15 = smov [#allocation12]  }
  0x4e   :  { %4715 = vmatprep.mubr.msk.f32.mxu1 %vm6764_vm0, %v8619_v1  ;;  %v94_v4 = vld [vmem:[#allocation8] sm:$0xff]  ;;  %v6869_v5 = vpack.c.bf16 %v98_v3, %v95_v2  ;;  %v101_v7 = vld [vmem:[#allocation8 + $0x38] sm:$0xff]  ;;  %v100_v11 = vld [vmem:[#allocation8 + $0x30] sm:$0xff]  ;;  %s4497_s17 = sshll.u32 %s6766_s15, 4  ;;  %s8574_s17 = int_to_ptr.vmem [resolvable:$true] %s4497_s17 }
  0x4f   :  { %v6871_v9 = vpack.c.bf16 %v97_v6, %v94_v4  ;;  %v6873_v10 = vpack.c.bf16 %v104_v8, %v101_v7  ;;  %v103_v12 = vld [vmem:[#allocation8 + $0x48] sm:$0xff]  ;;  %v110_v14 = vld [vmem:[#allocation8 + $0x80] sm:$0xff]  ;;  %v109_v18 = vld [vmem:[#allocation8 + $0x78] sm:$0xff] }
  0x50   :  { %v107_v13 = vld [vmem:[#allocation8 + $0x68] sm:$0xff]  ;;  %4964 = vmatprep.subr.bf16.mxu0 %v6869_v5  ;;  %v6877_v15 = vpack.c.bf16 %v103_v12, %v100_v11  ;;  %v106_v17 = vld [vmem:[#allocation8 + $0x60] sm:$0xff]  ;;  %v113_v19 = vld [vmem:[#allocation8 + $0x98] sm:$0xff] }
  0x51   :  { %4966 = vmatpush1.bf16.msra.mxu0 %v6871_v9  ;;  %v6880_v16 = vpack.c.bf16 %v110_v14, %v107_v13  ;;  %v116_v20 = vld [vmem:[#allocation8 + $0xb0] sm:$0xff]  ;;  %v6883_v21 = vpack.c.bf16 %v109_v18, %v106_v17  ;;  %v115_v24 = vld [vmem:[#allocation8 + $0xa8] sm:$0xff]  ;;  %v122_v26 = vld [vmem:[#allocation8 + $0xe0] sm:$0xff] }
  0x52   :  { %4968 = vmatprep.subr.bf16.mxu0 %v6873_v10  ;;  %v6886_v22 = vpack.c.bf16 %v116_v20, %v113_v19  ;;  %v112_v23 = vld [vmem:[#allocation8 + $0x90] sm:$0xff]  ;;  %v119_v25 = vld [vmem:[#allocation8 + $0xc8] sm:$0xff]  ;;  %v102_v30 = vld [vmem:[#allocation8 + $0x40] sm:$0xff] }
  0x53   :  { %v96_v27 = vld [vmem:[#allocation8 + $0x10] sm:$0xff]  ;;  %v99_v28 = vld [vmem:[#allocation8 + $0x28] sm:$0xff]  ;;  %v6891_v31 = vpack.c.bf16 %v115_v24, %v112_v23  ;;  %v105_v32 = vld [vmem:[#allocation8 + $0x58] sm:$0xff]  ;;  %v6894_v33 = vpack.c.bf16 %v122_v26, %v119_v25 }
  0x54   :  { %v6888_v29 = vpack.c.bf16 %v99_v28, %v96_v27  ;;  %v118_v34 = vld [vmem:[#allocation8 + $0xc0] sm:$0xff]  ;;  %v121_v35 = vld [vmem:[#allocation8 + $0xd8] sm:$0xff]  ;;  %v6897_v37 = vpack.c.bf16 %v105_v32, %v102_v30  ;;  %v128_v38 = vld [vmem:[#allocation8 + $0x110] sm:$0xff] }
  0x55   :  { %4970 = vmatpush1.bf16.msra.mxu0 %v6877_v15  ;;  %v125_v36 = vld [vmem:[#allocation8 + $0xf8] sm:$0xff]  ;;  %v108_v39 = vld [vmem:[#allocation8 + $0x70] sm:$0xff]  ;;  %v111_v40 = vld [vmem:[#allocation8 + $0x88] sm:$0xff]  ;;  %v6901_v41 = vpack.c.bf16 %v121_v35, %v118_v34 }
  0x56   :  { %4972 = vmatprep.subr.bf16.mxu0 %v6880_v16  ;;  %4997 = vmatpush3.bf16.msra.mxu1 %v6888_v29  ;;  %v6904_v42 = vpack.c.bf16 %v128_v38, %v125_v36  ;;  %v124_v43 = vld [vmem:[#allocation8 + $0xf0] sm:$0xff]  ;;  %v127_v44 = vld [vmem:[#allocation8 + $0x108] sm:$0xff]  ;;  %v6907_v46 = vpack.c.bf16 %v111_v40, %v108_v39  ;;  %v134_v47 = vld [vmem:[#allocation8 + $0x140] sm:$0xff] }
  0x57   :  { %4998 = vmatprep.subr.bf16.mxu1 %v8621_v0  ;;  %v131_v45 = vld [vmem:[#allocation8 + $0x128] sm:$0xff]  ;;  %v114_v48 = vld [vmem:[#allocation8 + $0xa0] sm:$0xff]  ;;  %v117_v49 = vld [vmem:[#allocation8 + $0xb8] sm:$0xff]  ;;  %v6911_v50 = vpack.c.bf16 %v127_v44, %v124_v43 }
  0x58   :  { %v6914_v51 = vpack.c.bf16 %v134_v47, %v131_v45  ;;  %v130_v52 = vld [vmem:[#allocation8 + $0x120] sm:$0xff]  ;;  %v133_v53 = vld [vmem:[#allocation8 + $0x138] sm:$0xff]  ;;  %v6917_v55 = vpack.c.bf16 %v117_v49, %v114_v48  ;;  %v140_v56 = vld [vmem:[#allocation8 + $0x170] sm:$0xff] }
  0x59   :  { %4974 = vmatpush1.bf16.msra.mxu0 %v6883_v21  ;;  %v137_v54 = vld [vmem:[#allocation8 + $0x158] sm:$0xff]  ;;  %v120_v57 = vld [vmem:[#allocation8 + $0xd0] sm:$0xff]  ;;  %v123_v58 = vld [vmem:[#allocation8 + $0xe8] sm:$0xff]  ;;  %v6921_v59 = vpack.c.bf16 %v133_v53, %v130_v52 }
  0x5a   :  { %4976 = vmatprep.subr.bf16.mxu0 %v6886_v22  ;;  %5000 = vmatpush3.bf16.msra.mxu1 %v6897_v37  ;;  %v6924_v60 = vpack.c.bf16 %v140_v56, %v137_v54  ;;  %v136_v61 = vld [vmem:[#allocation8 + $0x150] sm:$0xff]  ;;  %v139_v62 = vld [vmem:[#allocation8 + $0x168] sm:$0xff]  ;;  %v6927_v63 = vpack.c.bf16 %v123_v58, %v120_v57  ;;  %v126_v2 = vld [vmem:[#allocation8 + $0x100] sm:$0xff] }
  0x5b   :  { %5001 = vmatprep.subr.bf16.mxu1 %v8621_v0  ;;  %v129_v3 = vld [vmem:[#allocation8 + $0x118] sm:$0xff]  ;;  %v325_v4 = vld [vmem:[#allocation9 + $0x8] sm:$0xff]  ;;  %v6931_v7 = vpack.c.bf16 %v139_v62, %v136_v61  ;;  %v132_v11 = vld [vmem:[#allocation8 + $0x130] sm:$0xff] }
  0x5c   :  { %v329_v6 = vld [vmem:[#allocation9 + $0x28] sm:$0xff]  ;;  %v6935_v8 = vpack.c.bf16 %v129_v3, %v126_v2  ;;  %v324_v13 = vld [vmem:[#allocation9] sm:$0xff]  ;;  %v6941_v20 = vld [vmem:[#allocation6] sm:$0xff] }
  0x5d   :  { %4978 = vmatpush1.bf16.msra.mxu0 %v6891_v31  ;;  %v6937_v12 = vpack.c.bf16 %v329_v6, %v325_v4  ;;  %v328_v14 = vld [vmem:[#allocation9 + $0x20] sm:$0xff]  ;;  %v135_v17 = vld [vmem:[#allocation8 + $0x148] sm:$0xff]  ;;  %v141_v30 = vld [vmem:[#allocation8 + $0x178] sm:$0xff] }
  0x5e   :  { %4980 = vmatprep.subr.bf16.mxu0 %v6894_v33  ;;  %5003 = vmatpush3.bf16.msra.mxu1 %v6907_v46  ;;  %v333_v18 = vld [vmem:[#allocation9 + $0x48] sm:$0xff]  ;;  %v6943_v23 = vpack.c.bf16 %v328_v14, %v324_v13  ;;  %v6946_v24 = vpack.c.bf16 %v135_v17, %v132_v11  ;;  %v138_v25 = vld [vmem:[#allocation8 + $0x160] sm:$0xff]  ;;  %v327_v35 = vld [vmem:[#allocation9 + $0x18] sm:$0xff] }
  0x5f   :  { %5004 = vmatprep.subr.bf16.mxu1 %v8621_v0  ;;  %v337_v19 = vld [vmem:[#allocation9 + $0x68] sm:$0xff]  ;;  %v332_v27 = vld [vmem:[#allocation9 + $0x40] sm:$0xff]  ;;  %v331_v36 = vld [vmem:[#allocation9 + $0x38] sm:$0xff]  ;;  %v6957_v39 = vpack.c.bf16 %v141_v30, %v138_v25 }
  0x60   :  { %v6949_v26 = vpack.c.bf16 %v337_v19, %v333_v18  ;;  %v336_v28 = vld [vmem:[#allocation9 + $0x60] sm:$0xff]  ;;  %v341_v32 = vld [vmem:[#allocation9 + $0x88] sm:$0xff]  ;;  %v326_v40 = vld [vmem:[#allocation9 + $0x10] sm:$0xff]  ;;  %v6963_v47 = vpack.c.bf16 %v331_v36, %v327_v35 }
  0x61   :  { %4982 = vmatpush1.bf16.msra.mxu0 %v6901_v41  ;;  %v345_v34 = vld [vmem:[#allocation9 + $0xa8] sm:$0xff]  ;;  %v6954_v38 = vpack.c.bf16 %v336_v28, %v332_v27  ;;  %v340_v44 = vld [vmem:[#allocation9 + $0x80] sm:$0xff]  ;;  %v330_v48 = vld [vmem:[#allocation9 + $0x30] sm:$0xff] }
  0x62   :  { %4984 = vmatprep.subr.bf16.mxu0 %v6904_v42  ;;  %5006 = vmatpush3.bf16.msra.mxu1 %v6917_v55  ;;  %v6960_v43 = vpack.c.bf16 %v345_v34, %v341_v32  ;;  %v344_v45 = vld [vmem:[#allocation9 + $0xa0] sm:$0xff]  ;;  %v349_v49 = vld [vmem:[#allocation9 + $0xc8] sm:$0xff]  ;;  %v335_v53 = vld [vmem:[#allocation9 + $0x58] sm:$0xff]  ;;  %v6969_v57 = vpack.c.bf16 %v330_v48, %v326_v40 }
  0x63   :  { %5007 = vmatprep.subr.bf16.mxu1 %v8621_v0  ;;  %v353_v52 = vld [vmem:[#allocation9 + $0xe8] sm:$0xff]  ;;  %v339_v54 = vld [vmem:[#allocation9 + $0x78] sm:$0xff]  ;;  %v6966_v56 = vpack.c.bf16 %v344_v45, %v340_v44  ;;  %v348_v61 = vld [vmem:[#allocation9 + $0xc0] sm:$0xff] }
  0x64   :  { %v6972_v58 = vpack.c.bf16 %v353_v52, %v349_v49  ;;  %v352_v62 = vld [vmem:[#allocation9 + $0xe0] sm:$0xff]  ;;  %v6975_v2 = vpack.c.bf16 %v339_v54, %v335_v53  ;;  %v334_v3 = vld [vmem:[#allocation9 + $0x50] sm:$0xff]  ;;  %v343_v6 = vld [vmem:[#allocation9 + $0x98] sm:$0xff] }
  0x65   :  { %4986 = vmatpush1.bf16.msra.mxu0 %v6911_v50  ;;  %v338_v4 = vld [vmem:[#allocation9 + $0x70] sm:$0xff]  ;;  %v347_v11 = vld [vmem:[#allocation9 + $0xb8] sm:$0xff]  ;;  %v6979_v13 = vpack.c.bf16 %v352_v62, %v348_v61  ;;  %v357_v36 = vld [vmem:[#allocation9 + $0x108] sm:$0xff] }
  0x66   :  { %4988 = vmatprep.subr.bf16.mxu0 %v6914_v51  ;;  %5009 = vmatpush3.bf16.msra.mxu1 %v6927_v63  ;;  %v6982_v14 = vpack.c.bf16 %v338_v4, %v334_v3  ;;  %v6986_v17 = vpack.c.bf16 %v347_v11, %v343_v6  ;;  %v342_v18 = vld [vmem:[#allocation9 + $0x90] sm:$0xff]  ;;  %v351_v25 = vld [vmem:[#allocation9 + $0xd8] sm:$0xff]  ;;  %v361_v40 = vld [vmem:[#allocation9 + $0x128] sm:$0xff] }
  0x67   :  { %5010 = vmatprep.subr.bf16.mxu1 %v8621_v0  ;;  %v346_v19 = vld [vmem:[#allocation9 + $0xb0] sm:$0xff]  ;;  %v355_v27 = vld [vmem:[#allocation9 + $0xf8] sm:$0xff]  ;;  %v7000_v45 = vpack.c.bf16 %v361_v40, %v357_v36  ;;  %v356_v49 = vld [vmem:[#allocation9 + $0x100] sm:$0xff] }
  0x68   :  { %v6990_v28 = vpack.c.bf16 %v346_v19, %v342_v18  ;;  %v6993_v30 = vpack.c.bf16 %v355_v27, %v351_v25  ;;  %v350_v32 = vld [vmem:[#allocation9 + $0xd0] sm:$0xff]  ;;  %v359_v44 = vld [vmem:[#allocation9 + $0x118] sm:$0xff]  ;;  %v360_v52 = vld [vmem:[#allocation9 + $0x120] sm:$0xff] }
  0x69   :  { %4990 = vmatpush1.bf16.msra.mxu0 %v6921_v59  ;;  %v354_v34 = vld [vmem:[#allocation9 + $0xf0] sm:$0xff]  ;;  %v363_v48 = vld [vmem:[#allocation9 + $0x138] sm:$0xff]  ;;  %v7004_v54 = vpack.c.bf16 %v360_v52, %v356_v49  ;;  %v365_v4 = vld [vmem:[#allocation9 + $0x148] sm:$0xff] }
  0x6a   :  { %4992 = vmatprep.subr.bf16.mxu0 %v6924_v60  ;;  %5012 = vmatpush3.bf16.msra.mxu1 %v6935_v8  ;;  %v6996_v35 = vpack.c.bf16 %v354_v34, %v350_v32  ;;  %v7002_v53 = vpack.c.bf16 %v363_v48, %v359_v44  ;;  %v358_v61 = vld [vmem:[#allocation9 + $0x110] sm:$0xff]  ;;  %v369_v6 = vld [vmem:[#allocation9 + $0x168] sm:$0xff]  ;;  %v367_v11 = vld [vmem:[#allocation9 + $0x158] sm:$0xff] }
  0x6b   :  { %5013 = vmatprep.subr.bf16.mxu1 %v8621_v0  ;;  %v362_v62 = vld [vmem:[#allocation9 + $0x130] sm:$0xff]  ;;  %v7012_v18 = vpack.c.bf16 %v369_v6, %v365_v4  ;;  %v371_v19 = vld [vmem:[#allocation9 + $0x178] sm:$0xff]  ;;  %v364_v25 = vld [vmem:[#allocation9 + $0x140] sm:$0xff] }
  0x6c   :  { %v7007_v3 = vpack.c.bf16 %v362_v62, %v358_v61  ;;  %v7014_v27 = vpack.c.bf16 %v371_v19, %v367_v11  ;;  %v368_v32 = vld [vmem:[#allocation9 + $0x160] sm:$0xff]  ;;  %v366_v34 = vld [vmem:[#allocation9 + $0x150] sm:$0xff]  ;;  %v373_v48 = vld [vmem:[#allocation9 + $0x188] sm:$0xff] }
  0x6d   :  { %4994 = vmatpush1.bf16.msra.mxu0 %v6931_v7  ;;  %8834 = vst [vmem:[#allocation20_spill] sm:$0xff] %v7012_v18  ;;  %v370_v36 = vld [vmem:[#allocation9 + $0x170] sm:$0xff]  ;;  %v7017_v40 = vpack.c.bf16 %v368_v32, %v364_v25  ;;  %v377_v49 = vld [vmem:[#allocation9 + $0x1a8] sm:$0xff]  ;;  %v375_v52 = vld [vmem:[#allocation9 + $0x198] sm:$0xff] }
  0x6e   :  { %5020 = vmatprep.subr.bf16.mxu0 %v6937_v12  ;;  %5015 = vmatpush3.bf16.msra.mxu1 %v6946_v24  ;;  %8833 = vst [vmem:[#allocation19_spill] sm:$0xff] %v7007_v3  ;;  %8835 = vst [vmem:[#allocation21_spill] sm:$0xff] %v7014_v27  ;;  %v7019_v44 = vpack.c.bf16 %v370_v36, %v366_v34  ;;  %v7024_v61 = vpack.c.bf16 %v377_v49, %v373_v48  ;;  %v379_v62 = vld [vmem:[#allocation9 + $0x1b8] sm:$0xff]  ;;  %v372_v4 = vld [vmem:[#allocation9 + $0x180] sm:$0xff] }
  0x6f   :  { %5016 = vmatprep.subr.bf16.mxu1 %v8621_v0  ;;  %8836 = vst [vmem:[#allocation22_spill] sm:$0xff] %v7017_v40  ;;  %v376_v6 = vld [vmem:[#allocation9 + $0x1a0] sm:$0xff]  ;;  %v7026_v11 = vpack.c.bf16 %v379_v62, %v375_v52  ;;  %v374_v25 = vld [vmem:[#allocation9 + $0x190] sm:$0xff]  ;;  %v381_v36 = vld [vmem:[#allocation9 + $0x1c8] sm:$0xff] }
  0x70   :  { %224 = vmatmul.mubr.f32.vlgmr.msra.gmra.mrb[0].mxu0 %v6941_v20  ;;  %8837 = vst [vmem:[#allocation23_spill] sm:$0xff] %v7019_v44  ;;  %8838 = vst [vmem:[#allocation24_spill] sm:$0xff] %v7024_v61  ;;  %v7028_v19 = vpack.c.bf16 %v376_v6, %v372_v4  ;;  %v378_v32 = vld [vmem:[#allocation9 + $0x1b0] sm:$0xff]  ;;  %v385_v1 = vld [vmem:[#allocation9 + $0x1e8] sm:$0xff] }
  0x71   :  { %5022 = vmatpush1.bf16.msra.mxu0 %v6943_v23  ;;  %8839 = vst [vmem:[#allocation25_spill] sm:$0xff] %v7026_v11  ;;  %v7031_v34 = vpack.c.bf16 %v378_v32, %v374_v25  ;;  %v383_v0 = vld [vmem:[#allocation9 + $0x1d8] sm:$0xff]  ;;  %v7036_v48 = vpack.c.bf16 %v385_v1, %v381_v36  ;;  %v380_v52 = vld [vmem:[#allocation9 + $0x1c0] sm:$0xff]  ;;  %v382_v25 = vld [vmem:[#allocation9 + $0x1d0] sm:$0xff] }
  0x72   :  { %5024 = vmatprep.subr.bf16.mxu0 %v6949_v26  ;;  %5018 = vmatpush3.bf16.msra.mxu1 %v6957_v39  ;;  %8840 = vst [vmem:[#allocation26_spill] sm:$0xff] %v7028_v19  ;;  %v387_v49 = vld [vmem:[#allocation9 + $0x1f8] sm:$0xff]  ;;  %v384_v62 = vld [vmem:[#allocation9 + $0x1e0] sm:$0xff]  ;;  %v386_v32 = vld [vmem:[#allocation9 + $0x1f0] sm:$0xff] }
  0x73   :  { %5084 = vmatprep.subr.bf16.mxu1 %v6963_v47  ;;  %8841 = vst [vmem:[#allocation27_spill] sm:$0xff] %v7031_v34  ;;  %8842 = vst [vmem:[#allocation28_spill] sm:$0xff] %v7036_v48  ;;  %v7038_v4 = vpack.c.bf16 %v387_v49, %v383_v0  ;;  %v7040_v6 = vpack.c.bf16 %v384_v62, %v380_v52  ;;  %v395_v0 = vld [vmem:[#allocation9 + $0x238] sm:$0xff]  ;;  %v388_v36 = vld [vmem:[#allocation9 + $0x200] sm:$0xff] }
  0x74   :  { %v392_v49 = vld [vmem:[#allocation9 + $0x220] sm:$0xff] }
  0x75   :  { %5026 = vmatpush1.bf16.msra.mxu0 %v6954_v38  ;;  %4716 = vmatmul.mubr.f32.vlgmr.msra.gmra.mrb[0].mxu1 %v6941_v20  ;;  %8843 = vst [vmem:[#allocation29_spill] sm:$0xff] %v7038_v4  ;;  %8844 = vst [vmem:[#allocation30_spill] sm:$0xff] %v7040_v6  ;;  %v7052_v62 = vpack.c.bf16 %v392_v49, %v388_v36 }
  0x76   :  { %5028 = vmatprep.subr.bf16.mxu0 %v6960_v43  ;;  %5086 = vmatpush1.bf16.msra.mxu1 %v6969_v57 }
  0x77   :  { %5088 = vmatprep.subr.bf16.mxu1 %v6975_v2  ;;  %8848 = vst [vmem:[#allocation34_spill] sm:$0xff] %v7052_v62 }
  0x79   :  { %5030 = vmatpush1.bf16.msra.mxu0 %v6966_v56 }
  0x7a   :  { %5032 = vmatprep.subr.bf16.mxu0 %v6972_v58  ;;  %5090 = vmatpush1.bf16.msra.mxu1 %v6982_v14 }
  0x7b   :  { %5092 = vmatprep.subr.bf16.mxu1 %v6986_v17 }
  0x7d   :  { %5034 = vmatpush1.bf16.msra.mxu0 %v6979_v13 }
  0x7e   :  { %5094 = vmatpush1.bf16.msra.mxu1 %v6990_v28  ;;  %5036 = vmatprep.subr.bf16.mxu0 %v7000_v45 }
  0x7f   :  { %5096 = vmatprep.subr.bf16.mxu1 %v6993_v30 }
  0x81   :  { %5038 = vmatpush1.bf16.msra.mxu0 %v7004_v54 }
  0x82   :  { %5098 = vmatpush1.bf16.msra.mxu1 %v6996_v35  ;;  %5040 = vmatprep.subr.bf16.mxu0 %v7012_v18 }
  0x83   :  { %5100 = vmatprep.subr.bf16.mxu1 %v7002_v53 }
  0x85   :  { %5042 = vmatpush1.bf16.msra.mxu0 %v7017_v40  ;;  %v408_v40 = vld [vmem:[#allocation9 + $0x2a0] sm:$0xff] }
  0x86   :  { %5102 = vmatpush1.bf16.msra.mxu1 %v7007_v3  ;;  %5044 = vmatprep.subr.bf16.mxu0 %v7024_v61  ;;  %v393_v61 = vld [vmem:[#allocation9 + $0x228] sm:$0xff] }
  0x87   :  { %5104 = vmatprep.subr.bf16.mxu1 %v7014_v27 }
  0x89   :  { %5046 = vmatpush1.bf16.msra.mxu0 %v7028_v19  ;;  %v389_v19 = vld [vmem:[#allocation9 + $0x208] sm:$0xff] }
  0x8a   :  { %5106 = vmatpush1.bf16.msra.mxu1 %v7019_v44  ;;  %5048 = vmatprep.subr.bf16.mxu0 %v7036_v48  ;;  %v7048_v1 = vpack.c.bf16 %v393_v61, %v389_v19  ;;  %v401_v48 = vld [vmem:[#allocation9 + $0x268] sm:$0xff]  ;;  %v403_v19 = vld [vmem:[#allocation9 + $0x278] sm:$0xff] }
  0x8b   :  { %5108 = vmatprep.subr.bf16.mxu1 %v7026_v11  ;;  %v7043_v11 = vpack.c.bf16 %v386_v32, %v382_v25  ;;  %v390_v25 = vld [vmem:[#allocation9 + $0x210] sm:$0xff]  ;;  %v409_v44 = vld [vmem:[#allocation9 + $0x2a8] sm:$0xff] }
  0x8c   :  { %8846 = vst [vmem:[#allocation32_spill] sm:$0xff] %v7048_v1  ;;  %v394_v32 = vld [vmem:[#allocation9 + $0x230] sm:$0xff] }
  0x8d   :  { %8845 = vst [vmem:[#allocation31_spill] sm:$0xff] %v7043_v11  ;;  %5050 = vmatpush1.bf16.msra.mxu0 %v7040_v6  ;;  %v397_v6 = vld [vmem:[#allocation9 + $0x248] sm:$0xff] }
  0x8e   :  { %5110 = vmatpush1.bf16.msra.mxu1 %v7031_v34  ;;  %v391_v34 = vld [vmem:[#allocation9 + $0x218] sm:$0xff]  ;;  %5052 = vmatprep.subr.bf16.mxu0 %v7048_v1  ;;  %v7060_v61 = vpack.c.bf16 %v401_v48, %v397_v6  ;;  %v405_v1 = vld [vmem:[#allocation9 + $0x288] sm:$0xff] }
  0x8f   :  { %5112 = vmatprep.subr.bf16.mxu1 %v7038_v4  ;;  %v7050_v52 = vpack.c.bf16 %v395_v0, %v391_v34  ;;  %v7055_v4 = vpack.c.bf16 %v394_v32, %v390_v25  ;;  %v396_v34 = vld [vmem:[#allocation9 + $0x240] sm:$0xff]  ;;  %v398_v25 = vld [vmem:[#allocation9 + $0x250] sm:$0xff]  ;;  %v7070_v48 = vpack.c.bf16 %v409_v44, %v405_v1  ;;  %v411_v6 = vld [vmem:[#allocation9 + $0x2b8] sm:$0xff] }
  0x90   :  { %8850 = vst [vmem:[#allocation36_spill] sm:$0xff] %v7060_v61  ;;  %v400_v0 = vld [vmem:[#allocation9 + $0x260] sm:$0xff]  ;;  %v402_v32 = vld [vmem:[#allocation9 + $0x270] sm:$0xff]  ;;  %v413_v44 = vld [vmem:[#allocation9 + $0x2c8] sm:$0xff] }
  0x91   :  { %8847 = vst [vmem:[#allocation33_spill] sm:$0xff] %v7050_v52  ;;  %8849 = vst [vmem:[#allocation35_spill] sm:$0xff] %v7055_v4  ;;  %5054 = vmatpush1.bf16.msra.mxu0 %v7052_v62  ;;  %v7064_v49 = vpack.c.bf16 %v400_v0, %v396_v34  ;;  %v407_v62 = vld [vmem:[#allocation9 + $0x298] sm:$0xff]  ;;  %v406_v34 = vld [vmem:[#allocation9 + $0x290] sm:$0xff] }
  0x92   :  { %5114 = vmatpush1.bf16.msra.mxu1 %v7043_v11  ;;  %v399_v11 = vld [vmem:[#allocation9 + $0x258] sm:$0xff]  ;;  %5056 = vmatprep.subr.bf16.mxu0 %v7060_v61  ;;  %8854 = vst [vmem:[#allocation40_spill] sm:$0xff] %v7070_v48  ;;  %v410_v0 = vld [vmem:[#allocation9 + $0x2b0] sm:$0xff]  ;;  %v417_v1 = vld [vmem:[#allocation9 + $0x2e8] sm:$0xff] }
  0x93   :  { %5116 = vmatprep.subr.bf16.mxu1 %v7050_v52  ;;  %v7062_v36 = vpack.c.bf16 %v403_v19, %v399_v11  ;;  %8852 = vst [vmem:[#allocation38_spill] sm:$0xff] %v7064_v49  ;;  %v7067_v52 = vpack.c.bf16 %v402_v32, %v398_v25  ;;  %v7074_v11 = vpack.c.bf16 %v411_v6, %v407_v62  ;;  %v415_v32 = vld [vmem:[#allocation9 + $0x2d8] sm:$0xff] }
  0x94   :  { %v7079_v25 = vpack.c.bf16 %v410_v0, %v406_v34  ;;  %v419_v62 = vld [vmem:[#allocation9 + $0x2f8] sm:$0xff]  ;;  %v414_v34 = vld [vmem:[#allocation9 + $0x2d0] sm:$0xff] }
  0x95   :  { %8851 = vst [vmem:[#allocation37_spill] sm:$0xff] %v7062_v36  ;;  %8853 = vst [vmem:[#allocation39_spill] sm:$0xff] %v7067_v52  ;;  %5058 = vmatpush1.bf16.msra.mxu0 %v7064_v49  ;;  %v7086_v6 = vpack.c.bf16 %v419_v62, %v415_v32  ;;  %v418_v0 = vld [vmem:[#allocation9 + $0x2f0] sm:$0xff]  ;;  %v420_v32 = vld [vmem:[#allocation9 + $0x300] sm:$0xff] }
  0x96   :  { %5118 = vmatpush1.bf16.msra.mxu1 %v7055_v4  ;;  %v404_v4 = vld [vmem:[#allocation9 + $0x280] sm:$0xff]  ;;  %8855 = vst [vmem:[#allocation41_spill] sm:$0xff] %v7074_v11  ;;  %5060 = vmatprep.subr.bf16.mxu0 %v7070_v48  ;;  %8857 = vst [vmem:[#allocation43_spill] sm:$0xff] %v7079_v25  ;;  %v425_v48 = vld [vmem:[#allocation9 + $0x328] sm:$0xff] }
  0x97   :  { %5120 = vmatprep.subr.bf16.mxu1 %v7062_v36  ;;  %v7076_v19 = vpack.c.bf16 %v408_v40, %v404_v4  ;;  %v412_v40 = vld [vmem:[#allocation9 + $0x2c0] sm:$0xff]  ;;  %8859 = vst [vmem:[#allocation45_spill] sm:$0xff] %v7086_v6  ;;  %v441_v36 = vld [vmem:[#allocation9 + $0x3a8] sm:$0xff]  ;;  %v443_v61 = vld [vmem:[#allocation9 + $0x3b8] sm:$0xff] }
  0x98   :  { %v416_v4 = vld [vmem:[#allocation9 + $0x2e0] sm:$0xff] }
  0x99   :  { %8856 = vst [vmem:[#allocation42_spill] sm:$0xff] %v7076_v19  ;;  %5062 = vmatpush1.bf16.msra.mxu0 %v7076_v19  ;;  %v7088_v49 = vpack.c.bf16 %v416_v4, %v412_v40  ;;  %v421_v19 = vld [vmem:[#allocation9 + $0x308] sm:$0xff]  ;;  %v424_v62 = vld [vmem:[#allocation9 + $0x320] sm:$0xff] }
  0x9a   :  { %5122 = vmatpush1.bf16.msra.mxu1 %v7067_v52  ;;  %v7084_v52 = vpack.c.bf16 %v417_v1, %v413_v44  ;;  %v7096_v44 = vpack.c.bf16 %v425_v48, %v421_v19  ;;  %v427_v1 = vld [vmem:[#allocation9 + $0x338] sm:$0xff]  ;;  %v7100_v4 = vpack.c.bf16 %v424_v62, %v420_v32 }
  0x9b   :  { %5124 = vmatprep.subr.bf16.mxu1 %v7074_v11  ;;  %8860 = vst [vmem:[#allocation46_spill] sm:$0xff] %v7088_v49  ;;  %v7091_v11 = vpack.c.bf16 %v418_v0, %v414_v34  ;;  %v422_v34 = vld [vmem:[#allocation9 + $0x310] sm:$0xff]  ;;  %v435_v19 = vld [vmem:[#allocation9 + $0x378] sm:$0xff] }
  0x9c   :  { %8858 = vst [vmem:[#allocation44_spill] sm:$0xff] %v7084_v52  ;;  %5064 = vmatprep.subr.bf16.mxu0 %v7084_v52  ;;  %8862 = vst [vmem:[#allocation48_spill] sm:$0xff] %v7096_v44  ;;  %v426_v0 = vld [vmem:[#allocation9 + $0x330] sm:$0xff]  ;;  %v433_v52 = vld [vmem:[#allocation9 + $0x368] sm:$0xff] }
  0x9d   :  { %8861 = vst [vmem:[#allocation47_spill] sm:$0xff] %v7091_v11  ;;  %5066 = vmatpush1.bf16.msra.mxu0 %v7088_v49  ;;  %8864 = vst [vmem:[#allocation50_spill] sm:$0xff] %v7100_v4  ;;  %v429_v49 = vld [vmem:[#allocation9 + $0x348] sm:$0xff] }
  0x9e   :  { %5126 = vmatpush1.bf16.msra.mxu1 %v7079_v25  ;;  %v423_v25 = vld [vmem:[#allocation9 + $0x318] sm:$0xff]  ;;  %5068 = vmatprep.subr.bf16.mxu0 %v7096_v44  ;;  %v7108_v48 = vpack.c.bf16 %v433_v52, %v429_v49  ;;  %v437_v44 = vld [vmem:[#allocation9 + $0x388] sm:$0xff] }
  0x9f   :  { %5128 = vmatprep.subr.bf16.mxu1 %v7086_v6  ;;  %v7098_v40 = vpack.c.bf16 %v427_v1, %v423_v25  ;;  %v7103_v6 = vpack.c.bf16 %v426_v0, %v422_v34  ;;  %v428_v25 = vld [vmem:[#allocation9 + $0x340] sm:$0xff]  ;;  %v430_v34 = vld [vmem:[#allocation9 + $0x350] sm:$0xff]  ;;  %v7118_v52 = vpack.c.bf16 %v441_v36, %v437_v44  ;;  %v447_v44 = vld [vmem:[#allocation9 + $0x3d8] sm:$0xff] }
  0xa0   :  { %8866 = vst [vmem:[#allocation52_spill] sm:$0xff] %v7108_v48  ;;  %v432_v1 = vld [vmem:[#allocation9 + $0x360] sm:$0xff]  ;;  %v434_v0 = vld [vmem:[#allocation9 + $0x370] sm:$0xff] }
  0xa1   :  { %8863 = vst [vmem:[#allocation49_spill] sm:$0xff] %v7098_v40  ;;  %8865 = vst [vmem:[#allocation51_spill] sm:$0xff] %v7103_v6  ;;  %5070 = vmatpush1.bf16.msra.mxu0 %v7100_v4  ;;  %v7112_v62 = vpack.c.bf16 %v432_v1, %v428_v25  ;;  %v439_v4 = vld [vmem:[#allocation9 + $0x398] sm:$0xff]  ;;  %v438_v25 = vld [vmem:[#allocation9 + $0x390] sm:$0xff] }
  0xa2   :  { %5130 = vmatpush1.bf16.msra.mxu1 %v7091_v11  ;;  %v431_v11 = vld [vmem:[#allocation9 + $0x358] sm:$0xff]  ;;  %5072 = vmatprep.subr.bf16.mxu0 %v7108_v48  ;;  %8870 = vst [vmem:[#allocation56_spill] sm:$0xff] %v7118_v52  ;;  %v7120_v49 = vpack.c.bf16 %v443_v61, %v439_v4  ;;  %v449_v48 = vld [vmem:[#allocation9 + $0x3e8] sm:$0xff] }
  0xa3   :  { %5132 = vmatprep.subr.bf16.mxu1 %v7098_v40  ;;  %v7110_v32 = vpack.c.bf16 %v435_v19, %v431_v11  ;;  %8868 = vst [vmem:[#allocation54_spill] sm:$0xff] %v7112_v62  ;;  %v7115_v40 = vpack.c.bf16 %v434_v0, %v430_v34  ;;  %v436_v11 = vld [vmem:[#allocation9 + $0x380] sm:$0xff]  ;;  %v442_v34 = vld [vmem:[#allocation9 + $0x3b0] sm:$0xff]  ;;  %v445_v0 = vld [vmem:[#allocation9 + $0x3c8] sm:$0xff] }
  0xa4   :  { %8871 = vst [vmem:[#allocation57_spill] sm:$0xff] %v7120_v49  ;;  %v440_v19 = vld [vmem:[#allocation9 + $0x3a0] sm:$0xff]  ;;  %v7128_v36 = vpack.c.bf16 %v442_v34, %v438_v25  ;;  %v7130_v61 = vpack.c.bf16 %v449_v48, %v445_v0  ;;  %v451_v4 = vld [vmem:[#allocation9 + $0x3f8] sm:$0xff]  ;;  %v8879_v48 = vmov 0.0|0.0   ;;  %v142_v34 = vld [vmem:[%s8614_s3] sm:$0x7] }
  0xa5   :  { %8867 = vst [vmem:[#allocation53_spill] sm:$0xff] %v7110_v32  ;;  %8869 = vst [vmem:[#allocation55_spill] sm:$0xff] %v7115_v40  ;;  %5074 = vmatpush1.bf16.msra.mxu0 %v7112_v62  ;;  %v7124_v1 = vpack.c.bf16 %v440_v19, %v436_v11  ;;  %v448_v62 = vld [vmem:[#allocation9 + $0x3e0] sm:$0xff]  ;;  %v450_v11 = vld [vmem:[#allocation9 + $0x3f0] sm:$0xff] }
  0xa6   :  { %5134 = vmatpush1.bf16.msra.mxu1 %v7103_v6  ;;  %5076 = vmatprep.subr.bf16.mxu0 %v7118_v52  ;;  %8873 = vst [vmem:[#allocation59_spill] sm:$0xff] %v7128_v36  ;;  %8874 = vst [vmem:[#allocation60_spill] sm:$0xff] %v7130_v61  ;;  %v7132_v6 = vpack.c.bf16 %v451_v4, %v447_v44  ;;  %v7134_v19 = vld [vmem:[#allocation6 + $0x8] sm:$0xff] }
  0xa7   :  { %5136 = vmatprep.subr.bf16.mxu1 %v7110_v32  ;;  %8872 = vst [vmem:[#allocation58_spill] sm:$0xff] %v7124_v1  ;;  %v444_v32 = vld [vmem:[#allocation9 + $0x3c0] sm:$0xff]  ;;  %8876 = vst [vmem:[#allocation62_spill] sm:$0xff] %v7134_v19  ;;  %538 = vmatprep.mubr.f32.mxu0 %v7134_v19 }
  0xa8   :  { %8875 = vst [vmem:[#allocation61_spill] sm:$0xff] %v7132_v6  ;;  %v7138_v52 = vpack.c.bf16 %v448_v62, %v444_v32  ;;  %609 = vmatprep.mubr.f32.mxu1 %v7134_v19  ;;  %v144_v32 = vlaneseq }
  0xa9   :  { %5078 = vmatpush1.bf16.msra.mxu0 %v7124_v1 }
  0xaa   :  { %5138 = vmatpush1.bf16.msra.mxu1 %v7115_v40  ;;  %v446_v40 = vld [vmem:[#allocation9 + $0x3d0] sm:$0xff]  ;;  %8877 = vst [vmem:[#allocation63_spill] sm:$0xff] %v7138_v52  ;;  %5080 = vmatprep.subr.bf16.mxu0 %v7130_v61  ;;  %v7150_v62 = vshrl.u32 %v144_v32, 7 }
  0xab   :  { %5140 = vmatprep.subr.bf16.mxu1 %v7120_v49  ;;  %v7140_v25 = vpack.c.bf16 %v450_v11, %v446_v40 }
  0xac   :  { %v7153_v40 = vsub.s32 0, %v7150_v62  ;;  %v7159_v0 = vsub.s32 1, %v7150_v62 }
  0xad   :  { %8878 = vst [vmem:[#allocation64_spill] sm:$0xff] %v7140_v25  ;;  %5082 = vmatpush1.bf16.msra.mxu0 %v7138_v52 }
  0xae   :  { %5142 = vmatpush1.bf16.msra.mxu1 %v7128_v36  ;;  %5148 = vmatprep.subr.bf16.mxu0 %v6869_v5  ;;  %8880 = vst [vmem:[#allocation65_spill] sm:$0xff] %v7153_v40  ;;  %8881 = vst [vmem:[#allocation66_spill] sm:$0xff] %v7159_v0  ;;  %v147_v44 = vrot.slane %v142_v34, %v7153_v40  ;;  %v151_v4 = vrot.slane %v142_v34, %v7159_v0  ;;  %v90_v5 = vld [vmem:[#allocation3] sm:$0xff]  ;;  %v7164_v40 = vsub.s32 2, %v7150_v62 }
  0xaf   :  { %5144 = vmatprep.subr.bf16.mxu1 %v7132_v6  ;;  %v91_v6 = vld [vmem:[#allocation3 + $0x8] sm:$0xff] }
  0xb0   :  { %v155_v0 = vrot.slane %v142_v34, %v7164_v40 }
  0xb2   :  { %5146 = vmatpush1.bf16.msra.mxu1 %v7140_v25 }
  0xb3   :  { %5179 = vmatprep.subr.bf16.mxu1 %v8879_v48 }
  0xb4   :  { %v8927_v34 = vld [vmem:[#allocation64_spill] sm:$0xff] }
 0x143   :  { %v225_v11 = vpop.f32.mrb[0].mxu0 }
 0x144   :  { %v226_v19 = vadd.f32 %v225_v11, %v147_v44  ;;  %v227_v25 = vpop.f32.mrb[1].mxu0 }
 0x145   :  { %v228_v32 = vadd.f32 %v227_v25, %v151_v4  ;;  %v92_v4 = vld [vmem:[#allocation3 + $0x10] sm:$0xff] }
 0x146   :  { %v300_v52 = vadd.f32 %v226_v19, %v90_v5 }
 0x147   :  { %v307_v36 = vadd.f32 %v228_v32, %v91_v6  ;;  %v1194_v32 = vld [vmem:[#allocation8 + $0x20] sm:$0xff] }
 0x148   :  { %v4515_v61 = vmul.f32 -1.442695, %v300_v52  ;;  %v296_v1 = vpop.f32.mrb[0].mxu1 }
 0x149   :  { %v4516_v49 = vmul.f32 -1.442695, %v307_v36  ;;  %v4717_v27 = vpop.f32.mrb[1].mxu1  ;;  %v297_v25 = vadd.f32 %v296_v1, %v155_v0  ;;  %v8926_v1 = vld [vmem:[#allocation63_spill] sm:$0xff]  ;;  %v1191_v0 = vld [vmem:[#allocation8 + $0x8] sm:$0xff] }
 0x14a   :  { %6450 = vpow2.f32 %v4515_v61 }
 0x14b   :  { %6452 = vpow2.f32 %v4516_v49 }
 0x154   :  { %v6451_v18 = vpop.eup %6450 }
 0x155   :  { %v304_v3 = vadd.f32 1.0, %v6451_v18  ;;  %v6453_v44 = vpop.eup %6452 }
 0x156   :  { %v311_v11 = vadd.f32 1.0, %v6453_v44  ;;  %v7272_v44 = vpack.c.bf16 %v1194_v32, %v1191_v0  ;;  %v1190_v32 = vld [vmem:[#allocation8] sm:$0xff] }
 0x157   :  { %6454 = vrcp.f32 %v304_v3  ;;  %v8882_v3 = vmov 0.0  }
 0x158   :  { %6456 = vrcp.f32 %v311_v11  ;;  %v452_v11 = vld [vmem:[%s8616_s5] sm:$0xf] }
 0x161   :  { %v6455_v19 = vpop.eup %6454 }
 0x162   :  { %v314_v6 = vmul.f32 %v6455_v19, %v297_v25  ;;  %v6457_v36 = vpop.eup %6456  ;;  %v8928_v25 = vld [vmem:[#allocation65_spill] sm:$0xff] }
 0x163   :  { %v317_v27 = vsub.f32 1.0, %v6457_v36  ;;  %v319_v18 = vmul.f32 %v6457_v36, %v6941_v20  ;;  %v8905_v20 = vld [vmem:[#allocation41_spill] sm:$0xff]  ;;  %v457_v19 = vrot.slane %v452_v11, %v8928_v25 }
 0x164   :  { %v315_v52 = vadd.f32 %v314_v6, %v92_v4 }
 0x166   :  { %6458 = vtanh.f32 %v315_v52  ;;  %v8929_v52 = vld [vmem:[#allocation66_spill] sm:$0xff] }
 0x167   :  { %v461_v36 = vrot.slane %v452_v11, %v8929_v52 }
 0x170   :  { %v6459_v49 = vpop.eup %6458 }
 0x171   :  { %v318_v61 = vmul.f32 %v6459_v49, %v317_v27 }
 0x173   :  { %v7168_v5 = vadd.f32 %v319_v18, %v318_v61 }
 0x175   :  { %539 = vmatmul.mubr.f32.vlgmr.msra.gmra.mrb[2].mxu0 %v7168_v5  ;;  %610 = vmatmul.mubr.f32.vlgmr.msra.gmra.mrb[2].mxu1 %v7168_v5 }
 0x176   :  { %5150 = vmatpush1.bf16.msra.mxu0 %v6871_v9  ;;  %5181 = vmatpush3.bf16.msra.mxu1 %v6888_v29  ;;  %v8883_v9 = vld [vmem:[#allocation19_spill] sm:$0xff]  ;;  %v8889_v29 = vld [vmem:[#allocation25_spill] sm:$0xff] }
 0x177   :  { %5152 = vmatprep.subr.bf16.mxu0 %v6873_v10  ;;  %5182 = vmatprep.subr.bf16.mxu1 %v8879_v48  ;;  %v8884_v10 = vld [vmem:[#allocation20_spill] sm:$0xff] }
 0x178   :  { %771 = vmatprep.mubr.f32.mxu0 %v8882_v3  ;;  %4750 = vmatprep.mubr.msk.f32.mxu1 %vm6764_vm0, %v8882_v3 }
 0x17a   :  { %5154 = vmatpush1.bf16.msra.mxu0 %v6877_v15  ;;  %5184 = vmatpush3.bf16.msra.mxu1 %v6897_v37  ;;  %v8885_v15 = vld [vmem:[#allocation21_spill] sm:$0xff]  ;;  %v8892_v37 = vld [vmem:[#allocation28_spill] sm:$0xff] }
 0x17b   :  { %5156 = vmatprep.subr.bf16.mxu0 %v6880_v16  ;;  %5185 = vmatprep.subr.bf16.mxu1 %v8879_v48  ;;  %v8886_v16 = vld [vmem:[#allocation22_spill] sm:$0xff] }
 0x17e   :  { %5158 = vmatpush1.bf16.msra.mxu0 %v6883_v21  ;;  %5187 = vmatpush3.bf16.msra.mxu1 %v6907_v46  ;;  %v8887_v21 = vld [vmem:[#allocation23_spill] sm:$0xff] }
 0x17f   :  { %5160 = vmatprep.subr.bf16.mxu0 %v6886_v22  ;;  %5188 = vmatprep.subr.bf16.mxu1 %v8879_v48  ;;  %v8888_v22 = vld [vmem:[#allocation24_spill] sm:$0xff]  ;;  %v8895_v46 = vld [vmem:[#allocation31_spill] sm:$0xff] }
 0x182   :  { %5162 = vmatpush1.bf16.msra.mxu0 %v6891_v31  ;;  %5190 = vmatpush3.bf16.msra.mxu1 %v6917_v55  ;;  %v8890_v31 = vld [vmem:[#allocation26_spill] sm:$0xff] }
 0x183   :  { %5164 = vmatprep.subr.bf16.mxu0 %v6894_v33  ;;  %5191 = vmatprep.subr.bf16.mxu1 %v8879_v48  ;;  %v8891_v33 = vld [vmem:[#allocation27_spill] sm:$0xff]  ;;  %v8898_v55 = vld [vmem:[#allocation34_spill] sm:$0xff] }
 0x186   :  { %5166 = vmatpush1.bf16.msra.mxu0 %v6901_v41  ;;  %5193 = vmatpush3.bf16.msra.mxu1 %v6927_v63  ;;  %v8893_v41 = vld [vmem:[#allocation29_spill] sm:$0xff] }
 0x187   :  { %5168 = vmatprep.subr.bf16.mxu0 %v6904_v42  ;;  %5194 = vmatprep.subr.bf16.mxu1 %v8879_v48  ;;  %v8894_v42 = vld [vmem:[#allocation30_spill] sm:$0xff]  ;;  %v8901_v63 = vld [vmem:[#allocation37_spill] sm:$0xff] }
 0x18a   :  { %5170 = vmatpush1.bf16.msra.mxu0 %v6911_v50  ;;  %5196 = vmatpush3.bf16.msra.mxu1 %v6935_v8  ;;  %v8896_v50 = vld [vmem:[#allocation32_spill] sm:$0xff]  ;;  %v8903_v8 = vld [vmem:[#allocation39_spill] sm:$0xff] }
 0x18b   :  { %5172 = vmatprep.subr.bf16.mxu0 %v6914_v51  ;;  %5197 = vmatprep.subr.bf16.mxu1 %v8879_v48  ;;  %v8897_v51 = vld [vmem:[#allocation33_spill] sm:$0xff] }
 0x18e   :  { %5174 = vmatpush1.bf16.msra.mxu0 %v6921_v59  ;;  %5199 = vmatpush3.bf16.msra.mxu1 %v6946_v24  ;;  %v8899_v59 = vld [vmem:[#allocation35_spill] sm:$0xff] }
 0x18f   :  { %5176 = vmatprep.subr.bf16.mxu0 %v6924_v60  ;;  %5200 = vmatprep.subr.bf16.mxu1 %v8879_v48  ;;  %v8900_v60 = vld [vmem:[#allocation36_spill] sm:$0xff]  ;;  %v8907_v24 = vld [vmem:[#allocation43_spill] sm:$0xff] }
 0x192   :  { %5178 = vmatpush1.bf16.msra.mxu0 %v6931_v7  ;;  %5202 = vmatpush3.bf16.msra.mxu1 %v6957_v39  ;;  %v8902_v7 = vld [vmem:[#allocation38_spill] sm:$0xff] }
 0x193   :  { %5204 = vmatprep.subr.bf16.mxu0 %v6937_v12  ;;  %5268 = vmatprep.subr.bf16.mxu1 %v6963_v47  ;;  %v8904_v12 = vld [vmem:[#allocation40_spill] sm:$0xff]  ;;  %v8910_v39 = vld [vmem:[#allocation46_spill] sm:$0xff] }
 0x194   :  { %v8912_v47 = vld [vmem:[#allocation48_spill] sm:$0xff] }
 0x195   :  { %772 = vmatmul.mubr.f32.vlgmr.msra.gmra.mrb[4].mxu0 %v7168_v5  ;;  %4751 = vmatmul.mubr.f32.vlgmr.msra.gmra.mrb[4].mxu1 %v7168_v5 }
 0x196   :  { %5206 = vmatpush1.bf16.msra.mxu0 %v6943_v23  ;;  %5270 = vmatpush1.bf16.msra.mxu1 %v6969_v57  ;;  %v8906_v23 = vld [vmem:[#allocation42_spill] sm:$0xff] }
 0x197   :  { %5208 = vmatprep.subr.bf16.mxu0 %v6949_v26  ;;  %5272 = vmatprep.subr.bf16.mxu1 %v6975_v2  ;;  %v8908_v26 = vld [vmem:[#allocation44_spill] sm:$0xff]  ;;  %v8914_v57 = vld [vmem:[#allocation50_spill] sm:$0xff] }
 0x198   :  { %v8916_v2 = vld [vmem:[#allocation52_spill] sm:$0xff] }
 0x19a   :  { %5210 = vmatpush1.bf16.msra.mxu0 %v6954_v38  ;;  %5274 = vmatpush1.bf16.msra.mxu1 %v6982_v14  ;;  %v8909_v38 = vld [vmem:[#allocation45_spill] sm:$0xff]  ;;  %v8918_v14 = vld [vmem:[#allocation54_spill] sm:$0xff] }
 0x19b   :  { %5212 = vmatprep.subr.bf16.mxu0 %v6960_v43  ;;  %5276 = vmatprep.subr.bf16.mxu1 %v6986_v17  ;;  %v8911_v43 = vld [vmem:[#allocation47_spill] sm:$0xff] }
 0x19c   :  { %v8919_v17 = vld [vmem:[#allocation55_spill] sm:$0xff] }
 0x19e   :  { %5214 = vmatpush1.bf16.msra.mxu0 %v6966_v56  ;;  %5278 = vmatpush1.bf16.msra.mxu1 %v6990_v28  ;;  %v8913_v56 = vld [vmem:[#allocation49_spill] sm:$0xff]  ;;  %v8920_v28 = vld [vmem:[#allocation56_spill] sm:$0xff] }
 0x19f   :  { %5216 = vmatprep.subr.bf16.mxu0 %v6972_v58  ;;  %5280 = vmatprep.subr.bf16.mxu1 %v6993_v30  ;;  %v8915_v58 = vld [vmem:[#allocation51_spill] sm:$0xff]  ;;  %v8921_v30 = vld [vmem:[#allocation57_spill] sm:$0xff] }
 0x1a2   :  { %5218 = vmatpush1.bf16.msra.mxu0 %v6979_v13  ;;  %5282 = vmatpush1.bf16.msra.mxu1 %v6996_v35  ;;  %v8917_v13 = vld [vmem:[#allocation53_spill] sm:$0xff]  ;;  %v8922_v35 = vld [vmem:[#allocation58_spill] sm:$0xff] }
 0x1a3   :  { %5220 = vmatprep.subr.bf16.mxu0 %v7000_v45  ;;  %5284 = vmatprep.subr.bf16.mxu1 %v7002_v53  ;;  %v8923_v45 = vld [vmem:[#allocation59_spill] sm:$0xff]  ;;  %v8924_v53 = vld [vmem:[#allocation60_spill] sm:$0xff] }
 0x1a6   :  { %5222 = vmatpush1.bf16.msra.mxu0 %v7004_v54  ;;  %5286 = vmatpush1.bf16.msra.mxu1 %v8883_v9  ;;  %v8925_v54 = vld [vmem:[#allocation61_spill] sm:$0xff] }
 0x1a7   :  { %5224 = vmatprep.subr.bf16.mxu0 %v8884_v10  ;;  %5288 = vmatprep.subr.bf16.mxu1 %v8885_v15 }
 0x1aa   :  { %5226 = vmatpush1.bf16.msra.mxu0 %v8886_v16  ;;  %5290 = vmatpush1.bf16.msra.mxu1 %v8887_v21  ;;  %v7281_v21 = vsub.s32 3, %v7150_v62 }
 0x1ab   :  { %5228 = vmatprep.subr.bf16.mxu0 %v8888_v22  ;;  %5292 = vmatprep.subr.bf16.mxu1 %v8889_v29 }
 0x1ac   :  { %8930 = vst [vmem:[#allocation19_spill] sm:$0xff] %v7281_v21  ;;  %v469_v29 = vrot.slane %v452_v11, %v7281_v21 }
 0x1ae   :  { %5230 = vmatpush1.bf16.msra.mxu0 %v8890_v31  ;;  %5294 = vmatpush1.bf16.msra.mxu1 %v8891_v33  ;;  %v465_v31 = vrot.slane %v452_v11, %v7164_v40 }
 0x1af   :  { %5232 = vmatprep.subr.bf16.mxu0 %v8892_v37  ;;  %5296 = vmatprep.subr.bf16.mxu1 %v8893_v41  ;;  %v690_v37 = vld [vmem:[%s8614_s3] sm:$0x7] }
 0x1b0   :  { %v699_v62 = vrot.slane %v690_v37, %v8929_v52 }
 0x1b2   :  { %5234 = vmatpush1.bf16.msra.mxu0 %v8894_v42  ;;  %5298 = vmatpush1.bf16.msra.mxu1 %v8895_v46 }
 0x1b3   :  { %5236 = vmatprep.subr.bf16.mxu0 %v8896_v50  ;;  %5300 = vmatprep.subr.bf16.mxu1 %v8897_v51  ;;  %v695_v51 = vrot.slane %v690_v37, %v8928_v25 }
 0x1b6   :  { %5238 = vmatpush1.bf16.msra.mxu0 %v8898_v55  ;;  %5302 = vmatpush1.bf16.msra.mxu1 %v8899_v59  ;;  %v638_v59 = vld [vmem:[#allocation3 + $0x18] sm:$0xff] }
 0x1b7   :  { %5240 = vmatprep.subr.bf16.mxu0 %v8900_v60  ;;  %5304 = vmatprep.subr.bf16.mxu1 %v8901_v63 }
 0x1ba   :  { %5242 = vmatpush1.bf16.msra.mxu0 %v8902_v7  ;;  %5306 = vmatpush1.bf16.msra.mxu1 %v8903_v8 }
 0x1bb   :  { %5244 = vmatprep.subr.bf16.mxu0 %v8904_v12  ;;  %5308 = vmatprep.subr.bf16.mxu1 %v8905_v20 }
 0x1be   :  { %5246 = vmatpush1.bf16.msra.mxu0 %v8906_v23  ;;  %5310 = vmatpush1.bf16.msra.mxu1 %v8907_v24  ;;  %v639_v24 = vld [vmem:[#allocation3 + $0x20] sm:$0xff] }
 0x1bf   :  { %5248 = vmatprep.subr.bf16.mxu0 %v8908_v26  ;;  %5312 = vmatprep.subr.bf16.mxu1 %v8909_v38 }
 0x1c2   :  { %5250 = vmatpush1.bf16.msra.mxu0 %v8910_v39  ;;  %5314 = vmatpush1.bf16.msra.mxu1 %v8911_v43 }
 0x1c3   :  { %5252 = vmatprep.subr.bf16.mxu0 %v8912_v47  ;;  %5316 = vmatprep.subr.bf16.mxu1 %v8913_v56 }
 0x1c6   :  { %5254 = vmatpush1.bf16.msra.mxu0 %v8914_v57  ;;  %5318 = vmatpush1.bf16.msra.mxu1 %v8915_v58  ;;  %v8931_v58 = vld [vmem:[#allocation62_spill] sm:$0xff] }
 0x1c7   :  { %5256 = vmatprep.subr.bf16.mxu0 %v8916_v2  ;;  %5320 = vmatprep.subr.bf16.mxu1 %v8917_v13 }
 0x1ca   :  { %5258 = vmatpush1.bf16.msra.mxu0 %v8918_v14  ;;  %5322 = vmatpush1.bf16.msra.mxu1 %v8919_v17 }
 0x1cb   :  { %5260 = vmatprep.subr.bf16.mxu0 %v8920_v28  ;;  %5324 = vmatprep.subr.bf16.mxu1 %v8921_v30  ;;  %v703_v30 = vrot.slane %v690_v37, %v7164_v40  ;;  %v1203_v37 = vld [vmem:[#allocation8 + $0x68] sm:$0xff] }
 0x1ce   :  { %5262 = vmatpush1.bf16.msra.mxu0 %v8922_v35  ;;  %5326 = vmatpush1.bf16.msra.mxu1 %v8923_v45 }
 0x1cf   :  { %5264 = vmatprep.subr.bf16.mxu0 %v8924_v53  ;;  %5328 = vmatprep.subr.bf16.mxu1 %v8925_v54  ;;  %v640_v54 = vld [vmem:[#allocation3 + $0x28] sm:$0xff] }
 0x1d2   :  { %5266 = vmatpush1.bf16.msra.mxu0 %v8926_v1  ;;  %5330 = vmatpush1.bf16.msra.mxu1 %v8927_v34 }
 0x1d3   :  { %5363 = vmatprep.subr.bf16.mxu1 %v8879_v48  ;;  %5332 = vmatprep.subr.bf16.mxu0 %v7272_v44 }
 0x248   :  { %v540_v4 = vpop.f32.mrb[2].mxu0  ;;  %v611_v6 = vpop.f32.mrb[2].mxu1 }
 0x249   :  { %v541_v27 = vadd.f32 %v540_v4, %v457_v19  ;;  %v542_v49 = vpop.f32.mrb[3].mxu0  ;;  %v613_v61 = vpop.f32.mrb[3].mxu1  ;;  %v612_v46 = vadd.f32 %v611_v6, %v465_v31  ;;  %v1193_v19 = vld [vmem:[#allocation8 + $0x18] sm:$0xff]  ;;  %v1192_v4 = vld [vmem:[#allocation8 + $0x10] sm:$0xff]  ;;  %v1195_v6 = vld [vmem:[#allocation8 + $0x28] sm:$0xff] }
 0x24a   :  { %v543_v9 = vadd.f32 %v542_v49, %v461_v36  ;;  %v614_v41 = vadd.f32 %v613_v61, %v469_v29  ;;  %v1200_v49 = vld [vmem:[#allocation8 + $0x50] sm:$0xff]  ;;  %v1199_v29 = vld [vmem:[#allocation8 + $0x48] sm:$0xff]  ;;  %v1198_v31 = vld [vmem:[#allocation8 + $0x40] sm:$0xff] }
 0x24b   :  { %v4517_v18 = vmul.f32 -1.442695, %v541_v27  ;;  %v1197_v27 = vld [vmem:[#allocation8 + $0x38] sm:$0xff] }
 0x24c   :  { %v4518_v10 = vmul.f32 -1.442695, %v543_v9  ;;  %v7298_v9 = vpack.c.bf16 %v1193_v19, %v1190_v32  ;;  %v1226_v19 = vld [vmem:[#allocation8 + $0x120] sm:$0xff] }
 0x24d   :  { %6460 = vpow2.f32 %v4517_v18 }
 0x24e   :  { %6462 = vpow2.f32 %v4518_v10  ;;  %v7300_v10 = vpack.c.bf16 %v1195_v6, %v1192_v4  ;;  %v1229_v6 = vld [vmem:[#allocation8 + $0x138] sm:$0xff] }
 0x257   :  { %v6461_v15 = vpop.eup %6460 }
 0x258   :  { %v619_v16 = vadd.f32 1.0, %v6461_v15  ;;  %v6463_v22 = vpop.eup %6462  ;;  %v1196_v15 = vld [vmem:[#allocation8 + $0x30] sm:$0xff] }
 0x259   :  { %v625_v33 = vadd.f32 1.0, %v6463_v22  ;;  %v7304_v22 = vpack.c.bf16 %v1200_v49, %v1197_v27  ;;  %v1231_v27 = vld [vmem:[#allocation8 + $0x148] sm:$0xff]  ;;  %v1233_v49 = vld [vmem:[#allocation8 + $0x158] sm:$0xff] }
 0x25a   :  { %6464 = vrcp.f32 %v619_v16 }
 0x25b   :  { %6466 = vrcp.f32 %v625_v33  ;;  %v1201_v33 = vld [vmem:[#allocation8 + $0x58] sm:$0xff] }
 0x264   :  { %v6465_v42 = vpop.eup %6464 }
 0x265   :  { %v628_v50 = vmul.f32 %v6465_v42, %v614_v41  ;;  %v6467_v39 = vpop.eup %6466  ;;  %v1206_v41 = vld [vmem:[#allocation8 + $0x80] sm:$0xff]  ;;  %v7312_v42 = vpack.c.bf16 %v1201_v33, %v1198_v31  ;;  %v1235_v33 = vld [vmem:[#allocation8 + $0x168] sm:$0xff] }
 0x266   :  { %v631_v47 = vsub.f32 1.0, %v6467_v39  ;;  %v633_v2 = vmul.f32 %v6467_v39, %v8931_v58  ;;  %v1216_v58 = vld [vmem:[#allocation8 + $0xd0] sm:$0xff] }
 0x267   :  { %v629_v55 = vadd.f32 %v628_v50, %v612_v46  ;;  %v1202_v46 = vld [vmem:[#allocation8 + $0x60] sm:$0xff]  ;;  %v7316_v50 = vpack.c.bf16 %v1206_v41, %v1203_v37  ;;  %v1237_v41 = vld [vmem:[#allocation8 + $0x178] sm:$0xff] }
 0x268   :  { %v773_v60 = vpop.f32.mrb[4].mxu0  ;;  %v844_v63 = vpop.f32.mrb[4].mxu1  ;;  %v1234_v37 = vld [vmem:[#allocation8 + $0x160] sm:$0xff] }
 0x269   :  { %6468 = vtanh.f32 %v629_v55  ;;  %v774_v7 = vadd.f32 %v773_v60, %v695_v51  ;;  %v775_v8 = vpop.f32.mrb[5].mxu0  ;;  %v4752_v12 = vpop.f32.mrb[5].mxu1  ;;  %v845_v45 = vadd.f32 %v844_v63, %v703_v30  ;;  %v1205_v51 = vld [vmem:[#allocation8 + $0x78] sm:$0xff]  ;;  %v1207_v55 = vld [vmem:[#allocation8 + $0x88] sm:$0xff]  ;;  %v1212_v60 = vld [vmem:[#allocation8 + $0xb0] sm:$0xff] }
 0x26a   :  { %v776_v20 = vadd.f32 %v775_v8, %v699_v62  ;;  %v1204_v62 = vld [vmem:[#allocation8 + $0x70] sm:$0xff]  ;;  %v7323_v63 = vpack.c.bf16 %v1205_v51, %v1202_v46  ;;  %v7375_v51 = vpack.c.bf16 %v1237_v41, %v1234_v37  ;;  %v1439_v37 = vld [vmem:[#allocation9 + $0xa0] sm:$0xff] }
 0x26b   :  { %v848_v23 = vadd.f32 %v774_v7, %v638_v59  ;;  %v1209_v59 = vld [vmem:[#allocation8 + $0x98] sm:$0xff]  ;;  %v7325_v7 = vpack.c.bf16 %v1207_v55, %v1204_v62  ;;  %v1208_v8 = vld [vmem:[#allocation8 + $0x90] sm:$0xff]  ;;  %v1420_v62 = vld [vmem:[#allocation9 + $0x8] sm:$0xff] }
 0x26c   :  { %v855_v38 = vadd.f32 %v776_v20, %v639_v24  ;;  %v7329_v12 = vpack.c.bf16 %v1212_v60, %v1209_v59  ;;  %v1211_v20 = vld [vmem:[#allocation8 + $0xa8] sm:$0xff]  ;;  %v1213_v24 = vld [vmem:[#allocation8 + $0xb8] sm:$0xff] }
 0x26d   :  { %v4519_v26 = vmul.f32 -1.442695, %v848_v23  ;;  %v1210_v23 = vld [vmem:[#allocation8 + $0xa0] sm:$0xff]  ;;  %v7333_v39 = vpack.c.bf16 %v1211_v20, %v1208_v8  ;;  %v1424_v55 = vld [vmem:[#allocation9 + $0x28] sm:$0xff]  ;;  %v1422_v59 = vld [vmem:[#allocation9 + $0x18] sm:$0xff] }
 0x26e   :  { %v4520_v43 = vmul.f32 -1.442695, %v855_v38  ;;  %v1218_v38 = vld [vmem:[#allocation8 + $0xe0] sm:$0xff]  ;;  %v7383_v60 = vpack.c.bf16 %v1424_v55, %v1420_v62  ;;  %v1426_v8 = vld [vmem:[#allocation9 + $0x38] sm:$0xff]  ;;  %v1437_v55 = vld [vmem:[#allocation9 + $0x90] sm:$0xff] }
 0x26f   :  { %6470 = vpow2.f32 %v4519_v26  ;;  %v1215_v26 = vld [vmem:[#allocation8 + $0xc8] sm:$0xff]  ;;  %v1419_v20 = vld [vmem:[#allocation9] sm:$0xff] }
 0x270   :  { %6472 = vpow2.f32 %v4520_v43  ;;  %v7335_v43 = vpack.c.bf16 %v1213_v24, %v1210_v23  ;;  %v1423_v23 = vld [vmem:[#allocation9 + $0x20] sm:$0xff]  ;;  %v7385_v24 = vpack.c.bf16 %v1426_v8, %v1422_v59  ;;  %v1441_v59 = vld [vmem:[#allocation9 + $0xb0] sm:$0xff] }
 0x271   :  { %v7414_v8 = vpack.c.bf16 %v1441_v59, %v1437_v55  ;;  %v1455_v59 = vld [vmem:[#allocation9 + $0x120] sm:$0xff] }
 0x273   :  { %v6469_v56 = vpop.eup %6468 }
 0x274   :  { %v632_v57 = vmul.f32 %v6469_v56, %v631_v47  ;;  %v1214_v47 = vld [vmem:[#allocation8 + $0xc0] sm:$0xff]  ;;  %v7339_v56 = vpack.c.bf16 %v1218_v38, %v1215_v26  ;;  %v7387_v26 = vpack.c.bf16 %v1423_v23, %v1419_v20  ;;  %v1421_v38 = vld [vmem:[#allocation9 + $0x10] sm:$0xff]  ;;  %v1444_v20 = vld [vmem:[#allocation9 + $0xc8] sm:$0xff] }
 0x275   :  { %v1448_v23 = vld [vmem:[#allocation9 + $0xe8] sm:$0xff] }
 0x276   :  { %v7291_v13 = vadd.f32 %v633_v2, %v632_v57  ;;  %v1217_v57 = vld [vmem:[#allocation8 + $0xd8] sm:$0xff]  ;;  %v1219_v2 = vld [vmem:[#allocation8 + $0xe8] sm:$0xff] }
 0x277   :  { %v7345_v30 = vpack.c.bf16 %v1219_v2, %v1216_v58  ;;  %v1428_v58 = vld [vmem:[#allocation9 + $0x48] sm:$0xff] }
 0x278   :  { %636 = vst [vmem:[#allocation11] sm:$0xff] %v7291_v13  ;;  %1085 = vmatprep.mubr.f32.mxu0 %v7291_v13  ;;  %1156 = vmatprep.mubr.f32.mxu1 %v7291_v13  ;;  %v1432_v2 = vld [vmem:[#allocation9 + $0x68] sm:$0xff] }
 0x279   :  { %v6471_v14 = vpop.eup %6470 }
 0x27a   :  { %v852_v17 = vadd.f32 1.0, %v6471_v14  ;;  %v6473_v28 = vpop.eup %6472  ;;  %v1221_v14 = vld [vmem:[#allocation8 + $0xf8] sm:$0xff] }
 0x27b   :  { %v859_v35 = vadd.f32 1.0, %v6473_v28  ;;  %v7343_v28 = vpack.c.bf16 %v1217_v57, %v1214_v47  ;;  %v1425_v47 = vld [vmem:[#allocation9 + $0x30] sm:$0xff] }
 0x27c   :  { %6474 = vrcp.f32 %v852_v17  ;;  %v1224_v17 = vld [vmem:[#allocation8 + $0x110] sm:$0xff]  ;;  %v7390_v57 = vpack.c.bf16 %v1425_v47, %v1421_v38  ;;  %v1446_v38 = vld [vmem:[#allocation9 + $0xd8] sm:$0xff]  ;;  %v7419_v47 = vpack.c.bf16 %v1448_v23, %v1444_v20 }
 0x27d   :  { %6476 = vrcp.f32 %v859_v35  ;;  %v1220_v35 = vld [vmem:[#allocation8 + $0xf0] sm:$0xff] }
 0x27e   :  { %8932 = vst [vmem:[#allocation20_spill] sm:$0xff] %v7419_v47  ;;  %v1453_v20 = vld [vmem:[#allocation9 + $0x110] sm:$0xff] }
 0x27f   :  { %v1457_v23 = vld [vmem:[#allocation9 + $0x130] sm:$0xff] }
 0x286   :  { %v6475_v53 = vpop.eup %6474 }
 0x287   :  { %v862_v1 = vmul.f32 %v6475_v53, %v845_v45  ;;  %v6477_v0 = vpop.eup %6476  ;;  %v7349_v45 = vpack.c.bf16 %v1224_v17, %v1221_v14  ;;  %v1223_v53 = vld [vmem:[#allocation8 + $0x108] sm:$0xff]  ;;  %v1430_v14 = vld [vmem:[#allocation9 + $0x58] sm:$0xff]  ;;  %v7395_v17 = vpack.c.bf16 %v1432_v2, %v1428_v58  ;;  %v1443_v2 = vld [vmem:[#allocation9 + $0xc0] sm:$0xff] }
 0x288   :  { %v865_v11 = vsub.f32 1.0, %v6477_v0  ;;  %v867_v18 = vmul.f32 %v6477_v0, %v7168_v5  ;;  %v7310_v5 = vpack.c.bf16 %v1199_v29, %v1196_v15  ;;  %v1230_v0 = vld [vmem:[#allocation8 + $0x140] sm:$0xff]  ;;  %v7353_v32 = vpack.c.bf16 %v1223_v53, %v1220_v35  ;;  %v1232_v29 = vld [vmem:[#allocation8 + $0x150] sm:$0xff]  ;;  %v1434_v35 = vld [vmem:[#allocation9 + $0x78] sm:$0xff] }
 0x289   :  { %v863_v34 = vadd.f32 %v862_v1, %v640_v54  ;;  %v1222_v54 = vld [vmem:[#allocation8 + $0x100] sm:$0xff]  ;;  %v1225_v1 = vld [vmem:[#allocation8 + $0x118] sm:$0xff]  ;;  %v7373_v46 = vpack.c.bf16 %v1235_v33, %v1232_v29 }
 0x28a   :  { %v1427_v53 = vld [vmem:[#allocation9 + $0x40] sm:$0xff]  ;;  %v1442_v29 = vld [vmem:[#allocation9 + $0xb8] sm:$0xff] }
 0x28b   :  { %6478 = vtanh.f32 %v863_v34  ;;  %v1227_v34 = vld [vmem:[#allocation8 + $0x128] sm:$0xff]  ;;  %v1435_v33 = vld [vmem:[#allocation9 + $0x80] sm:$0xff]  ;;  %v1450_v58 = vld [vmem:[#allocation9 + $0xf8] sm:$0xff] }
 0x28c   :  { %v7359_v4 = vpack.c.bf16 %v1230_v0, %v1227_v34  ;;  %v1429_v0 = vld [vmem:[#allocation9 + $0x50] sm:$0xff]  ;;  %v7411_v62 = vpack.c.bf16 %v1439_v37, %v1435_v33  ;;  %v1458_v33 = vld [vmem:[#allocation9 + $0x138] sm:$0xff]  ;;  %v1451_v37 = vld [vmem:[#allocation9 + $0x100] sm:$0xff] }
 0x295   :  { %v6479_v36 = vpop.eup %6478 }
 0x296   :  { %v866_v61 = vmul.f32 %v6479_v36, %v865_v11  ;;  %v7355_v11 = vpack.c.bf16 %v1225_v1, %v1222_v54  ;;  %v1228_v36 = vld [vmem:[#allocation8 + $0x130] sm:$0xff]  ;;  %v1431_v54 = vld [vmem:[#allocation9 + $0x60] sm:$0xff]  ;;  %v7397_v1 = vpack.c.bf16 %v1434_v35, %v1430_v14  ;;  %v7421_v35 = vpack.c.bf16 %v1450_v58, %v1446_v38 }
 0x297   :  { %v7365_v15 = vpack.c.bf16 %v1231_v27, %v1228_v36  ;;  %v7399_v34 = vpack.c.bf16 %v1431_v54, %v1427_v53  ;;  %v1436_v36 = vld [vmem:[#allocation9 + $0x88] sm:$0xff]  ;;  %v1447_v14 = vld [vmem:[#allocation9 + $0xe0] sm:$0xff]  ;;  %v1445_v54 = vld [vmem:[#allocation9 + $0xd0] sm:$0xff]  ;;  %v7436_v38 = vpack.c.bf16 %v1455_v59, %v1451_v37  ;;  %v7438_v58 = vpack.c.bf16 %v1457_v23, %v1453_v20 }
 0x298   :  { %v7302_v16 = vadd.f32 %v867_v18, %v866_v61  ;;  %v1236_v61 = vld [vmem:[#allocation8 + $0x170] sm:$0xff]  ;;  %v7363_v18 = vpack.c.bf16 %v1229_v6, %v1226_v19  ;;  %v1440_v27 = vld [vmem:[#allocation9 + $0xa8] sm:$0xff]  ;;  %8933 = vst [vmem:[#allocation21_spill] sm:$0xff] %v7421_v35  ;;  %v7423_v53 = vpack.c.bf16 %v1447_v14, %v1443_v2 }
 0x299   :  { %v7369_v31 = vpack.c.bf16 %v1236_v61, %v1233_v49  ;;  %v1433_v19 = vld [vmem:[#allocation9 + $0x70] sm:$0xff]  ;;  %v1438_v49 = vld [vmem:[#allocation9 + $0x98] sm:$0xff]  ;;  %v7407_v61 = vpack.c.bf16 %v1440_v27, %v1436_v36  ;;  %v1452_v36 = vld [vmem:[#allocation9 + $0x108] sm:$0xff]  ;;  %8938 = vst [vmem:[#allocation26_spill] sm:$0xff] %v7436_v38 }
 0x29a   :  { %1086 = vmatmul.mubr.f32.vlgmr.msra.gmra.mrb[6].mxu0 %v7302_v16  ;;  %1157 = vmatmul.mubr.f32.vlgmr.msra.gmra.mrb[6].mxu1 %v7302_v16  ;;  %v7402_v6 = vpack.c.bf16 %v1433_v19, %v1429_v0  ;;  %v7409_v41 = vpack.c.bf16 %v1442_v29, %v1438_v49  ;;  %8934 = vst [vmem:[#allocation22_spill] sm:$0xff] %v7423_v53  ;;  %v1449_v0 = vld [vmem:[#allocation9 + $0xf0] sm:$0xff]  ;;  %v1456_v27 = vld [vmem:[#allocation9 + $0x128] sm:$0xff]  ;;  %v1454_v29 = vld [vmem:[#allocation9 + $0x118] sm:$0xff] }
 0x29b   :  { %5334 = vmatpush1.bf16.msra.mxu0 %v7298_v9  ;;  %5365 = vmatpush3.bf16.msra.mxu1 %v7300_v10  ;;  %v7426_v19 = vpack.c.bf16 %v1449_v0, %v1445_v54  ;;  %v7431_v49 = vpack.c.bf16 %v1456_v27, %v1452_v36  ;;  %v7433_v55 = vpack.c.bf16 %v1458_v33, %v1454_v29  ;;  %v1460_v2 = vld [vmem:[#allocation9 + $0x148] sm:$0xff]  ;;  %v1462_v54 = vld [vmem:[#allocation9 + $0x158] sm:$0xff]  ;;  %v1459_v27 = vld [vmem:[#allocation9 + $0x140] sm:$0xff] }
 0x29c   :  { %5336 = vmatprep.subr.bf16.mxu0 %v7304_v22  ;;  %5366 = vmatprep.subr.bf16.mxu1 %v8879_v48  ;;  %8939 = vst [vmem:[#allocation27_spill] sm:$0xff] %v7438_v58  ;;  %v1464_v14 = vld [vmem:[#allocation9 + $0x168] sm:$0xff]  ;;  %v1466_v36 = vld [vmem:[#allocation9 + $0x178] sm:$0xff]  ;;  %v1463_v33 = vld [vmem:[#allocation9 + $0x160] sm:$0xff] }
 0x29d   :  { %1319 = vmatprep.mubr.f32.mxu0 %v8882_v3  ;;  %4785 = vmatprep.mubr.msk.f32.mxu1 %vm6764_vm0, %v8882_v3  ;;  %8935 = vst [vmem:[#allocation23_spill] sm:$0xff] %v7426_v19  ;;  %8936 = vst [vmem:[#allocation24_spill] sm:$0xff] %v7431_v49  ;;  %v7443_v0 = vpack.c.bf16 %v1464_v14, %v1460_v2  ;;  %v7445_v29 = vpack.c.bf16 %v1466_v36, %v1462_v54  ;;  %v1461_v37 = vld [vmem:[#allocation9 + $0x150] sm:$0xff]  ;;  %v1474_v14 = vld [vmem:[#allocation9 + $0x1b8] sm:$0xff] }
 0x29e   :  { %8937 = vst [vmem:[#allocation25_spill] sm:$0xff] %v7433_v55  ;;  %v1465_v59 = vld [vmem:[#allocation9 + $0x170] sm:$0xff]  ;;  %v7448_v20 = vpack.c.bf16 %v1463_v33, %v1459_v27  ;;  %v1467_v54 = vld [vmem:[#allocation9 + $0x180] sm:$0xff] }
 0x29f   :  { %5338 = vmatpush1.bf16.msra.mxu0 %v7310_v5  ;;  %5368 = vmatpush3.bf16.msra.mxu1 %v7312_v42  ;;  %8940 = vst [vmem:[#allocation28_spill] sm:$0xff] %v7443_v0  ;;  %8941 = vst [vmem:[#allocation29_spill] sm:$0xff] %v7445_v29  ;;  %v7450_v23 = vpack.c.bf16 %v1465_v59, %v1461_v37  ;;  %v1471_v36 = vld [vmem:[#allocation9 + $0x1a0] sm:$0xff]  ;;  %v1469_v33 = vld [vmem:[#allocation9 + $0x190] sm:$0xff] }
 0x2a0   :  { %5340 = vmatprep.subr.bf16.mxu0 %v7316_v50  ;;  %5369 = vmatprep.subr.bf16.mxu1 %v8879_v48  ;;  %8942 = vst [vmem:[#allocation30_spill] sm:$0xff] %v7448_v20  ;;  %v7459_v27 = vpack.c.bf16 %v1471_v36, %v1467_v54  ;;  %v1473_v37 = vld [vmem:[#allocation9 + $0x1b0] sm:$0xff] }
 0x2a1   :  { %8943 = vst [vmem:[#allocation31_spill] sm:$0xff] %v7450_v23  ;;  %v7462_v59 = vpack.c.bf16 %v1473_v37, %v1469_v33  ;;  %v1477_v33 = vld [vmem:[#allocation9 + $0x1d0] sm:$0xff] }
 0x2a2   :  { %8946 = vst [vmem:[#allocation34_spill] sm:$0xff] %v7459_v27  ;;  %v1481_v37 = vld [vmem:[#allocation9 + $0x1f0] sm:$0xff] }
 0x2a3   :  { %5342 = vmatpush1.bf16.msra.mxu0 %v7323_v63  ;;  %5371 = vmatpush3.bf16.msra.mxu1 %v7325_v7  ;;  %8947 = vst [vmem:[#allocation35_spill] sm:$0xff] %v7462_v59 }
 0x2a4   :  { %5344 = vmatprep.subr.bf16.mxu0 %v7329_v12  ;;  %5372 = vmatprep.subr.bf16.mxu1 %v8879_v48 }
 0x2a7   :  { %5346 = vmatpush1.bf16.msra.mxu0 %v7333_v39  ;;  %5374 = vmatpush3.bf16.msra.mxu1 %v7335_v43 }
 0x2a8   :  { %5348 = vmatprep.subr.bf16.mxu0 %v7339_v56  ;;  %5375 = vmatprep.subr.bf16.mxu1 %v8879_v48 }
 0x2ab   :  { %5350 = vmatpush1.bf16.msra.mxu0 %v7343_v28  ;;  %5377 = vmatpush3.bf16.msra.mxu1 %v7345_v30 }
 0x2ac   :  { %5352 = vmatprep.subr.bf16.mxu0 %v7349_v45  ;;  %5378 = vmatprep.subr.bf16.mxu1 %v8879_v48 }
 0x2af   :  { %5354 = vmatpush1.bf16.msra.mxu0 %v7353_v32  ;;  %5380 = vmatpush3.bf16.msra.mxu1 %v7355_v11 }
 0x2b0   :  { %5356 = vmatprep.subr.bf16.mxu0 %v7359_v4  ;;  %5381 = vmatprep.subr.bf16.mxu1 %v8879_v48 }
 0x2b3   :  { %5358 = vmatpush1.bf16.msra.mxu0 %v7363_v18  ;;  %5383 = vmatpush3.bf16.msra.mxu1 %v7365_v15 }
 0x2b4   :  { %5360 = vmatprep.subr.bf16.mxu0 %v7369_v31  ;;  %5384 = vmatprep.subr.bf16.mxu1 %v8879_v48 }
 0x2b7   :  { %5362 = vmatpush1.bf16.msra.mxu0 %v7373_v46  ;;  %5386 = vmatpush3.bf16.msra.mxu1 %v7375_v51 }
 0x2b8   :  { %5388 = vmatprep.subr.bf16.mxu0 %v7383_v60  ;;  %5452 = vmatprep.subr.bf16.mxu1 %v7385_v24 }
 0x2ba   :  { %1320 = vmatmul.mubr.f32.vlgmr.msra.gmra.mrb[8].mxu0 %v7302_v16  ;;  %4786 = vmatmul.mubr.f32.vlgmr.msra.gmra.mrb[8].mxu1 %v7302_v16 }
 0x2bb   :  { %5390 = vmatpush1.bf16.msra.mxu0 %v7387_v26  ;;  %5454 = vmatpush1.bf16.msra.mxu1 %v7390_v57 }
 0x2bc   :  { %5392 = vmatprep.subr.bf16.mxu0 %v7395_v17  ;;  %5456 = vmatprep.subr.bf16.mxu1 %v7397_v1 }
 0x2bf   :  { %5394 = vmatpush1.bf16.msra.mxu0 %v7399_v34  ;;  %5458 = vmatpush1.bf16.msra.mxu1 %v7402_v6 }
 0x2c0   :  { %5396 = vmatprep.subr.bf16.mxu0 %v7407_v61  ;;  %5460 = vmatprep.subr.bf16.mxu1 %v7409_v41 }
 0x2c3   :  { %5398 = vmatpush1.bf16.msra.mxu0 %v7411_v62  ;;  %5462 = vmatpush1.bf16.msra.mxu1 %v7414_v8 }
 0x2c4   :  { %5400 = vmatprep.subr.bf16.mxu0 %v7419_v47  ;;  %5464 = vmatprep.subr.bf16.mxu1 %v7421_v35  ;;  %v1187_v47 = vld [vmem:[#allocation3 + $0x38] sm:$0xff] }
 0x2c7   :  { %5402 = vmatpush1.bf16.msra.mxu0 %v7423_v53  ;;  %5466 = vmatpush1.bf16.msra.mxu1 %v7426_v19  ;;  %v1538_v19 = vld [vmem:[#allocation9 + $0x3b8] sm:$0xff] }
 0x2c8   :  { %5404 = vmatprep.subr.bf16.mxu0 %v7431_v49  ;;  %5468 = vmatprep.subr.bf16.mxu1 %v7433_v55  ;;  %v1472_v55 = vld [vmem:[#allocation9 + $0x1a8] sm:$0xff] }
 0x2cb   :  { %5406 = vmatpush1.bf16.msra.mxu0 %v7436_v38  ;;  %5470 = vmatpush1.bf16.msra.mxu1 %v7438_v58  ;;  %v1468_v38 = vld [vmem:[#allocation9 + $0x188] sm:$0xff]  ;;  %v1470_v58 = vld [vmem:[#allocation9 + $0x198] sm:$0xff] }
 0x2cc   :  { %5408 = vmatprep.subr.bf16.mxu0 %v7443_v0  ;;  %5472 = vmatprep.subr.bf16.mxu1 %v7445_v29  ;;  %v7455_v2 = vpack.c.bf16 %v1472_v55, %v1468_v38  ;;  %v7457_v49 = vpack.c.bf16 %v1474_v14, %v1470_v58  ;;  %v1480_v29 = vld [vmem:[#allocation9 + $0x1e8] sm:$0xff]  ;;  %v1482_v38 = vld [vmem:[#allocation9 + $0x1f8] sm:$0xff]  ;;  %v1475_v58 = vld [vmem:[#allocation9 + $0x1c0] sm:$0xff] }
 0x2cd   :  { %v1479_v14 = vld [vmem:[#allocation9 + $0x1e0] sm:$0xff]  ;;  %v1536_v0 = vld [vmem:[#allocation9 + $0x3a8] sm:$0xff] }
 0x2ce   :  { %8944 = vst [vmem:[#allocation32_spill] sm:$0xff] %v7455_v2  ;;  %8945 = vst [vmem:[#allocation33_spill] sm:$0xff] %v7457_v49  ;;  %v7471_v36 = vpack.c.bf16 %v1479_v14, %v1475_v58 }
 0x2cf   :  { %5410 = vmatpush1.bf16.msra.mxu0 %v7448_v20  ;;  %5474 = vmatpush1.bf16.msra.mxu1 %v7450_v23  ;;  %v1476_v20 = vld [vmem:[#allocation9 + $0x1c8] sm:$0xff]  ;;  %v1478_v23 = vld [vmem:[#allocation9 + $0x1d8] sm:$0xff] }
 0x2d0   :  { %5412 = vmatprep.subr.bf16.mxu0 %v7455_v2  ;;  %5476 = vmatprep.subr.bf16.mxu1 %v7457_v49  ;;  %v7467_v55 = vpack.c.bf16 %v1480_v29, %v1476_v20  ;;  %v7469_v54 = vpack.c.bf16 %v1482_v38, %v1478_v23  ;;  %8950 = vst [vmem:[#allocation38_spill] sm:$0xff] %v7471_v36  ;;  %v1488_v2 = vld [vmem:[#allocation9 + $0x228] sm:$0xff]  ;;  %v1490_v20 = vld [vmem:[#allocation9 + $0x238] sm:$0xff]  ;;  %v1483_v23 = vld [vmem:[#allocation9 + $0x200] sm:$0xff] }
 0x2d1   :  { %v7474_v49 = vpack.c.bf16 %v1481_v37, %v1477_v33  ;;  %v1487_v38 = vld [vmem:[#allocation9 + $0x220] sm:$0xff]  ;;  %v1485_v33 = vld [vmem:[#allocation9 + $0x210] sm:$0xff] }
 0x2d2   :  { %8948 = vst [vmem:[#allocation36_spill] sm:$0xff] %v7467_v55  ;;  %8949 = vst [vmem:[#allocation37_spill] sm:$0xff] %v7469_v54  ;;  %v7483_v14 = vpack.c.bf16 %v1487_v38, %v1483_v23  ;;  %v1489_v37 = vld [vmem:[#allocation9 + $0x230] sm:$0xff] }
 0x2d3   :  { %5414 = vmatpush1.bf16.msra.mxu0 %v7459_v27  ;;  %5478 = vmatpush1.bf16.msra.mxu1 %v7462_v59  ;;  %8951 = vst [vmem:[#allocation39_spill] sm:$0xff] %v7474_v49  ;;  %v1484_v27 = vld [vmem:[#allocation9 + $0x208] sm:$0xff]  ;;  %v1486_v59 = vld [vmem:[#allocation9 + $0x218] sm:$0xff] }
 0x2d4   :  { %5416 = vmatprep.subr.bf16.mxu0 %v7467_v55  ;;  %5480 = vmatprep.subr.bf16.mxu1 %v7469_v54  ;;  %v7479_v29 = vpack.c.bf16 %v1488_v2, %v1484_v27  ;;  %v7481_v58 = vpack.c.bf16 %v1490_v20, %v1486_v59  ;;  %8954 = vst [vmem:[#allocation42_spill] sm:$0xff] %v7483_v14  ;;  %v1496_v55 = vld [vmem:[#allocation9 + $0x268] sm:$0xff]  ;;  %v1498_v27 = vld [vmem:[#allocation9 + $0x278] sm:$0xff]  ;;  %v1491_v59 = vld [vmem:[#allocation9 + $0x240] sm:$0xff] }
 0x2d5   :  { %v7486_v54 = vpack.c.bf16 %v1489_v37, %v1485_v33  ;;  %v1495_v20 = vld [vmem:[#allocation9 + $0x260] sm:$0xff]  ;;  %v1493_v33 = vld [vmem:[#allocation9 + $0x250] sm:$0xff] }
 0x2d6   :  { %8952 = vst [vmem:[#allocation40_spill] sm:$0xff] %v7479_v29  ;;  %8953 = vst [vmem:[#allocation41_spill] sm:$0xff] %v7481_v58  ;;  %v7495_v38 = vpack.c.bf16 %v1495_v20, %v1491_v59  ;;  %v1497_v37 = vld [vmem:[#allocation9 + $0x270] sm:$0xff] }
 0x2d7   :  { %5418 = vmatpush1.bf16.msra.mxu0 %v7471_v36  ;;  %5482 = vmatpush1.bf16.msra.mxu1 %v7474_v49  ;;  %8955 = vst [vmem:[#allocation43_spill] sm:$0xff] %v7486_v54  ;;  %v1492_v36 = vld [vmem:[#allocation9 + $0x248] sm:$0xff]  ;;  %v1494_v49 = vld [vmem:[#allocation9 + $0x258] sm:$0xff] }
 0x2d8   :  { %5420 = vmatprep.subr.bf16.mxu0 %v7479_v29  ;;  %5484 = vmatprep.subr.bf16.mxu1 %v7481_v58  ;;  %v7491_v2 = vpack.c.bf16 %v1496_v55, %v1492_v36  ;;  %v7493_v23 = vpack.c.bf16 %v1498_v27, %v1494_v49  ;;  %8958 = vst [vmem:[#allocation46_spill] sm:$0xff] %v7495_v38  ;;  %v1504_v29 = vld [vmem:[#allocation9 + $0x2a8] sm:$0xff]  ;;  %v1506_v49 = vld [vmem:[#allocation9 + $0x2b8] sm:$0xff]  ;;  %v1499_v36 = vld [vmem:[#allocation9 + $0x280] sm:$0xff] }
 0x2d9   :  { %v7498_v58 = vpack.c.bf16 %v1497_v37, %v1493_v33  ;;  %v1503_v27 = vld [vmem:[#allocation9 + $0x2a0] sm:$0xff]  ;;  %v1501_v33 = vld [vmem:[#allocation9 + $0x290] sm:$0xff] }
 0x2da   :  { %8956 = vst [vmem:[#allocation44_spill] sm:$0xff] %v7491_v2  ;;  %8957 = vst [vmem:[#allocation45_spill] sm:$0xff] %v7493_v23  ;;  %v7507_v20 = vpack.c.bf16 %v1503_v27, %v1499_v36  ;;  %v1505_v37 = vld [vmem:[#allocation9 + $0x2b0] sm:$0xff] }
 0x2db   :  { %5422 = vmatpush1.bf16.msra.mxu0 %v7483_v14  ;;  %5486 = vmatpush1.bf16.msra.mxu1 %v7486_v54  ;;  %8959 = vst [vmem:[#allocation47_spill] sm:$0xff] %v7498_v58  ;;  %v1500_v14 = vld [vmem:[#allocation9 + $0x288] sm:$0xff]  ;;  %v1502_v54 = vld [vmem:[#allocation9 + $0x298] sm:$0xff] }
 0x2dc   :  { %5424 = vmatprep.subr.bf16.mxu0 %v7491_v2  ;;  %5488 = vmatprep.subr.bf16.mxu1 %v7493_v23  ;;  %v7503_v55 = vpack.c.bf16 %v1504_v29, %v1500_v14  ;;  %v7505_v59 = vpack.c.bf16 %v1506_v49, %v1502_v54  ;;  %8962 = vst [vmem:[#allocation50_spill] sm:$0xff] %v7507_v20  ;;  %v1512_v2 = vld [vmem:[#allocation9 + $0x2e8] sm:$0xff]  ;;  %v1514_v54 = vld [vmem:[#allocation9 + $0x2f8] sm:$0xff]  ;;  %v1507_v14 = vld [vmem:[#allocation9 + $0x2c0] sm:$0xff] }
 0x2dd   :  { %v7510_v23 = vpack.c.bf16 %v1505_v37, %v1501_v33  ;;  %v1511_v49 = vld [vmem:[#allocation9 + $0x2e0] sm:$0xff]  ;;  %v1509_v33 = vld [vmem:[#allocation9 + $0x2d0] sm:$0xff] }
 0x2de   :  { %8960 = vst [vmem:[#allocation48_spill] sm:$0xff] %v7503_v55  ;;  %8961 = vst [vmem:[#allocation49_spill] sm:$0xff] %v7505_v59  ;;  %v7519_v27 = vpack.c.bf16 %v1511_v49, %v1507_v14  ;;  %v1513_v37 = vld [vmem:[#allocation9 + $0x2f0] sm:$0xff] }
 0x2df   :  { %5426 = vmatpush1.bf16.msra.mxu0 %v7495_v38  ;;  %5490 = vmatpush1.bf16.msra.mxu1 %v7498_v58  ;;  %8963 = vst [vmem:[#allocation51_spill] sm:$0xff] %v7510_v23  ;;  %v1508_v38 = vld [vmem:[#allocation9 + $0x2c8] sm:$0xff]  ;;  %v1510_v58 = vld [vmem:[#allocation9 + $0x2d8] sm:$0xff] }
 0x2e0   :  { %5428 = vmatprep.subr.bf16.mxu0 %v7503_v55  ;;  %5492 = vmatprep.subr.bf16.mxu1 %v7505_v59  ;;  %v7515_v29 = vpack.c.bf16 %v1512_v2, %v1508_v38  ;;  %v7517_v36 = vpack.c.bf16 %v1514_v54, %v1510_v58  ;;  %8966 = vst [vmem:[#allocation54_spill] sm:$0xff] %v7519_v27  ;;  %v1520_v55 = vld [vmem:[#allocation9 + $0x328] sm:$0xff]  ;;  %v1522_v58 = vld [vmem:[#allocation9 + $0x338] sm:$0xff]  ;;  %v1515_v38 = vld [vmem:[#allocation9 + $0x300] sm:$0xff] }
 0x2e1   :  { %v7522_v59 = vpack.c.bf16 %v1513_v37, %v1509_v33  ;;  %v1519_v54 = vld [vmem:[#allocation9 + $0x320] sm:$0xff]  ;;  %v1517_v33 = vld [vmem:[#allocation9 + $0x310] sm:$0xff] }
 0x2e2   :  { %8964 = vst [vmem:[#allocation52_spill] sm:$0xff] %v7515_v29  ;;  %8965 = vst [vmem:[#allocation53_spill] sm:$0xff] %v7517_v36  ;;  %v7531_v49 = vpack.c.bf16 %v1519_v54, %v1515_v38  ;;  %v1521_v37 = vld [vmem:[#allocation9 + $0x330] sm:$0xff] }
 0x2e3   :  { %5430 = vmatpush1.bf16.msra.mxu0 %v7507_v20  ;;  %5494 = vmatpush1.bf16.msra.mxu1 %v7510_v23  ;;  %8967 = vst [vmem:[#allocation55_spill] sm:$0xff] %v7522_v59  ;;  %v1516_v20 = vld [vmem:[#allocation9 + $0x308] sm:$0xff]  ;;  %v1518_v23 = vld [vmem:[#allocation9 + $0x318] sm:$0xff] }
 0x2e4   :  { %5432 = vmatprep.subr.bf16.mxu0 %v7515_v29  ;;  %5496 = vmatprep.subr.bf16.mxu1 %v7517_v36  ;;  %v7527_v2 = vpack.c.bf16 %v1520_v55, %v1516_v20  ;;  %v7529_v14 = vpack.c.bf16 %v1522_v58, %v1518_v23  ;;  %8970 = vst [vmem:[#allocation58_spill] sm:$0xff] %v7531_v49  ;;  %v1528_v29 = vld [vmem:[#allocation9 + $0x368] sm:$0xff]  ;;  %v1530_v23 = vld [vmem:[#allocation9 + $0x378] sm:$0xff]  ;;  %v1523_v20 = vld [vmem:[#allocation9 + $0x340] sm:$0xff] }
 0x2e5   :  { %v7534_v36 = vpack.c.bf16 %v1521_v37, %v1517_v33  ;;  %v1527_v58 = vld [vmem:[#allocation9 + $0x360] sm:$0xff]  ;;  %v1525_v33 = vld [vmem:[#allocation9 + $0x350] sm:$0xff] }
 0x2e6   :  { %8968 = vst [vmem:[#allocation56_spill] sm:$0xff] %v7527_v2  ;;  %8969 = vst [vmem:[#allocation57_spill] sm:$0xff] %v7529_v14  ;;  %v7543_v54 = vpack.c.bf16 %v1527_v58, %v1523_v20  ;;  %v1529_v37 = vld [vmem:[#allocation9 + $0x370] sm:$0xff] }
 0x2e7   :  { %5434 = vmatpush1.bf16.msra.mxu0 %v7519_v27  ;;  %5498 = vmatpush1.bf16.msra.mxu1 %v7522_v59  ;;  %8971 = vst [vmem:[#allocation59_spill] sm:$0xff] %v7534_v36  ;;  %v1524_v27 = vld [vmem:[#allocation9 + $0x348] sm:$0xff]  ;;  %v1526_v59 = vld [vmem:[#allocation9 + $0x358] sm:$0xff]  ;;  %v1533_v20 = vld [vmem:[#allocation9 + $0x390] sm:$0xff] }
 0x2e8   :  { %5436 = vmatprep.subr.bf16.mxu0 %v7527_v2  ;;  %5500 = vmatprep.subr.bf16.mxu1 %v7529_v14  ;;  %v7539_v55 = vpack.c.bf16 %v1528_v29, %v1524_v27  ;;  %v7541_v38 = vpack.c.bf16 %v1530_v23, %v1526_v59  ;;  %8974 = vst [vmem:[#allocation63_spill] sm:$0xff] %v7543_v54  ;;  %v1532_v2 = vld [vmem:[#allocation9 + $0x388] sm:$0xff]  ;;  %v1531_v59 = vld [vmem:[#allocation9 + $0x380] sm:$0xff] }
 0x2e9   :  { %v7546_v14 = vpack.c.bf16 %v1529_v37, %v1525_v33  ;;  %v7549_v29 = vpack.c.bf16 %v1536_v0, %v1532_v2  ;;  %v1535_v23 = vld [vmem:[#allocation9 + $0x3a0] sm:$0xff]  ;;  %v1537_v33 = vld [vmem:[#allocation9 + $0x3b0] sm:$0xff]  ;;  %v1540_v37 = vld [vmem:[#allocation9 + $0x3c8] sm:$0xff] }
 0x2ea   :  { %8972 = vst [vmem:[#allocation60_spill] sm:$0xff] %v7539_v55  ;;  %8973 = vst [vmem:[#allocation61_spill] sm:$0xff] %v7541_v38  ;;  %v7555_v58 = vpack.c.bf16 %v1535_v23, %v1531_v59  ;;  %v7559_v0 = vpack.c.bf16 %v1537_v33, %v1533_v20  ;;  %v1542_v2 = vld [vmem:[#allocation9 + $0x3d8] sm:$0xff]  ;;  %v1545_v59 = vld [vmem:[#allocation9 + $0x3f0] sm:$0xff] }
 0x2eb   :  { %5438 = vmatpush1.bf16.msra.mxu0 %v7531_v49  ;;  %5502 = vmatpush1.bf16.msra.mxu1 %v7534_v36  ;;  %8975 = vst [vmem:[#allocation64_spill] sm:$0xff] %v7546_v14  ;;  %v1534_v49 = vld [vmem:[#allocation9 + $0x398] sm:$0xff]  ;;  %8976 = vst [vmem:[#allocation65_spill] sm:$0xff] %v7549_v29 }
 0x2ec   :  { %5440 = vmatprep.subr.bf16.mxu0 %v7539_v55  ;;  %5504 = vmatprep.subr.bf16.mxu1 %v7541_v38  ;;  %v7551_v27 = vpack.c.bf16 %v1538_v19, %v1534_v49  ;;  %8978 = vst [vmem:[#allocation62_spill] sm:$0xff] %v7555_v58  ;;  %v1544_v55 = vld [vmem:[#allocation9 + $0x3e8] sm:$0xff]  ;;  %8979 = vst [vmem:[#allocation67_spill] sm:$0xff] %v7559_v0  ;;  %v1546_v49 = vld [vmem:[#allocation9 + $0x3f8] sm:$0xff] }
 0x2ed   :  { %v7561_v19 = vpack.c.bf16 %v1544_v55, %v1540_v37  ;;  %v1539_v38 = vld [vmem:[#allocation9 + $0x3c0] sm:$0xff]  ;;  %v7563_v36 = vpack.c.bf16 %v1546_v49, %v1542_v2  ;;  %v999_v55 = vld [vmem:[%s8616_s5] sm:$0xf] }
 0x2ee   :  { %8977 = vst [vmem:[#allocation66_spill] sm:$0xff] %v7551_v27  ;;  %v1008_v20 = vrot.slane %v999_v55, %v8929_v52 }
 0x2ef   :  { %5442 = vmatpush1.bf16.msra.mxu0 %v7543_v54  ;;  %5506 = vmatpush1.bf16.msra.mxu1 %v7546_v14  ;;  %8980 = vst [vmem:[#allocation68_spill] sm:$0xff] %v7561_v19  ;;  %8981 = vst [vmem:[#allocation69_spill] sm:$0xff] %v7563_v36  ;;  %v1543_v54 = vld [vmem:[#allocation9 + $0x3e0] sm:$0xff]  ;;  %v1541_v14 = vld [vmem:[#allocation9 + $0x3d0] sm:$0xff] }
 0x2f0   :  { %5444 = vmatprep.subr.bf16.mxu0 %v7549_v29  ;;  %5508 = vmatprep.subr.bf16.mxu1 %v7551_v27  ;;  %v7567_v23 = vpack.c.bf16 %v1543_v54, %v1539_v38  ;;  %v7569_v29 = vpack.c.bf16 %v1545_v59, %v1541_v14  ;;  %v1004_v38 = vrot.slane %v999_v55, %v8928_v25 }
 0x2f2   :  { %8982 = vst [vmem:[#allocation70_spill] sm:$0xff] %v7567_v23  ;;  %8983 = vst [vmem:[#allocation71_spill] sm:$0xff] %v7569_v29 }
 0x2f3   :  { %5446 = vmatpush1.bf16.msra.mxu0 %v7555_v58  ;;  %5510 = vmatpush1.bf16.msra.mxu1 %v7559_v0  ;;  %v1012_v0 = vrot.slane %v999_v55, %v7164_v40 }
 0x2f4   :  { %5448 = vmatprep.subr.bf16.mxu0 %v7561_v19  ;;  %5512 = vmatprep.subr.bf16.mxu1 %v7563_v36  ;;  %v1016_v19 = vrot.slane %v999_v55, %v7281_v21 }
 0x2f7   :  { %5450 = vmatpush1.bf16.msra.mxu0 %v7567_v23  ;;  %5514 = vmatpush1.bf16.msra.mxu1 %v7569_v29 }
 0x2f8   :  { %5516 = vmatprep.subr.bf16.mxu0 %v7272_v44  ;;  %5547 = vmatprep.subr.bf16.mxu1 %v8879_v48 }
 0x36d   :  { %v1087_v14 = vpop.f32.mrb[6].mxu0  ;;  %v1158_v54 = vpop.f32.mrb[6].mxu1 }
 0x36e   :  { %v1088_v33 = vadd.f32 %v1087_v14, %v1004_v38  ;;  %v1089_v37 = vpop.f32.mrb[7].mxu0  ;;  %v1160_v2 = vpop.f32.mrb[7].mxu1  ;;  %v1238_v38 = vld [vmem:[%s8614_s3] sm:$0x7] }
 0x36f   :  { %v1090_v59 = vadd.f32 %v1089_v37, %v1008_v20  ;;  %v1161_v14 = vadd.f32 %v1160_v2, %v1016_v19  ;;  %v1247_v37 = vrot.slane %v1238_v38, %v8929_v52 }
 0x370   :  { %v4521_v49 = vmul.f32 -1.442695, %v1088_v33  ;;  %v1159_v33 = vadd.f32 %v1158_v54, %v1012_v0 }
 0x371   :  { %v4522_v29 = vmul.f32 -1.442695, %v1090_v59 }
 0x372   :  { %6480 = vpow2.f32 %v4521_v49  ;;  %v1186_v49 = vld [vmem:[#allocation3 + $0x30] sm:$0xff] }
 0x373   :  { %6482 = vpow2.f32 %v4522_v29  ;;  %v1243_v29 = vrot.slane %v1238_v38, %v8928_v25 }
 0x37c   :  { %v6481_v44 = vpop.eup %6480 }
 0x37d   :  { %v1166_v23 = vadd.f32 1.0, %v6481_v44  ;;  %v6483_v36 = vpop.eup %6482 }
 0x37e   :  { %v1172_v58 = vadd.f32 1.0, %v6483_v36 }
 0x37f   :  { %6484 = vrcp.f32 %v1166_v23 }
 0x380   :  { %6486 = vrcp.f32 %v1172_v58 }
 0x389   :  { %v6485_v27 = vpop.eup %6484 }
 0x38a   :  { %v1175_v20 = vmul.f32 %v6485_v27, %v1161_v14  ;;  %v6487_v0 = vpop.eup %6486 }
 0x38b   :  { %v1178_v58 = vsub.f32 1.0, %v6487_v0 }
 0x38c   :  { %v1176_v23 = vadd.f32 %v1175_v20, %v1159_v33  ;;  %v1180_v33 = vmul.f32 %v6487_v0, %v7291_v13 }
 0x38d   :  { %v1321_v59 = vpop.f32.mrb[8].mxu0  ;;  %v1392_v44 = vpop.f32.mrb[8].mxu1 }
 0x38e   :  { %6488 = vtanh.f32 %v1176_v23  ;;  %v1322_v55 = vadd.f32 %v1321_v59, %v1243_v29  ;;  %v1323_v36 = vpop.f32.mrb[9].mxu0  ;;  %v4787_v21 = vpop.f32.mrb[9].mxu1 }
 0x38f   :  { %v1324_v53 = vadd.f32 %v1323_v36, %v1247_v37 }
 0x390   :  { %v1396_v35 = vadd.f32 %v1322_v55, %v1186_v49  ;;  %v1188_v49 = vld [vmem:[#allocation3 + $0x40] sm:$0xff] }
 0x391   :  { %v1403_v2 = vadd.f32 %v1324_v53, %v1187_v47  ;;  %v1251_v53 = vrot.slane %v1238_v38, %v7164_v40  ;;  %v9020_v38 = vld [vmem:[#allocation56_spill] sm:$0xff] }
 0x392   :  { %v4523_v19 = vmul.f32 -1.442695, %v1396_v35 }
 0x393   :  { %v4524_v27 = vmul.f32 -1.442695, %v1403_v2  ;;  %v1393_v37 = vadd.f32 %v1392_v44, %v1251_v53  ;;  %v9021_v44 = vld [vmem:[#allocation57_spill] sm:$0xff]  ;;  %v9029_v53 = vld [vmem:[#allocation66_spill] sm:$0xff] }
 0x394   :  { %6490 = vpow2.f32 %v4523_v19 }
 0x395   :  { %6492 = vpow2.f32 %v4524_v27 }
 0x398   :  { %v6489_v54 = vpop.eup %6488 }
 0x399   :  { %v1179_v14 = vmul.f32 %v6489_v54, %v1178_v58  ;;  %v9022_v58 = vld [vmem:[#allocation58_spill] sm:$0xff]  ;;  %v9023_v54 = vld [vmem:[#allocation59_spill] sm:$0xff] }
 0x39b   :  { %v7590_v20 = vadd.f32 %v1180_v33, %v1179_v14  ;;  %v9024_v14 = vld [vmem:[#allocation60_spill] sm:$0xff]  ;;  %v9025_v33 = vld [vmem:[#allocation61_spill] sm:$0xff] }
 0x39d   :  { %1184 = vst [vmem:[#allocation11 + $0x8] sm:$0xff] %v7590_v20  ;;  %1633 = vmatprep.mubr.f32.mxu0 %v7590_v20  ;;  %1704 = vmatprep.mubr.f32.mxu1 %v7590_v20 }
 0x39e   :  { %v6491_v21 = vpop.eup %6490 }
 0x39f   :  { %v1400_v35 = vadd.f32 1.0, %v6491_v21  ;;  %v6493_v47 = vpop.eup %6492  ;;  %v9026_v21 = vld [vmem:[#allocation63_spill] sm:$0xff] }
 0x3a0   :  { %v1407_v29 = vadd.f32 1.0, %v6493_v47  ;;  %v9028_v47 = vld [vmem:[#allocation65_spill] sm:$0xff] }
 0x3a1   :  { %6494 = vrcp.f32 %v1400_v35  ;;  %v9027_v35 = vld [vmem:[#allocation64_spill] sm:$0xff] }
 0x3a2   :  { %6496 = vrcp.f32 %v1407_v29  ;;  %v9030_v29 = vld [vmem:[#allocation62_spill] sm:$0xff] }
 0x3ab   :  { %v6495_v23 = vpop.eup %6494 }
 0x3ac   :  { %v1410_v13 = vmul.f32 %v6495_v23, %v1393_v37  ;;  %v6497_v55 = vpop.eup %6496  ;;  %v9031_v37 = vld [vmem:[#allocation67_spill] sm:$0xff]  ;;  %v9032_v23 = vld [vmem:[#allocation68_spill] sm:$0xff] }
 0x3ad   :  { %v1413_v36 = vsub.f32 1.0, %v6497_v55  ;;  %v1415_v0 = vmul.f32 %v6497_v55, %v7302_v16  ;;  %v8986_v16 = vld [vmem:[#allocation22_spill] sm:$0xff] }
 0x3ae   :  { %v1411_v59 = vadd.f32 %v1410_v13, %v1188_v49  ;;  %v9033_v49 = vld [vmem:[#allocation69_spill] sm:$0xff]  ;;  %v9034_v13 = vld [vmem:[#allocation70_spill] sm:$0xff] }
 0x3af   :  { %v2287_v55 = vld [vmem:[#allocation8 + $0x8] sm:$0xff] }
 0x3b0   :  { %6498 = vtanh.f32 %v1411_v59  ;;  %v9035_v59 = vld [vmem:[#allocation71_spill] sm:$0xff] }
 0x3ba   :  { %v6499_v19 = vpop.eup %6498 }
 0x3bb   :  { %v1414_v2 = vmul.f32 %v6499_v19, %v1413_v36  ;;  %v2290_v36 = vld [vmem:[#allocation8 + $0x20] sm:$0xff] }
 0x3bc   :  { %v7701_v19 = vpack.c.bf16 %v2290_v36, %v2287_v55  ;;  %v2286_v55 = vld [vmem:[#allocation8] sm:$0xff] }
 0x3bd   :  { %v7597_v27 = vadd.f32 %v1415_v0, %v1414_v2  ;;  %v1547_v2 = vld [vmem:[%s8616_s5] sm:$0xf] }
 0x3be   :  { %v1552_v0 = vrot.slane %v1547_v2, %v8928_v25 }
 0x3bf   :  { %1634 = vmatmul.mubr.f32.vlgmr.msra.gmra.mrb[10].mxu0 %v7597_v27  ;;  %1705 = vmatmul.mubr.f32.vlgmr.msra.gmra.mrb[10].mxu1 %v7597_v27 }
 0x3c0   :  { %5518 = vmatpush1.bf16.msra.mxu0 %v7298_v9  ;;  %5549 = vmatpush3.bf16.msra.mxu1 %v7300_v10  ;;  %v8984_v9 = vld [vmem:[#allocation20_spill] sm:$0xff]  ;;  %v8985_v10 = vld [vmem:[#allocation21_spill] sm:$0xff] }
 0x3c1   :  { %5520 = vmatprep.subr.bf16.mxu0 %v7304_v22  ;;  %5550 = vmatprep.subr.bf16.mxu1 %v8879_v48  ;;  %v8987_v22 = vld [vmem:[#allocation23_spill] sm:$0xff] }
 0x3c2   :  { %1867 = vmatprep.mubr.f32.mxu0 %v8882_v3  ;;  %4820 = vmatprep.mubr.msk.f32.mxu1 %vm6764_vm0, %v8882_v3 }
 0x3c4   :  { %5522 = vmatpush1.bf16.msra.mxu0 %v7310_v5  ;;  %5552 = vmatpush3.bf16.msra.mxu1 %v7312_v42  ;;  %v8988_v5 = vld [vmem:[#allocation24_spill] sm:$0xff]  ;;  %v8989_v42 = vld [vmem:[#allocation25_spill] sm:$0xff] }
 0x3c5   :  { %5524 = vmatprep.subr.bf16.mxu0 %v7316_v50  ;;  %5553 = vmatprep.subr.bf16.mxu1 %v8879_v48  ;;  %v8990_v50 = vld [vmem:[#allocation26_spill] sm:$0xff] }
 0x3c8   :  { %5526 = vmatpush1.bf16.msra.mxu0 %v7323_v63  ;;  %5555 = vmatpush3.bf16.msra.mxu1 %v7325_v7  ;;  %v8991_v63 = vld [vmem:[#allocation27_spill] sm:$0xff]  ;;  %v8992_v7 = vld [vmem:[#allocation28_spill] sm:$0xff] }
 0x3c9   :  { %5528 = vmatprep.subr.bf16.mxu0 %v7329_v12  ;;  %5556 = vmatprep.subr.bf16.mxu1 %v8879_v48  ;;  %v8993_v12 = vld [vmem:[#allocation29_spill] sm:$0xff] }
 0x3cc   :  { %5530 = vmatpush1.bf16.msra.mxu0 %v7333_v39  ;;  %5558 = vmatpush3.bf16.msra.mxu1 %v7335_v43  ;;  %v8994_v39 = vld [vmem:[#allocation30_spill] sm:$0xff]  ;;  %v8995_v43 = vld [vmem:[#allocation31_spill] sm:$0xff] }
 0x3cd   :  { %5532 = vmatprep.subr.bf16.mxu0 %v7339_v56  ;;  %5559 = vmatprep.subr.bf16.mxu1 %v8879_v48  ;;  %v8996_v56 = vld [vmem:[#allocation32_spill] sm:$0xff] }
 0x3d0   :  { %5534 = vmatpush1.bf16.msra.mxu0 %v7343_v28  ;;  %5561 = vmatpush3.bf16.msra.mxu1 %v7345_v30  ;;  %v8997_v28 = vld [vmem:[#allocation33_spill] sm:$0xff]  ;;  %v8998_v30 = vld [vmem:[#allocation34_spill] sm:$0xff] }
 0x3d1   :  { %5536 = vmatprep.subr.bf16.mxu0 %v7349_v45  ;;  %5562 = vmatprep.subr.bf16.mxu1 %v8879_v48  ;;  %v8999_v45 = vld [vmem:[#allocation35_spill] sm:$0xff] }
 0x3d4   :  { %5538 = vmatpush1.bf16.msra.mxu0 %v7353_v32  ;;  %5564 = vmatpush3.bf16.msra.mxu1 %v7355_v11  ;;  %v9000_v32 = vld [vmem:[#allocation36_spill] sm:$0xff]  ;;  %v9001_v11 = vld [vmem:[#allocation37_spill] sm:$0xff] }
 0x3d5   :  { %5540 = vmatprep.subr.bf16.mxu0 %v7359_v4  ;;  %5565 = vmatprep.subr.bf16.mxu1 %v8879_v48  ;;  %v9002_v4 = vld [vmem:[#allocation38_spill] sm:$0xff] }
 0x3d8   :  { %5542 = vmatpush1.bf16.msra.mxu0 %v7363_v18  ;;  %5567 = vmatpush3.bf16.msra.mxu1 %v7365_v15  ;;  %v9003_v18 = vld [vmem:[#allocation39_spill] sm:$0xff]  ;;  %v9004_v15 = vld [vmem:[#allocation40_spill] sm:$0xff] }
 0x3d9   :  { %5544 = vmatprep.subr.bf16.mxu0 %v7369_v31  ;;  %5568 = vmatprep.subr.bf16.mxu1 %v8879_v48  ;;  %v9005_v31 = vld [vmem:[#allocation41_spill] sm:$0xff] }
 0x3dc   :  { %5546 = vmatpush1.bf16.msra.mxu0 %v7373_v46  ;;  %5570 = vmatpush3.bf16.msra.mxu1 %v7375_v51  ;;  %v9006_v46 = vld [vmem:[#allocation42_spill] sm:$0xff]  ;;  %v9007_v51 = vld [vmem:[#allocation43_spill] sm:$0xff] }
 0x3dd   :  { %5572 = vmatprep.subr.bf16.mxu0 %v7383_v60  ;;  %5636 = vmatprep.subr.bf16.mxu1 %v7385_v24  ;;  %v9008_v60 = vld [vmem:[#allocation44_spill] sm:$0xff]  ;;  %v9009_v24 = vld [vmem:[#allocation45_spill] sm:$0xff] }
 0x3df   :  { %1868 = vmatmul.mubr.f32.vlgmr.msra.gmra.mrb[12].mxu0 %v7597_v27  ;;  %4821 = vmatmul.mubr.f32.vlgmr.msra.gmra.mrb[12].mxu1 %v7597_v27 }
 0x3e0   :  { %5574 = vmatpush1.bf16.msra.mxu0 %v7387_v26  ;;  %5638 = vmatpush1.bf16.msra.mxu1 %v7390_v57  ;;  %v9010_v26 = vld [vmem:[#allocation46_spill] sm:$0xff]  ;;  %v9011_v57 = vld [vmem:[#allocation47_spill] sm:$0xff] }
 0x3e1   :  { %5576 = vmatprep.subr.bf16.mxu0 %v7395_v17  ;;  %5640 = vmatprep.subr.bf16.mxu1 %v7397_v1  ;;  %v9012_v17 = vld [vmem:[#allocation48_spill] sm:$0xff]  ;;  %v9013_v1 = vld [vmem:[#allocation49_spill] sm:$0xff] }
 0x3e4   :  { %5578 = vmatpush1.bf16.msra.mxu0 %v7399_v34  ;;  %5642 = vmatpush1.bf16.msra.mxu1 %v7402_v6  ;;  %v9014_v34 = vld [vmem:[#allocation50_spill] sm:$0xff]  ;;  %v9015_v6 = vld [vmem:[#allocation51_spill] sm:$0xff] }
 0x3e5   :  { %5580 = vmatprep.subr.bf16.mxu0 %v7407_v61  ;;  %5644 = vmatprep.subr.bf16.mxu1 %v7409_v41  ;;  %v9016_v61 = vld [vmem:[#allocation52_spill] sm:$0xff]  ;;  %v9017_v41 = vld [vmem:[#allocation53_spill] sm:$0xff] }
 0x3e8   :  { %5582 = vmatpush1.bf16.msra.mxu0 %v7411_v62  ;;  %5646 = vmatpush1.bf16.msra.mxu1 %v7414_v8  ;;  %v9018_v62 = vld [vmem:[#allocation54_spill] sm:$0xff]  ;;  %v9019_v8 = vld [vmem:[#allocation55_spill] sm:$0xff] }
 0x3e9   :  { %5584 = vmatprep.subr.bf16.mxu0 %v8984_v9  ;;  %5648 = vmatprep.subr.bf16.mxu1 %v8985_v10 }
 0x3ec   :  { %5586 = vmatpush1.bf16.msra.mxu0 %v8986_v16  ;;  %5650 = vmatpush1.bf16.msra.mxu1 %v8987_v22  ;;  %v1556_v16 = vrot.slane %v1547_v2, %v8929_v52 }
 0x3ed   :  { %5588 = vmatprep.subr.bf16.mxu0 %v8988_v5  ;;  %5652 = vmatprep.subr.bf16.mxu1 %v8989_v42 }
 0x3f0   :  { %5590 = vmatpush1.bf16.msra.mxu0 %v8990_v50  ;;  %5654 = vmatpush1.bf16.msra.mxu1 %v8991_v63 }
 0x3f1   :  { %5592 = vmatprep.subr.bf16.mxu0 %v8992_v7  ;;  %5656 = vmatprep.subr.bf16.mxu1 %v8993_v12 }
 0x3f4   :  { %5594 = vmatpush1.bf16.msra.mxu0 %v8994_v39  ;;  %5658 = vmatpush1.bf16.msra.mxu1 %v8995_v43 }
 0x3f5   :  { %5596 = vmatprep.subr.bf16.mxu0 %v8996_v56  ;;  %5660 = vmatprep.subr.bf16.mxu1 %v8997_v28  ;;  %v9036_v56 = vld [vmem:[#allocation19_spill] sm:$0xff] }
 0x3f6   :  { %v1564_v28 = vrot.slane %v1547_v2, %v9036_v56 }
 0x3f8   :  { %5598 = vmatpush1.bf16.msra.mxu0 %v8998_v30  ;;  %5662 = vmatpush1.bf16.msra.mxu1 %v8999_v45  ;;  %v1560_v30 = vrot.slane %v1547_v2, %v7164_v40  ;;  %v2289_v2 = vld [vmem:[#allocation8 + $0x18] sm:$0xff] }
 0x3f9   :  { %5600 = vmatprep.subr.bf16.mxu0 %v9000_v32  ;;  %5664 = vmatprep.subr.bf16.mxu1 %v9001_v11  ;;  %v1786_v32 = vld [vmem:[%s8614_s3] sm:$0x7] }
 0x3fc   :  { %5602 = vmatpush1.bf16.msra.mxu0 %v9002_v4  ;;  %5666 = vmatpush1.bf16.msra.mxu1 %v9003_v18 }
 0x3fd   :  { %5604 = vmatprep.subr.bf16.mxu0 %v9004_v15  ;;  %5668 = vmatprep.subr.bf16.mxu1 %v9005_v31  ;;  %v1791_v31 = vrot.slane %v1786_v32, %v8928_v25 }
 0x400   :  { %5606 = vmatpush1.bf16.msra.mxu0 %v9006_v46  ;;  %5670 = vmatpush1.bf16.msra.mxu1 %v9007_v51  ;;  %v1795_v46 = vrot.slane %v1786_v32, %v8929_v52 }
 0x401   :  { %5608 = vmatprep.subr.bf16.mxu0 %v9008_v60  ;;  %5672 = vmatprep.subr.bf16.mxu1 %v9009_v24  ;;  %v1734_v60 = vld [vmem:[#allocation3 + $0x48] sm:$0xff] }
 0x404   :  { %5610 = vmatpush1.bf16.msra.mxu0 %v9010_v26  ;;  %5674 = vmatpush1.bf16.msra.mxu1 %v9011_v57 }
 0x405   :  { %5612 = vmatprep.subr.bf16.mxu0 %v9012_v17  ;;  %5676 = vmatprep.subr.bf16.mxu1 %v9013_v1 }
 0x408   :  { %5614 = vmatpush1.bf16.msra.mxu0 %v9014_v34  ;;  %5678 = vmatpush1.bf16.msra.mxu1 %v9015_v6 }
 0x409   :  { %5616 = vmatprep.subr.bf16.mxu0 %v9016_v61  ;;  %5680 = vmatprep.subr.bf16.mxu1 %v9017_v41  ;;  %v1735_v61 = vld [vmem:[#allocation3 + $0x50] sm:$0xff] }
 0x40c   :  { %5618 = vmatpush1.bf16.msra.mxu0 %v9018_v62  ;;  %5682 = vmatpush1.bf16.msra.mxu1 %v9019_v8 }
 0x40d   :  { %5620 = vmatprep.subr.bf16.mxu0 %v9020_v38  ;;  %5684 = vmatprep.subr.bf16.mxu1 %v9021_v44 }
 0x410   :  { %5622 = vmatpush1.bf16.msra.mxu0 %v9022_v58  ;;  %5686 = vmatpush1.bf16.msra.mxu1 %v9023_v54 }
 0x411   :  { %5624 = vmatprep.subr.bf16.mxu0 %v9024_v14  ;;  %5688 = vmatprep.subr.bf16.mxu1 %v9025_v33 }
 0x414   :  { %5626 = vmatpush1.bf16.msra.mxu0 %v9026_v21  ;;  %5690 = vmatpush1.bf16.msra.mxu1 %v9027_v35 }
 0x415   :  { %5628 = vmatprep.subr.bf16.mxu0 %v9028_v47  ;;  %5692 = vmatprep.subr.bf16.mxu1 %v9029_v53  ;;  %v1799_v53 = vrot.slane %v1786_v32, %v7164_v40  ;;  %v2302_v32 = vld [vmem:[#allocation8 + $0x80] sm:$0xff] }
 0x418   :  { %5630 = vmatpush1.bf16.msra.mxu0 %v9030_v29  ;;  %5694 = vmatpush1.bf16.msra.mxu1 %v9031_v37 }
 0x419   :  { %5632 = vmatprep.subr.bf16.mxu0 %v9032_v23  ;;  %5696 = vmatprep.subr.bf16.mxu1 %v9033_v49  ;;  %v1736_v49 = vld [vmem:[#allocation3 + $0x58] sm:$0xff] }
 0x41c   :  { %5634 = vmatpush1.bf16.msra.mxu0 %v9034_v13  ;;  %5698 = vmatpush1.bf16.msra.mxu1 %v9035_v59 }
 0x41d   :  { %5731 = vmatprep.subr.bf16.mxu1 %v8879_v48  ;;  %5700 = vmatprep.subr.bf16.mxu0 %v7701_v19 }
 0x492   :  { %v1635_v9 = vpop.f32.mrb[10].mxu0  ;;  %v1706_v10 = vpop.f32.mrb[10].mxu1 }
 0x493   :  { %v1636_v22 = vadd.f32 %v1635_v9, %v1552_v0  ;;  %v1637_v5 = vpop.f32.mrb[11].mxu0  ;;  %v1708_v42 = vpop.f32.mrb[11].mxu1  ;;  %v1707_v18 = vadd.f32 %v1706_v10, %v1560_v30  ;;  %v2288_v0 = vld [vmem:[#allocation8 + $0x10] sm:$0xff]  ;;  %v2291_v9 = vld [vmem:[#allocation8 + $0x28] sm:$0xff]  ;;  %v2297_v30 = vld [vmem:[#allocation8 + $0x58] sm:$0xff] }
 0x494   :  { %v1638_v63 = vadd.f32 %v1637_v5, %v1556_v16  ;;  %v1709_v11 = vadd.f32 %v1708_v42, %v1564_v28  ;;  %v2293_v16 = vld [vmem:[#allocation8 + $0x38] sm:$0xff]  ;;  %v2294_v28 = vld [vmem:[#allocation8 + $0x40] sm:$0xff] }
 0x495   :  { %v4525_v50 = vmul.f32 -1.442695, %v1636_v22  ;;  %v2296_v22 = vld [vmem:[#allocation8 + $0x50] sm:$0xff] }
 0x496   :  { %v4526_v7 = vmul.f32 -1.442695, %v1638_v63  ;;  %v7726_v63 = vpack.c.bf16 %v2291_v9, %v2288_v0  ;;  %v2325_v9 = vld [vmem:[#allocation8 + $0x138] sm:$0xff] }
 0x497   :  { %6500 = vpow2.f32 %v4525_v50  ;;  %v7724_v50 = vpack.c.bf16 %v2289_v2, %v2286_v55  ;;  %v2322_v2 = vld [vmem:[#allocation8 + $0x120] sm:$0xff] }
 0x498   :  { %6502 = vpow2.f32 %v4526_v7  ;;  %v2292_v7 = vld [vmem:[#allocation8 + $0x30] sm:$0xff] }
 0x4a1   :  { %v6501_v12 = vpop.eup %6500 }
 0x4a2   :  { %v1714_v39 = vadd.f32 1.0, %v6501_v12  ;;  %v6503_v43 = vpop.eup %6502 }
 0x4a3   :  { %v1720_v45 = vadd.f32 1.0, %v6503_v43  ;;  %v2295_v43 = vld [vmem:[#allocation8 + $0x48] sm:$0xff] }
 0x4a4   :  { %6504 = vrcp.f32 %v1714_v39  ;;  %v7730_v39 = vpack.c.bf16 %v2296_v22, %v2293_v16  ;;  %v2327_v16 = vld [vmem:[#allocation8 + $0x148] sm:$0xff]  ;;  %v2329_v22 = vld [vmem:[#allocation8 + $0x158] sm:$0xff] }
 0x4a5   :  { %6506 = vrcp.f32 %v1720_v45  ;;  %v2299_v45 = vld [vmem:[#allocation8 + $0x68] sm:$0xff] }
 0x4ae   :  { %v6505_v4 = vpop.eup %6504 }
 0x4af   :  { %v1723_v15 = vmul.f32 %v6505_v4, %v1709_v11  ;;  %v6507_v8 = vpop.eup %6506  ;;  %v7738_v11 = vpack.c.bf16 %v2297_v30, %v2294_v28  ;;  %v2298_v4 = vld [vmem:[#allocation8 + $0x60] sm:$0xff]  ;;  %v2331_v30 = vld [vmem:[#allocation8 + $0x168] sm:$0xff] }
 0x4b0   :  { %v1726_v44 = vsub.f32 1.0, %v6507_v8  ;;  %v1728_v14 = vmul.f32 %v6507_v8, %v7590_v20 }
 0x4b1   :  { %v1724_v51 = vadd.f32 %v1723_v15, %v1707_v18  ;;  %v7742_v18 = vpack.c.bf16 %v2302_v32, %v2299_v45  ;;  %v2301_v15 = vld [vmem:[#allocation8 + $0x78] sm:$0xff]  ;;  %v2330_v45 = vld [vmem:[#allocation8 + $0x160] sm:$0xff] }
 0x4b2   :  { %v1869_v24 = vpop.f32.mrb[12].mxu0  ;;  %v1940_v26 = vpop.f32.mrb[12].mxu1  ;;  %v2333_v32 = vld [vmem:[#allocation8 + $0x178] sm:$0xff] }
 0x4b3   :  { %6508 = vtanh.f32 %v1724_v51  ;;  %v1870_v57 = vadd.f32 %v1869_v24, %v1791_v31  ;;  %v1871_v17 = vpop.f32.mrb[13].mxu0  ;;  %v4822_v1 = vpop.f32.mrb[13].mxu1  ;;  %v1941_v37 = vadd.f32 %v1940_v26, %v1799_v53  ;;  %v2300_v31 = vld [vmem:[#allocation8 + $0x70] sm:$0xff]  ;;  %v2305_v51 = vld [vmem:[#allocation8 + $0x98] sm:$0xff]  ;;  %v7749_v24 = vpack.c.bf16 %v2301_v15, %v2298_v4 }
 0x4b4   :  { %v1872_v34 = vadd.f32 %v1871_v17, %v1795_v46  ;;  %v2303_v46 = vld [vmem:[#allocation8 + $0x88] sm:$0xff]  ;;  %v7801_v15 = vpack.c.bf16 %v2333_v32, %v2330_v45  ;;  %v2535_v45 = vld [vmem:[#allocation9 + $0xa0] sm:$0xff] }
 0x4b5   :  { %v1944_v6 = vadd.f32 %v1870_v57, %v1734_v60  ;;  %v2308_v60 = vld [vmem:[#allocation8 + $0xb0] sm:$0xff]  ;;  %v7751_v26 = vpack.c.bf16 %v2303_v46, %v2300_v31  ;;  %v2307_v1 = vld [vmem:[#allocation8 + $0xa8] sm:$0xff] }
 0x4b6   :  { %v1951_v62 = vadd.f32 %v1872_v34, %v1735_v61  ;;  %v2304_v57 = vld [vmem:[#allocation8 + $0x90] sm:$0xff]  ;;  %v7755_v17 = vpack.c.bf16 %v2308_v60, %v2305_v51  ;;  %v2306_v34 = vld [vmem:[#allocation8 + $0xa0] sm:$0xff]  ;;  %v2311_v61 = vld [vmem:[#allocation8 + $0xc8] sm:$0xff] }
 0x4b7   :  { %v4527_v41 = vmul.f32 -1.442695, %v1944_v6  ;;  %v2309_v6 = vld [vmem:[#allocation8 + $0xb8] sm:$0xff]  ;;  %v2516_v31 = vld [vmem:[#allocation9 + $0x8] sm:$0xff] }
 0x4b8   :  { %v4528_v38 = vmul.f32 -1.442695, %v1951_v62  ;;  %v7759_v62 = vpack.c.bf16 %v2307_v1, %v2304_v57  ;;  %v7761_v8 = vpack.c.bf16 %v2309_v6, %v2306_v34  ;;  %v2520_v46 = vld [vmem:[#allocation9 + $0x28] sm:$0xff]  ;;  %v2518_v51 = vld [vmem:[#allocation9 + $0x18] sm:$0xff]  ;;  %v2515_v1 = vld [vmem:[#allocation9] sm:$0xff] }
 0x4b9   :  { %6510 = vpow2.f32 %v4527_v41  ;;  %v2314_v41 = vld [vmem:[#allocation8 + $0xe0] sm:$0xff]  ;;  %v7809_v60 = vpack.c.bf16 %v2520_v46, %v2516_v31  ;;  %v2522_v57 = vld [vmem:[#allocation9 + $0x38] sm:$0xff]  ;;  %v2533_v46 = vld [vmem:[#allocation9 + $0x90] sm:$0xff] }
 0x4ba   :  { %6512 = vpow2.f32 %v4528_v38  ;;  %v2310_v38 = vld [vmem:[#allocation8 + $0xc0] sm:$0xff]  ;;  %v7811_v6 = vpack.c.bf16 %v2522_v57, %v2518_v51  ;;  %v2537_v51 = vld [vmem:[#allocation9 + $0xb0] sm:$0xff] }
 0x4bb   :  { %v2519_v34 = vld [vmem:[#allocation9 + $0x20] sm:$0xff]  ;;  %v7840_v57 = vpack.c.bf16 %v2537_v51, %v2533_v46 }
 0x4bc   :  { %v2551_v51 = vld [vmem:[#allocation9 + $0x120] sm:$0xff] }
 0x4bd   :  { %v6509_v58 = vpop.eup %6508 }
 0x4be   :  { %v1727_v54 = vmul.f32 %v6509_v58, %v1726_v44  ;;  %v7765_v44 = vpack.c.bf16 %v2314_v41, %v2311_v61  ;;  %v2313_v58 = vld [vmem:[#allocation8 + $0xd8] sm:$0xff]  ;;  %v7813_v61 = vpack.c.bf16 %v2519_v34, %v2515_v1  ;;  %v2517_v41 = vld [vmem:[#allocation9 + $0x10] sm:$0xff]  ;;  %v2540_v1 = vld [vmem:[#allocation9 + $0xc8] sm:$0xff] }
 0x4bf   :  { %v2544_v34 = vld [vmem:[#allocation9 + $0xe8] sm:$0xff] }
 0x4c0   :  { %v7717_v33 = vadd.f32 %v1728_v14, %v1727_v54  ;;  %v2312_v54 = vld [vmem:[#allocation8 + $0xd0] sm:$0xff]  ;;  %v2315_v14 = vld [vmem:[#allocation8 + $0xe8] sm:$0xff] }
 0x4c1   :  { %v7771_v53 = vpack.c.bf16 %v2315_v14, %v2312_v54  ;;  %v2524_v54 = vld [vmem:[#allocation9 + $0x48] sm:$0xff] }
 0x4c2   :  { %1732 = vst [vmem:[#allocation11 + $0x10] sm:$0xff] %v7717_v33  ;;  %2181 = vmatprep.mubr.f32.mxu0 %v7717_v33  ;;  %2252 = vmatprep.mubr.f32.mxu1 %v7717_v33  ;;  %v2528_v14 = vld [vmem:[#allocation9 + $0x68] sm:$0xff] }
 0x4c3   :  { %v6511_v21 = vpop.eup %6510 }
 0x4c4   :  { %v1948_v35 = vadd.f32 1.0, %v6511_v21  ;;  %v6513_v47 = vpop.eup %6512  ;;  %v2317_v21 = vld [vmem:[#allocation8 + $0xf8] sm:$0xff] }
 0x4c5   :  { %v1955_v29 = vadd.f32 1.0, %v6513_v47  ;;  %v7769_v47 = vpack.c.bf16 %v2313_v58, %v2310_v38  ;;  %v2521_v38 = vld [vmem:[#allocation9 + $0x30] sm:$0xff] }
 0x4c6   :  { %6514 = vrcp.f32 %v1948_v35  ;;  %v2320_v35 = vld [vmem:[#allocation8 + $0x110] sm:$0xff]  ;;  %v7816_v58 = vpack.c.bf16 %v2521_v38, %v2517_v41  ;;  %v2542_v41 = vld [vmem:[#allocation9 + $0xd8] sm:$0xff]  ;;  %v7845_v38 = vpack.c.bf16 %v2544_v34, %v2540_v1 }
 0x4c7   :  { %6516 = vrcp.f32 %v1955_v29  ;;  %v2316_v29 = vld [vmem:[#allocation8 + $0xf0] sm:$0xff] }
 0x4c8   :  { %9037 = vst [vmem:[#allocation20_spill] sm:$0xff] %v7845_v38  ;;  %v2549_v1 = vld [vmem:[#allocation9 + $0x110] sm:$0xff] }
 0x4c9   :  { %v2553_v34 = vld [vmem:[#allocation9 + $0x130] sm:$0xff] }
 0x4d0   :  { %v6515_v23 = vpop.eup %6514 }
 0x4d1   :  { %v1958_v20 = vmul.f32 %v6515_v23, %v1941_v37  ;;  %v6517_v59 = vpop.eup %6516  ;;  %v7775_v37 = vpack.c.bf16 %v2320_v35, %v2317_v21  ;;  %v2319_v23 = vld [vmem:[#allocation8 + $0x108] sm:$0xff]  ;;  %v2526_v21 = vld [vmem:[#allocation9 + $0x58] sm:$0xff]  ;;  %v7821_v35 = vpack.c.bf16 %v2528_v14, %v2524_v54  ;;  %v2539_v14 = vld [vmem:[#allocation9 + $0xc0] sm:$0xff] }
 0x4d2   :  { %v1961_v36 = vsub.f32 1.0, %v6517_v59  ;;  %v1963_v42 = vmul.f32 %v6517_v59, %v7597_v27  ;;  %v7736_v27 = vpack.c.bf16 %v2295_v43, %v2292_v7  ;;  %v2326_v59 = vld [vmem:[#allocation8 + $0x140] sm:$0xff]  ;;  %v7779_v55 = vpack.c.bf16 %v2319_v23, %v2316_v29  ;;  %v2328_v43 = vld [vmem:[#allocation8 + $0x150] sm:$0xff]  ;;  %v2530_v29 = vld [vmem:[#allocation9 + $0x78] sm:$0xff] }
 0x4d3   :  { %v1959_v13 = vadd.f32 %v1958_v20, %v1736_v49  ;;  %v2318_v49 = vld [vmem:[#allocation8 + $0x100] sm:$0xff]  ;;  %v2321_v20 = vld [vmem:[#allocation8 + $0x118] sm:$0xff]  ;;  %v7799_v4 = vpack.c.bf16 %v2331_v30, %v2328_v43 }
 0x4d4   :  { %v2523_v23 = vld [vmem:[#allocation9 + $0x40] sm:$0xff]  ;;  %v2538_v43 = vld [vmem:[#allocation9 + $0xb8] sm:$0xff] }
 0x4d5   :  { %6518 = vtanh.f32 %v1959_v13  ;;  %v2323_v13 = vld [vmem:[#allocation8 + $0x128] sm:$0xff]  ;;  %v2531_v30 = vld [vmem:[#allocation9 + $0x80] sm:$0xff]  ;;  %v2546_v54 = vld [vmem:[#allocation9 + $0xf8] sm:$0xff] }
 0x4d6   :  { %v7785_v0 = vpack.c.bf16 %v2326_v59, %v2323_v13  ;;  %v2525_v59 = vld [vmem:[#allocation9 + $0x50] sm:$0xff]  ;;  %v7837_v31 = vpack.c.bf16 %v2535_v45, %v2531_v30  ;;  %v2554_v30 = vld [vmem:[#allocation9 + $0x138] sm:$0xff]  ;;  %v2547_v45 = vld [vmem:[#allocation9 + $0x100] sm:$0xff] }
 0x4df   :  { %v6519_v10 = vpop.eup %6518 }
 0x4e0   :  { %v1962_v5 = vmul.f32 %v6519_v10, %v1961_v36  ;;  %v7781_v36 = vpack.c.bf16 %v2321_v20, %v2318_v49  ;;  %v2324_v10 = vld [vmem:[#allocation8 + $0x130] sm:$0xff]  ;;  %v2527_v49 = vld [vmem:[#allocation9 + $0x60] sm:$0xff]  ;;  %v7823_v20 = vpack.c.bf16 %v2530_v29, %v2526_v21  ;;  %v7847_v29 = vpack.c.bf16 %v2546_v54, %v2542_v41 }
 0x4e1   :  { %v7791_v7 = vpack.c.bf16 %v2327_v16, %v2324_v10  ;;  %v7825_v13 = vpack.c.bf16 %v2527_v49, %v2523_v23  ;;  %v2532_v10 = vld [vmem:[#allocation9 + $0x88] sm:$0xff]  ;;  %v2543_v21 = vld [vmem:[#allocation9 + $0xe0] sm:$0xff]  ;;  %v2541_v49 = vld [vmem:[#allocation9 + $0xd0] sm:$0xff]  ;;  %v7862_v41 = vpack.c.bf16 %v2551_v51, %v2547_v45  ;;  %v7864_v54 = vpack.c.bf16 %v2553_v34, %v2549_v1 }
 0x4e2   :  { %v7728_v12 = vadd.f32 %v1963_v42, %v1962_v5  ;;  %v2332_v5 = vld [vmem:[#allocation8 + $0x170] sm:$0xff]  ;;  %v7789_v42 = vpack.c.bf16 %v2325_v9, %v2322_v2  ;;  %v2536_v16 = vld [vmem:[#allocation9 + $0xa8] sm:$0xff]  ;;  %9038 = vst [vmem:[#allocation21_spill] sm:$0xff] %v7847_v29  ;;  %v7849_v23 = vpack.c.bf16 %v2543_v21, %v2539_v14 }
 0x4e3   :  { %v7795_v28 = vpack.c.bf16 %v2332_v5, %v2329_v22  ;;  %v2529_v2 = vld [vmem:[#allocation9 + $0x70] sm:$0xff]  ;;  %v2534_v22 = vld [vmem:[#allocation9 + $0x98] sm:$0xff]  ;;  %v7833_v5 = vpack.c.bf16 %v2536_v16, %v2532_v10  ;;  %v2548_v10 = vld [vmem:[#allocation9 + $0x108] sm:$0xff]  ;;  %9043 = vst [vmem:[#allocation26_spill] sm:$0xff] %v7862_v41 }
 0x4e4   :  { %2182 = vmatmul.mubr.f32.vlgmr.msra.gmra.mrb[14].mxu0 %v7728_v12  ;;  %2253 = vmatmul.mubr.f32.vlgmr.msra.gmra.mrb[14].mxu1 %v7728_v12  ;;  %v7828_v9 = vpack.c.bf16 %v2529_v2, %v2525_v59  ;;  %v7835_v32 = vpack.c.bf16 %v2538_v43, %v2534_v22  ;;  %9039 = vst [vmem:[#allocation22_spill] sm:$0xff] %v7849_v23  ;;  %v2545_v59 = vld [vmem:[#allocation9 + $0xf0] sm:$0xff]  ;;  %v2552_v16 = vld [vmem:[#allocation9 + $0x128] sm:$0xff]  ;;  %v2550_v43 = vld [vmem:[#allocation9 + $0x118] sm:$0xff] }
 0x4e5   :  { %5702 = vmatpush1.bf16.msra.mxu0 %v7724_v50  ;;  %5733 = vmatpush3.bf16.msra.mxu1 %v7726_v63  ;;  %v7852_v2 = vpack.c.bf16 %v2545_v59, %v2541_v49  ;;  %v7857_v22 = vpack.c.bf16 %v2552_v16, %v2548_v10  ;;  %v7859_v46 = vpack.c.bf16 %v2554_v30, %v2550_v43  ;;  %v2556_v14 = vld [vmem:[#allocation9 + $0x148] sm:$0xff]  ;;  %v2558_v49 = vld [vmem:[#allocation9 + $0x158] sm:$0xff]  ;;  %v2555_v16 = vld [vmem:[#allocation9 + $0x140] sm:$0xff] }
 0x4e6   :  { %5704 = vmatprep.subr.bf16.mxu0 %v7730_v39  ;;  %5734 = vmatprep.subr.bf16.mxu1 %v8879_v48  ;;  %9044 = vst [vmem:[#allocation27_spill] sm:$0xff] %v7864_v54  ;;  %v2560_v21 = vld [vmem:[#allocation9 + $0x168] sm:$0xff]  ;;  %v2562_v10 = vld [vmem:[#allocation9 + $0x178] sm:$0xff]  ;;  %v2559_v30 = vld [vmem:[#allocation9 + $0x160] sm:$0xff] }
 0x4e7   :  { %2415 = vmatprep.mubr.f32.mxu0 %v8882_v3  ;;  %4855 = vmatprep.mubr.msk.f32.mxu1 %vm6764_vm0, %v8882_v3  ;;  %9040 = vst [vmem:[#allocation23_spill] sm:$0xff] %v7852_v2  ;;  %9041 = vst [vmem:[#allocation24_spill] sm:$0xff] %v7857_v22  ;;  %v7869_v59 = vpack.c.bf16 %v2560_v21, %v2556_v14  ;;  %v7871_v43 = vpack.c.bf16 %v2562_v10, %v2558_v49  ;;  %v2557_v45 = vld [vmem:[#allocation9 + $0x150] sm:$0xff]  ;;  %v2570_v21 = vld [vmem:[#allocation9 + $0x1b8] sm:$0xff] }
 0x4e8   :  { %9042 = vst [vmem:[#allocation25_spill] sm:$0xff] %v7859_v46  ;;  %v2561_v51 = vld [vmem:[#allocation9 + $0x170] sm:$0xff]  ;;  %v7874_v1 = vpack.c.bf16 %v2559_v30, %v2555_v16  ;;  %v2563_v49 = vld [vmem:[#allocation9 + $0x180] sm:$0xff] }
 0x4e9   :  { %5706 = vmatpush1.bf16.msra.mxu0 %v7736_v27  ;;  %5736 = vmatpush3.bf16.msra.mxu1 %v7738_v11  ;;  %9045 = vst [vmem:[#allocation28_spill] sm:$0xff] %v7869_v59  ;;  %9046 = vst [vmem:[#allocation29_spill] sm:$0xff] %v7871_v43  ;;  %v7876_v34 = vpack.c.bf16 %v2561_v51, %v2557_v45  ;;  %v2567_v10 = vld [vmem:[#allocation9 + $0x1a0] sm:$0xff]  ;;  %v2565_v30 = vld [vmem:[#allocation9 + $0x190] sm:$0xff] }
 0x4ea   :  { %5708 = vmatprep.subr.bf16.mxu0 %v7742_v18  ;;  %5737 = vmatprep.subr.bf16.mxu1 %v8879_v48  ;;  %9047 = vst [vmem:[#allocation30_spill] sm:$0xff] %v7874_v1  ;;  %v7885_v16 = vpack.c.bf16 %v2567_v10, %v2563_v49  ;;  %v2569_v45 = vld [vmem:[#allocation9 + $0x1b0] sm:$0xff] }
 0x4eb   :  { %9048 = vst [vmem:[#allocation31_spill] sm:$0xff] %v7876_v34  ;;  %v7888_v51 = vpack.c.bf16 %v2569_v45, %v2565_v30  ;;  %v2573_v30 = vld [vmem:[#allocation9 + $0x1d0] sm:$0xff] }
 0x4ec   :  { %9051 = vst [vmem:[#allocation34_spill] sm:$0xff] %v7885_v16  ;;  %v2577_v45 = vld [vmem:[#allocation9 + $0x1f0] sm:$0xff] }
 0x4ed   :  { %5710 = vmatpush1.bf16.msra.mxu0 %v7749_v24  ;;  %5739 = vmatpush3.bf16.msra.mxu1 %v7751_v26  ;;  %9052 = vst [vmem:[#allocation35_spill] sm:$0xff] %v7888_v51 }
 0x4ee   :  { %5712 = vmatprep.subr.bf16.mxu0 %v7755_v17  ;;  %5740 = vmatprep.subr.bf16.mxu1 %v8879_v48 }
 0x4f1   :  { %5714 = vmatpush1.bf16.msra.mxu0 %v7759_v62  ;;  %5742 = vmatpush3.bf16.msra.mxu1 %v7761_v8 }
 0x4f2   :  { %5716 = vmatprep.subr.bf16.mxu0 %v7765_v44  ;;  %5743 = vmatprep.subr.bf16.mxu1 %v8879_v48 }
 0x4f5   :  { %5718 = vmatpush1.bf16.msra.mxu0 %v7769_v47  ;;  %5745 = vmatpush3.bf16.msra.mxu1 %v7771_v53 }
 0x4f6   :  { %5720 = vmatprep.subr.bf16.mxu0 %v7775_v37  ;;  %5746 = vmatprep.subr.bf16.mxu1 %v8879_v48 }
 0x4f9   :  { %5722 = vmatpush1.bf16.msra.mxu0 %v7779_v55  ;;  %5748 = vmatpush3.bf16.msra.mxu1 %v7781_v36 }
 0x4fa   :  { %5724 = vmatprep.subr.bf16.mxu0 %v7785_v0  ;;  %5749 = vmatprep.subr.bf16.mxu1 %v8879_v48 }
 0x4fd   :  { %5726 = vmatpush1.bf16.msra.mxu0 %v7789_v42  ;;  %5751 = vmatpush3.bf16.msra.mxu1 %v7791_v7 }
 0x4fe   :  { %5728 = vmatprep.subr.bf16.mxu0 %v7795_v28  ;;  %5752 = vmatprep.subr.bf16.mxu1 %v8879_v48 }
 0x501   :  { %5730 = vmatpush1.bf16.msra.mxu0 %v7799_v4  ;;  %5754 = vmatpush3.bf16.msra.mxu1 %v7801_v15 }
 0x502   :  { %5756 = vmatprep.subr.bf16.mxu0 %v7809_v60  ;;  %5820 = vmatprep.subr.bf16.mxu1 %v7811_v6 }
 0x504   :  { %2416 = vmatmul.mubr.f32.vlgmr.msra.gmra.mrb[16].mxu0 %v7728_v12  ;;  %4856 = vmatmul.mubr.f32.vlgmr.msra.gmra.mrb[16].mxu1 %v7728_v12 }
 0x505   :  { %5758 = vmatpush1.bf16.msra.mxu0 %v7813_v61  ;;  %5822 = vmatpush1.bf16.msra.mxu1 %v7816_v58 }
 0x506   :  { %5760 = vmatprep.subr.bf16.mxu0 %v7821_v35  ;;  %5824 = vmatprep.subr.bf16.mxu1 %v7823_v20 }
 0x509   :  { %5762 = vmatpush1.bf16.msra.mxu0 %v7825_v13  ;;  %5826 = vmatpush1.bf16.msra.mxu1 %v7828_v9 }
 0x50a   :  { %5764 = vmatprep.subr.bf16.mxu0 %v7833_v5  ;;  %5828 = vmatprep.subr.bf16.mxu1 %v7835_v32 }
 0x50d   :  { %5766 = vmatpush1.bf16.msra.mxu0 %v7837_v31  ;;  %5830 = vmatpush1.bf16.msra.mxu1 %v7840_v57 }
 0x50e   :  { %5768 = vmatprep.subr.bf16.mxu0 %v7845_v38  ;;  %5832 = vmatprep.subr.bf16.mxu1 %v7847_v29  ;;  %v2283_v38 = vld [vmem:[#allocation3 + $0x68] sm:$0xff] }
 0x511   :  { %5770 = vmatpush1.bf16.msra.mxu0 %v7849_v23  ;;  %5834 = vmatpush1.bf16.msra.mxu1 %v7852_v2  ;;  %v2634_v2 = vld [vmem:[#allocation9 + $0x3b8] sm:$0xff] }
 0x512   :  { %5772 = vmatprep.subr.bf16.mxu0 %v7857_v22  ;;  %5836 = vmatprep.subr.bf16.mxu1 %v7859_v46  ;;  %v2568_v46 = vld [vmem:[#allocation9 + $0x1a8] sm:$0xff] }
 0x515   :  { %5774 = vmatpush1.bf16.msra.mxu0 %v7862_v41  ;;  %5838 = vmatpush1.bf16.msra.mxu1 %v7864_v54  ;;  %v2564_v41 = vld [vmem:[#allocation9 + $0x188] sm:$0xff]  ;;  %v2566_v54 = vld [vmem:[#allocation9 + $0x198] sm:$0xff] }
 0x516   :  { %5776 = vmatprep.subr.bf16.mxu0 %v7869_v59  ;;  %5840 = vmatprep.subr.bf16.mxu1 %v7871_v43  ;;  %v7881_v14 = vpack.c.bf16 %v2568_v46, %v2564_v41  ;;  %v7883_v22 = vpack.c.bf16 %v2570_v21, %v2566_v54  ;;  %v2576_v43 = vld [vmem:[#allocation9 + $0x1e8] sm:$0xff]  ;;  %v2578_v41 = vld [vmem:[#allocation9 + $0x1f8] sm:$0xff]  ;;  %v2571_v54 = vld [vmem:[#allocation9 + $0x1c0] sm:$0xff] }
 0x517   :  { %v2575_v21 = vld [vmem:[#allocation9 + $0x1e0] sm:$0xff]  ;;  %v2632_v59 = vld [vmem:[#allocation9 + $0x3a8] sm:$0xff] }
 0x518   :  { %9049 = vst [vmem:[#allocation32_spill] sm:$0xff] %v7881_v14  ;;  %9050 = vst [vmem:[#allocation33_spill] sm:$0xff] %v7883_v22  ;;  %v7897_v10 = vpack.c.bf16 %v2575_v21, %v2571_v54 }
 0x519   :  { %5778 = vmatpush1.bf16.msra.mxu0 %v7874_v1  ;;  %5842 = vmatpush1.bf16.msra.mxu1 %v7876_v34  ;;  %v2572_v1 = vld [vmem:[#allocation9 + $0x1c8] sm:$0xff]  ;;  %v2574_v34 = vld [vmem:[#allocation9 + $0x1d8] sm:$0xff] }
 0x51a   :  { %5780 = vmatprep.subr.bf16.mxu0 %v7881_v14  ;;  %5844 = vmatprep.subr.bf16.mxu1 %v7883_v22  ;;  %v7893_v46 = vpack.c.bf16 %v2576_v43, %v2572_v1  ;;  %v7895_v49 = vpack.c.bf16 %v2578_v41, %v2574_v34  ;;  %9055 = vst [vmem:[#allocation38_spill] sm:$0xff] %v7897_v10  ;;  %v2584_v14 = vld [vmem:[#allocation9 + $0x228] sm:$0xff]  ;;  %v2586_v1 = vld [vmem:[#allocation9 + $0x238] sm:$0xff]  ;;  %v2579_v34 = vld [vmem:[#allocation9 + $0x200] sm:$0xff] }
 0x51b   :  { %v7900_v22 = vpack.c.bf16 %v2577_v45, %v2573_v30  ;;  %v2583_v41 = vld [vmem:[#allocation9 + $0x220] sm:$0xff]  ;;  %v2581_v30 = vld [vmem:[#allocation9 + $0x210] sm:$0xff] }
 0x51c   :  { %9053 = vst [vmem:[#allocation36_spill] sm:$0xff] %v7893_v46  ;;  %9054 = vst [vmem:[#allocation37_spill] sm:$0xff] %v7895_v49  ;;  %v7909_v21 = vpack.c.bf16 %v2583_v41, %v2579_v34  ;;  %v2585_v45 = vld [vmem:[#allocation9 + $0x230] sm:$0xff] }
 0x51d   :  { %5782 = vmatpush1.bf16.msra.mxu0 %v7885_v16  ;;  %5846 = vmatpush1.bf16.msra.mxu1 %v7888_v51  ;;  %9056 = vst [vmem:[#allocation39_spill] sm:$0xff] %v7900_v22  ;;  %v2580_v16 = vld [vmem:[#allocation9 + $0x208] sm:$0xff]  ;;  %v2582_v51 = vld [vmem:[#allocation9 + $0x218] sm:$0xff] }
 0x51e   :  { %5784 = vmatprep.subr.bf16.mxu0 %v7893_v46  ;;  %5848 = vmatprep.subr.bf16.mxu1 %v7895_v49  ;;  %v7905_v43 = vpack.c.bf16 %v2584_v14, %v2580_v16  ;;  %v7907_v54 = vpack.c.bf16 %v2586_v1, %v2582_v51  ;;  %9059 = vst [vmem:[#allocation42_spill] sm:$0xff] %v7909_v21  ;;  %v2592_v46 = vld [vmem:[#allocation9 + $0x268] sm:$0xff]  ;;  %v2594_v16 = vld [vmem:[#allocation9 + $0x278] sm:$0xff]  ;;  %v2587_v51 = vld [vmem:[#allocation9 + $0x240] sm:$0xff] }
 0x51f   :  { %v7912_v49 = vpack.c.bf16 %v2585_v45, %v2581_v30  ;;  %v2591_v1 = vld [vmem:[#allocation9 + $0x260] sm:$0xff]  ;;  %v2589_v30 = vld [vmem:[#allocation9 + $0x250] sm:$0xff] }
 0x520   :  { %9057 = vst [vmem:[#allocation40_spill] sm:$0xff] %v7905_v43  ;;  %9058 = vst [vmem:[#allocation41_spill] sm:$0xff] %v7907_v54  ;;  %v7921_v41 = vpack.c.bf16 %v2591_v1, %v2587_v51  ;;  %v2593_v45 = vld [vmem:[#allocation9 + $0x270] sm:$0xff] }
 0x521   :  { %5786 = vmatpush1.bf16.msra.mxu0 %v7897_v10  ;;  %5850 = vmatpush1.bf16.msra.mxu1 %v7900_v22  ;;  %9060 = vst [vmem:[#allocation43_spill] sm:$0xff] %v7912_v49  ;;  %v2588_v10 = vld [vmem:[#allocation9 + $0x248] sm:$0xff]  ;;  %v2590_v22 = vld [vmem:[#allocation9 + $0x258] sm:$0xff] }
 0x522   :  { %5788 = vmatprep.subr.bf16.mxu0 %v7905_v43  ;;  %5852 = vmatprep.subr.bf16.mxu1 %v7907_v54  ;;  %v7917_v14 = vpack.c.bf16 %v2592_v46, %v2588_v10  ;;  %v7919_v34 = vpack.c.bf16 %v2594_v16, %v2590_v22  ;;  %9063 = vst [vmem:[#allocation46_spill] sm:$0xff] %v7921_v41  ;;  %v2600_v43 = vld [vmem:[#allocation9 + $0x2a8] sm:$0xff]  ;;  %v2602_v22 = vld [vmem:[#allocation9 + $0x2b8] sm:$0xff]  ;;  %v2595_v10 = vld [vmem:[#allocation9 + $0x280] sm:$0xff] }
 0x523   :  { %v7924_v54 = vpack.c.bf16 %v2593_v45, %v2589_v30  ;;  %v2599_v16 = vld [vmem:[#allocation9 + $0x2a0] sm:$0xff]  ;;  %v2597_v30 = vld [vmem:[#allocation9 + $0x290] sm:$0xff] }
 0x524   :  { %9061 = vst [vmem:[#allocation44_spill] sm:$0xff] %v7917_v14  ;;  %9062 = vst [vmem:[#allocation45_spill] sm:$0xff] %v7919_v34  ;;  %v7933_v1 = vpack.c.bf16 %v2599_v16, %v2595_v10  ;;  %v2601_v45 = vld [vmem:[#allocation9 + $0x2b0] sm:$0xff] }
 0x525   :  { %5790 = vmatpush1.bf16.msra.mxu0 %v7909_v21  ;;  %5854 = vmatpush1.bf16.msra.mxu1 %v7912_v49  ;;  %9064 = vst [vmem:[#allocation47_spill] sm:$0xff] %v7924_v54  ;;  %v2596_v21 = vld [vmem:[#allocation9 + $0x288] sm:$0xff]  ;;  %v2598_v49 = vld [vmem:[#allocation9 + $0x298] sm:$0xff] }
 0x526   :  { %5792 = vmatprep.subr.bf16.mxu0 %v7917_v14  ;;  %5856 = vmatprep.subr.bf16.mxu1 %v7919_v34  ;;  %v7929_v46 = vpack.c.bf16 %v2600_v43, %v2596_v21  ;;  %v7931_v51 = vpack.c.bf16 %v2602_v22, %v2598_v49  ;;  %9067 = vst [vmem:[#allocation50_spill] sm:$0xff] %v7933_v1  ;;  %v2608_v14 = vld [vmem:[#allocation9 + $0x2e8] sm:$0xff]  ;;  %v2610_v49 = vld [vmem:[#allocation9 + $0x2f8] sm:$0xff]  ;;  %v2603_v21 = vld [vmem:[#allocation9 + $0x2c0] sm:$0xff] }
 0x527   :  { %v7936_v34 = vpack.c.bf16 %v2601_v45, %v2597_v30  ;;  %v2607_v22 = vld [vmem:[#allocation9 + $0x2e0] sm:$0xff]  ;;  %v2605_v30 = vld [vmem:[#allocation9 + $0x2d0] sm:$0xff] }
 0x528   :  { %9065 = vst [vmem:[#allocation48_spill] sm:$0xff] %v7929_v46  ;;  %9066 = vst [vmem:[#allocation49_spill] sm:$0xff] %v7931_v51  ;;  %v7945_v16 = vpack.c.bf16 %v2607_v22, %v2603_v21  ;;  %v2609_v45 = vld [vmem:[#allocation9 + $0x2f0] sm:$0xff] }
 0x529   :  { %5794 = vmatpush1.bf16.msra.mxu0 %v7921_v41  ;;  %5858 = vmatpush1.bf16.msra.mxu1 %v7924_v54  ;;  %9068 = vst [vmem:[#allocation51_spill] sm:$0xff] %v7936_v34  ;;  %v2604_v41 = vld [vmem:[#allocation9 + $0x2c8] sm:$0xff]  ;;  %v2606_v54 = vld [vmem:[#allocation9 + $0x2d8] sm:$0xff] }
 0x52a   :  { %5796 = vmatprep.subr.bf16.mxu0 %v7929_v46  ;;  %5860 = vmatprep.subr.bf16.mxu1 %v7931_v51  ;;  %v7941_v43 = vpack.c.bf16 %v2608_v14, %v2604_v41  ;;  %v7943_v10 = vpack.c.bf16 %v2610_v49, %v2606_v54  ;;  %9071 = vst [vmem:[#allocation54_spill] sm:$0xff] %v7945_v16  ;;  %v2616_v46 = vld [vmem:[#allocation9 + $0x328] sm:$0xff]  ;;  %v2618_v54 = vld [vmem:[#allocation9 + $0x338] sm:$0xff]  ;;  %v2611_v41 = vld [vmem:[#allocation9 + $0x300] sm:$0xff] }
 0x52b   :  { %v7948_v51 = vpack.c.bf16 %v2609_v45, %v2605_v30  ;;  %v2615_v49 = vld [vmem:[#allocation9 + $0x320] sm:$0xff]  ;;  %v2613_v30 = vld [vmem:[#allocation9 + $0x310] sm:$0xff] }
 0x52c   :  { %9069 = vst [vmem:[#allocation52_spill] sm:$0xff] %v7941_v43  ;;  %9070 = vst [vmem:[#allocation53_spill] sm:$0xff] %v7943_v10  ;;  %v7957_v22 = vpack.c.bf16 %v2615_v49, %v2611_v41  ;;  %v2617_v45 = vld [vmem:[#allocation9 + $0x330] sm:$0xff] }
 0x52d   :  { %5798 = vmatpush1.bf16.msra.mxu0 %v7933_v1  ;;  %5862 = vmatpush1.bf16.msra.mxu1 %v7936_v34  ;;  %9072 = vst [vmem:[#allocation55_spill] sm:$0xff] %v7948_v51  ;;  %v2612_v1 = vld [vmem:[#allocation9 + $0x308] sm:$0xff]  ;;  %v2614_v34 = vld [vmem:[#allocation9 + $0x318] sm:$0xff] }
 0x52e   :  { %5800 = vmatprep.subr.bf16.mxu0 %v7941_v43  ;;  %5864 = vmatprep.subr.bf16.mxu1 %v7943_v10  ;;  %v7953_v14 = vpack.c.bf16 %v2616_v46, %v2612_v1  ;;  %v7955_v21 = vpack.c.bf16 %v2618_v54, %v2614_v34  ;;  %9075 = vst [vmem:[#allocation58_spill] sm:$0xff] %v7957_v22  ;;  %v2624_v43 = vld [vmem:[#allocation9 + $0x368] sm:$0xff]  ;;  %v2626_v34 = vld [vmem:[#allocation9 + $0x378] sm:$0xff]  ;;  %v2619_v1 = vld [vmem:[#allocation9 + $0x340] sm:$0xff] }
 0x52f   :  { %v7960_v10 = vpack.c.bf16 %v2617_v45, %v2613_v30  ;;  %v2623_v54 = vld [vmem:[#allocation9 + $0x360] sm:$0xff]  ;;  %v2621_v30 = vld [vmem:[#allocation9 + $0x350] sm:$0xff] }
 0x530   :  { %9073 = vst [vmem:[#allocation56_spill] sm:$0xff] %v7953_v14  ;;  %9074 = vst [vmem:[#allocation57_spill] sm:$0xff] %v7955_v21  ;;  %v7969_v49 = vpack.c.bf16 %v2623_v54, %v2619_v1  ;;  %v2625_v45 = vld [vmem:[#allocation9 + $0x370] sm:$0xff] }
 0x531   :  { %5802 = vmatpush1.bf16.msra.mxu0 %v7945_v16  ;;  %5866 = vmatpush1.bf16.msra.mxu1 %v7948_v51  ;;  %9076 = vst [vmem:[#allocation59_spill] sm:$0xff] %v7960_v10  ;;  %v2620_v16 = vld [vmem:[#allocation9 + $0x348] sm:$0xff]  ;;  %v2622_v51 = vld [vmem:[#allocation9 + $0x358] sm:$0xff]  ;;  %v2629_v1 = vld [vmem:[#allocation9 + $0x390] sm:$0xff] }
 0x532   :  { %5804 = vmatprep.subr.bf16.mxu0 %v7953_v14  ;;  %5868 = vmatprep.subr.bf16.mxu1 %v7955_v21  ;;  %v7965_v46 = vpack.c.bf16 %v2624_v43, %v2620_v16  ;;  %v7967_v41 = vpack.c.bf16 %v2626_v34, %v2622_v51  ;;  %9079 = vst [vmem:[#allocation63_spill] sm:$0xff] %v7969_v49  ;;  %v2628_v14 = vld [vmem:[#allocation9 + $0x388] sm:$0xff]  ;;  %v2627_v51 = vld [vmem:[#allocation9 + $0x380] sm:$0xff] }
 0x533   :  { %v7972_v21 = vpack.c.bf16 %v2625_v45, %v2621_v30  ;;  %v7975_v43 = vpack.c.bf16 %v2632_v59, %v2628_v14  ;;  %v2631_v34 = vld [vmem:[#allocation9 + $0x3a0] sm:$0xff]  ;;  %v2633_v30 = vld [vmem:[#allocation9 + $0x3b0] sm:$0xff]  ;;  %v2636_v45 = vld [vmem:[#allocation9 + $0x3c8] sm:$0xff] }
 0x534   :  { %9077 = vst [vmem:[#allocation60_spill] sm:$0xff] %v7965_v46  ;;  %9078 = vst [vmem:[#allocation61_spill] sm:$0xff] %v7967_v41  ;;  %v7981_v54 = vpack.c.bf16 %v2631_v34, %v2627_v51  ;;  %v7985_v59 = vpack.c.bf16 %v2633_v30, %v2629_v1  ;;  %v2638_v14 = vld [vmem:[#allocation9 + $0x3d8] sm:$0xff]  ;;  %v2641_v51 = vld [vmem:[#allocation9 + $0x3f0] sm:$0xff] }
 0x535   :  { %5806 = vmatpush1.bf16.msra.mxu0 %v7957_v22  ;;  %5870 = vmatpush1.bf16.msra.mxu1 %v7960_v10  ;;  %9080 = vst [vmem:[#allocation64_spill] sm:$0xff] %v7972_v21  ;;  %v2630_v22 = vld [vmem:[#allocation9 + $0x398] sm:$0xff]  ;;  %9081 = vst [vmem:[#allocation65_spill] sm:$0xff] %v7975_v43 }
 0x536   :  { %5808 = vmatprep.subr.bf16.mxu0 %v7965_v46  ;;  %5872 = vmatprep.subr.bf16.mxu1 %v7967_v41  ;;  %v7977_v16 = vpack.c.bf16 %v2634_v2, %v2630_v22  ;;  %9083 = vst [vmem:[#allocation62_spill] sm:$0xff] %v7981_v54  ;;  %v2640_v46 = vld [vmem:[#allocation9 + $0x3e8] sm:$0xff]  ;;  %9084 = vst [vmem:[#allocation67_spill] sm:$0xff] %v7985_v59  ;;  %v2642_v22 = vld [vmem:[#allocation9 + $0x3f8] sm:$0xff] }
 0x537   :  { %v7987_v2 = vpack.c.bf16 %v2640_v46, %v2636_v45  ;;  %v2635_v41 = vld [vmem:[#allocation9 + $0x3c0] sm:$0xff]  ;;  %v7989_v10 = vpack.c.bf16 %v2642_v22, %v2638_v14  ;;  %v2095_v46 = vld [vmem:[%s8616_s5] sm:$0xf] }
 0x538   :  { %9082 = vst [vmem:[#allocation66_spill] sm:$0xff] %v7977_v16  ;;  %v2104_v1 = vrot.slane %v2095_v46, %v8929_v52 }
 0x539   :  { %5810 = vmatpush1.bf16.msra.mxu0 %v7969_v49  ;;  %5874 = vmatpush1.bf16.msra.mxu1 %v7972_v21  ;;  %9085 = vst [vmem:[#allocation68_spill] sm:$0xff] %v7987_v2  ;;  %9086 = vst [vmem:[#allocation69_spill] sm:$0xff] %v7989_v10  ;;  %v2639_v49 = vld [vmem:[#allocation9 + $0x3e0] sm:$0xff]  ;;  %v2637_v21 = vld [vmem:[#allocation9 + $0x3d0] sm:$0xff] }
 0x53a   :  { %5812 = vmatprep.subr.bf16.mxu0 %v7975_v43  ;;  %5876 = vmatprep.subr.bf16.mxu1 %v7977_v16  ;;  %v7993_v34 = vpack.c.bf16 %v2639_v49, %v2635_v41  ;;  %v7995_v43 = vpack.c.bf16 %v2641_v51, %v2637_v21  ;;  %v2100_v41 = vrot.slane %v2095_v46, %v8928_v25 }
 0x53c   :  { %9087 = vst [vmem:[#allocation70_spill] sm:$0xff] %v7993_v34  ;;  %9088 = vst [vmem:[#allocation71_spill] sm:$0xff] %v7995_v43 }
 0x53d   :  { %5814 = vmatpush1.bf16.msra.mxu0 %v7981_v54  ;;  %5878 = vmatpush1.bf16.msra.mxu1 %v7985_v59  ;;  %v2108_v59 = vrot.slane %v2095_v46, %v7164_v40 }
 0x53e   :  { %5816 = vmatprep.subr.bf16.mxu0 %v7987_v2  ;;  %5880 = vmatprep.subr.bf16.mxu1 %v7989_v10  ;;  %v2112_v2 = vrot.slane %v2095_v46, %v9036_v56 }
 0x541   :  { %5818 = vmatpush1.bf16.msra.mxu0 %v7993_v34  ;;  %5882 = vmatpush1.bf16.msra.mxu1 %v7995_v43 }
 0x542   :  { %5884 = vmatprep.subr.bf16.mxu0 %v7701_v19  ;;  %5915 = vmatprep.subr.bf16.mxu1 %v8879_v48 }
 0x5b7   :  { %v2183_v21 = vpop.f32.mrb[14].mxu0  ;;  %v2254_v49 = vpop.f32.mrb[14].mxu1 }
 0x5b8   :  { %v2184_v30 = vadd.f32 %v2183_v21, %v2100_v41  ;;  %v2185_v45 = vpop.f32.mrb[15].mxu0  ;;  %v2256_v14 = vpop.f32.mrb[15].mxu1  ;;  %v2334_v41 = vld [vmem:[%s8614_s3] sm:$0x7] }
 0x5b9   :  { %v2186_v51 = vadd.f32 %v2185_v45, %v2104_v1  ;;  %v2257_v21 = vadd.f32 %v2256_v14, %v2112_v2  ;;  %v2343_v45 = vrot.slane %v2334_v41, %v8929_v52 }
 0x5ba   :  { %v4529_v22 = vmul.f32 -1.442695, %v2184_v30  ;;  %v2255_v30 = vadd.f32 %v2254_v49, %v2108_v59 }
 0x5bb   :  { %v4530_v43 = vmul.f32 -1.442695, %v2186_v51 }
 0x5bc   :  { %6520 = vpow2.f32 %v4529_v22  ;;  %v2282_v22 = vld [vmem:[#allocation3 + $0x60] sm:$0xff] }
 0x5bd   :  { %6522 = vpow2.f32 %v4530_v43  ;;  %v2339_v43 = vrot.slane %v2334_v41, %v8928_v25 }
 0x5c6   :  { %v6521_v19 = vpop.eup %6520 }
 0x5c7   :  { %v2262_v34 = vadd.f32 1.0, %v6521_v19  ;;  %v6523_v10 = vpop.eup %6522 }
 0x5c8   :  { %v2268_v54 = vadd.f32 1.0, %v6523_v10 }
 0x5c9   :  { %6524 = vrcp.f32 %v2262_v34 }
 0x5ca   :  { %6526 = vrcp.f32 %v2268_v54 }
 0x5d3   :  { %v6525_v16 = vpop.eup %6524 }
 0x5d4   :  { %v2271_v1 = vmul.f32 %v6525_v16, %v2257_v21  ;;  %v6527_v59 = vpop.eup %6526 }
 0x5d5   :  { %v2274_v54 = vsub.f32 1.0, %v6527_v59 }
 0x5d6   :  { %v2272_v34 = vadd.f32 %v2271_v1, %v2255_v30  ;;  %v2276_v30 = vmul.f32 %v6527_v59, %v7717_v33 }
 0x5d7   :  { %v2417_v51 = vpop.f32.mrb[16].mxu0  ;;  %v2488_v19 = vpop.f32.mrb[16].mxu1 }
 0x5d8   :  { %6528 = vtanh.f32 %v2272_v34  ;;  %v2418_v46 = vadd.f32 %v2417_v51, %v2339_v43  ;;  %v2419_v10 = vpop.f32.mrb[17].mxu0  ;;  %v4857_v56 = vpop.f32.mrb[17].mxu1 }
 0x5d9   :  { %v2420_v23 = vadd.f32 %v2419_v10, %v2343_v45 }
 0x5da   :  { %v2492_v29 = vadd.f32 %v2418_v46, %v2282_v22  ;;  %v2284_v22 = vld [vmem:[#allocation3 + $0x70] sm:$0xff] }
 0x5db   :  { %v2499_v14 = vadd.f32 %v2420_v23, %v2283_v38  ;;  %v2347_v23 = vrot.slane %v2334_v41, %v7164_v40  ;;  %v9125_v41 = vld [vmem:[#allocation56_spill] sm:$0xff] }
 0x5dc   :  { %v4531_v2 = vmul.f32 -1.442695, %v2492_v29 }
 0x5dd   :  { %v4532_v16 = vmul.f32 -1.442695, %v2499_v14  ;;  %v2489_v45 = vadd.f32 %v2488_v19, %v2347_v23  ;;  %v9126_v19 = vld [vmem:[#allocation57_spill] sm:$0xff]  ;;  %v9134_v23 = vld [vmem:[#allocation66_spill] sm:$0xff] }
 0x5de   :  { %6530 = vpow2.f32 %v4531_v2 }
 0x5df   :  { %6532 = vpow2.f32 %v4532_v16 }
 0x5e2   :  { %v6529_v49 = vpop.eup %6528 }
 0x5e3   :  { %v2275_v21 = vmul.f32 %v6529_v49, %v2274_v54  ;;  %v9127_v54 = vld [vmem:[#allocation58_spill] sm:$0xff]  ;;  %v9128_v49 = vld [vmem:[#allocation59_spill] sm:$0xff] }
 0x5e5   :  { %v8016_v1 = vadd.f32 %v2276_v30, %v2275_v21  ;;  %v9129_v21 = vld [vmem:[#allocation60_spill] sm:$0xff]  ;;  %v9130_v30 = vld [vmem:[#allocation61_spill] sm:$0xff] }
 0x5e7   :  { %2280 = vst [vmem:[#allocation11 + $0x18] sm:$0xff] %v8016_v1  ;;  %2729 = vmatprep.mubr.f32.mxu0 %v8016_v1  ;;  %2800 = vmatprep.mubr.f32.mxu1 %v8016_v1 }
 0x5e8   :  { %v6531_v56 = vpop.eup %6530 }
 0x5e9   :  { %v2496_v29 = vadd.f32 1.0, %v6531_v56  ;;  %v6533_v38 = vpop.eup %6532  ;;  %v9131_v56 = vld [vmem:[#allocation63_spill] sm:$0xff] }
 0x5ea   :  { %v2503_v43 = vadd.f32 1.0, %v6533_v38  ;;  %v9133_v38 = vld [vmem:[#allocation65_spill] sm:$0xff] }
 0x5eb   :  { %6534 = vrcp.f32 %v2496_v29  ;;  %v9132_v29 = vld [vmem:[#allocation64_spill] sm:$0xff] }
 0x5ec   :  { %6536 = vrcp.f32 %v2503_v43  ;;  %v9135_v43 = vld [vmem:[#allocation62_spill] sm:$0xff] }
 0x5f5   :  { %v6535_v34 = vpop.eup %6534 }
 0x5f6   :  { %v2506_v33 = vmul.f32 %v6535_v34, %v2489_v45  ;;  %v6537_v46 = vpop.eup %6536  ;;  %v9136_v45 = vld [vmem:[#allocation67_spill] sm:$0xff]  ;;  %v9137_v34 = vld [vmem:[#allocation68_spill] sm:$0xff] }
 0x5f7   :  { %v2509_v10 = vsub.f32 1.0, %v6537_v46  ;;  %v2511_v59 = vmul.f32 %v6537_v46, %v7728_v12  ;;  %v9091_v12 = vld [vmem:[#allocation22_spill] sm:$0xff] }
 0x5f8   :  { %v2507_v51 = vadd.f32 %v2506_v33, %v2284_v22  ;;  %v9138_v22 = vld [vmem:[#allocation69_spill] sm:$0xff]  ;;  %v9139_v33 = vld [vmem:[#allocation70_spill] sm:$0xff] }
 0x5f9   :  { %v3383_v46 = vld [vmem:[#allocation8 + $0x8] sm:$0xff] }
 0x5fa   :  { %6538 = vtanh.f32 %v2507_v51  ;;  %v9140_v51 = vld [vmem:[#allocation71_spill] sm:$0xff] }
 0x604   :  { %v6539_v2 = vpop.eup %6538 }
 0x605   :  { %v2510_v14 = vmul.f32 %v6539_v2, %v2509_v10  ;;  %v3386_v10 = vld [vmem:[#allocation8 + $0x20] sm:$0xff] }
 0x606   :  { %v8127_v2 = vpack.c.bf16 %v3386_v10, %v3383_v46  ;;  %v3382_v46 = vld [vmem:[#allocation8] sm:$0xff] }
 0x607   :  { %v8023_v16 = vadd.f32 %v2511_v59, %v2510_v14  ;;  %v2643_v14 = vld [vmem:[%s8616_s5] sm:$0xf] }
 0x608   :  { %v2648_v59 = vrot.slane %v2643_v14, %v8928_v25 }
 0x609   :  { %2730 = vmatmul.mubr.f32.vlgmr.msra.gmra.mrb[18].mxu0 %v8023_v16  ;;  %2801 = vmatmul.mubr.f32.vlgmr.msra.gmra.mrb[18].mxu1 %v8023_v16 }
 0x60a   :  { %5886 = vmatpush1.bf16.msra.mxu0 %v7724_v50  ;;  %5917 = vmatpush3.bf16.msra.mxu1 %v7726_v63  ;;  %v9089_v50 = vld [vmem:[#allocation20_spill] sm:$0xff]  ;;  %v9090_v63 = vld [vmem:[#allocation21_spill] sm:$0xff] }
 0x60b   :  { %5888 = vmatprep.subr.bf16.mxu0 %v7730_v39  ;;  %5918 = vmatprep.subr.bf16.mxu1 %v8879_v48  ;;  %v9092_v39 = vld [vmem:[#allocation23_spill] sm:$0xff] }
 0x60c   :  { %2963 = vmatprep.mubr.f32.mxu0 %v8882_v3  ;;  %4890 = vmatprep.mubr.msk.f32.mxu1 %vm6764_vm0, %v8882_v3 }
 0x60e   :  { %5890 = vmatpush1.bf16.msra.mxu0 %v7736_v27  ;;  %5920 = vmatpush3.bf16.msra.mxu1 %v7738_v11  ;;  %v9093_v27 = vld [vmem:[#allocation24_spill] sm:$0xff]  ;;  %v9094_v11 = vld [vmem:[#allocation25_spill] sm:$0xff] }
 0x60f   :  { %5892 = vmatprep.subr.bf16.mxu0 %v7742_v18  ;;  %5921 = vmatprep.subr.bf16.mxu1 %v8879_v48  ;;  %v9095_v18 = vld [vmem:[#allocation26_spill] sm:$0xff] }
 0x612   :  { %5894 = vmatpush1.bf16.msra.mxu0 %v7749_v24  ;;  %5923 = vmatpush3.bf16.msra.mxu1 %v7751_v26  ;;  %v9096_v24 = vld [vmem:[#allocation27_spill] sm:$0xff]  ;;  %v9097_v26 = vld [vmem:[#allocation28_spill] sm:$0xff] }
 0x613   :  { %5896 = vmatprep.subr.bf16.mxu0 %v7755_v17  ;;  %5924 = vmatprep.subr.bf16.mxu1 %v8879_v48  ;;  %v9098_v17 = vld [vmem:[#allocation29_spill] sm:$0xff] }
 0x616   :  { %5898 = vmatpush1.bf16.msra.mxu0 %v7759_v62  ;;  %5926 = vmatpush3.bf16.msra.mxu1 %v7761_v8  ;;  %v9099_v62 = vld [vmem:[#allocation30_spill] sm:$0xff]  ;;  %v9100_v8 = vld [vmem:[#allocation31_spill] sm:$0xff] }
 0x617   :  { %5900 = vmatprep.subr.bf16.mxu0 %v7765_v44  ;;  %5927 = vmatprep.subr.bf16.mxu1 %v8879_v48  ;;  %v9101_v44 = vld [vmem:[#allocation32_spill] sm:$0xff] }
 0x61a   :  { %5902 = vmatpush1.bf16.msra.mxu0 %v7769_v47  ;;  %5929 = vmatpush3.bf16.msra.mxu1 %v7771_v53  ;;  %v9102_v47 = vld [vmem:[#allocation33_spill] sm:$0xff]  ;;  %v9103_v53 = vld [vmem:[#allocation34_spill] sm:$0xff] }
 0x61b   :  { %5904 = vmatprep.subr.bf16.mxu0 %v7775_v37  ;;  %5930 = vmatprep.subr.bf16.mxu1 %v8879_v48  ;;  %v9104_v37 = vld [vmem:[#allocation35_spill] sm:$0xff] }
 0x61e   :  { %5906 = vmatpush1.bf16.msra.mxu0 %v7779_v55  ;;  %5932 = vmatpush3.bf16.msra.mxu1 %v7781_v36  ;;  %v9105_v55 = vld [vmem:[#allocation36_spill] sm:$0xff]  ;;  %v9106_v36 = vld [vmem:[#allocation37_spill] sm:$0xff] }
 0x61f   :  { %5908 = vmatprep.subr.bf16.mxu0 %v7785_v0  ;;  %5933 = vmatprep.subr.bf16.mxu1 %v8879_v48  ;;  %v9107_v0 = vld [vmem:[#allocation38_spill] sm:$0xff] }
 0x622   :  { %5910 = vmatpush1.bf16.msra.mxu0 %v7789_v42  ;;  %5935 = vmatpush3.bf16.msra.mxu1 %v7791_v7  ;;  %v9108_v42 = vld [vmem:[#allocation39_spill] sm:$0xff]  ;;  %v9109_v7 = vld [vmem:[#allocation40_spill] sm:$0xff] }
 0x623   :  { %5912 = vmatprep.subr.bf16.mxu0 %v7795_v28  ;;  %5936 = vmatprep.subr.bf16.mxu1 %v8879_v48  ;;  %v9110_v28 = vld [vmem:[#allocation41_spill] sm:$0xff] }
 0x626   :  { %5914 = vmatpush1.bf16.msra.mxu0 %v7799_v4  ;;  %5938 = vmatpush3.bf16.msra.mxu1 %v7801_v15  ;;  %v9111_v4 = vld [vmem:[#allocation42_spill] sm:$0xff]  ;;  %v9112_v15 = vld [vmem:[#allocation43_spill] sm:$0xff] }
 0x627   :  { %5940 = vmatprep.subr.bf16.mxu0 %v7809_v60  ;;  %6004 = vmatprep.subr.bf16.mxu1 %v7811_v6  ;;  %v9113_v60 = vld [vmem:[#allocation44_spill] sm:$0xff]  ;;  %v9114_v6 = vld [vmem:[#allocation45_spill] sm:$0xff] }
 0x629   :  { %2964 = vmatmul.mubr.f32.vlgmr.msra.gmra.mrb[20].mxu0 %v8023_v16  ;;  %4891 = vmatmul.mubr.f32.vlgmr.msra.gmra.mrb[20].mxu1 %v8023_v16 }
 0x62a   :  { %5942 = vmatpush1.bf16.msra.mxu0 %v7813_v61  ;;  %6006 = vmatpush1.bf16.msra.mxu1 %v7816_v58  ;;  %v9115_v61 = vld [vmem:[#allocation46_spill] sm:$0xff]  ;;  %v9116_v58 = vld [vmem:[#allocation47_spill] sm:$0xff] }
 0x62b   :  { %5944 = vmatprep.subr.bf16.mxu0 %v7821_v35  ;;  %6008 = vmatprep.subr.bf16.mxu1 %v7823_v20  ;;  %v9117_v35 = vld [vmem:[#allocation48_spill] sm:$0xff]  ;;  %v9118_v20 = vld [vmem:[#allocation49_spill] sm:$0xff] }
 0x62e   :  { %5946 = vmatpush1.bf16.msra.mxu0 %v7825_v13  ;;  %6010 = vmatpush1.bf16.msra.mxu1 %v7828_v9  ;;  %v9119_v13 = vld [vmem:[#allocation50_spill] sm:$0xff]  ;;  %v9120_v9 = vld [vmem:[#allocation51_spill] sm:$0xff] }
 0x62f   :  { %5948 = vmatprep.subr.bf16.mxu0 %v7833_v5  ;;  %6012 = vmatprep.subr.bf16.mxu1 %v7835_v32  ;;  %v9121_v5 = vld [vmem:[#allocation52_spill] sm:$0xff]  ;;  %v9122_v32 = vld [vmem:[#allocation53_spill] sm:$0xff] }
 0x632   :  { %5950 = vmatpush1.bf16.msra.mxu0 %v7837_v31  ;;  %6014 = vmatpush1.bf16.msra.mxu1 %v7840_v57  ;;  %v9123_v31 = vld [vmem:[#allocation54_spill] sm:$0xff]  ;;  %v9124_v57 = vld [vmem:[#allocation55_spill] sm:$0xff] }
 0x633   :  { %5952 = vmatprep.subr.bf16.mxu0 %v9089_v50  ;;  %6016 = vmatprep.subr.bf16.mxu1 %v9090_v63 }
 0x636   :  { %5954 = vmatpush1.bf16.msra.mxu0 %v9091_v12  ;;  %6018 = vmatpush1.bf16.msra.mxu1 %v9092_v39  ;;  %v2652_v12 = vrot.slane %v2643_v14, %v8929_v52 }
 0x637   :  { %5956 = vmatprep.subr.bf16.mxu0 %v9093_v27  ;;  %6020 = vmatprep.subr.bf16.mxu1 %v9094_v11 }
 0x63a   :  { %5958 = vmatpush1.bf16.msra.mxu0 %v9095_v18  ;;  %6022 = vmatpush1.bf16.msra.mxu1 %v9096_v24 }
 0x63b   :  { %5960 = vmatprep.subr.bf16.mxu0 %v9097_v26  ;;  %6024 = vmatprep.subr.bf16.mxu1 %v9098_v17 }
 0x63e   :  { %5962 = vmatpush1.bf16.msra.mxu0 %v9099_v62  ;;  %6026 = vmatpush1.bf16.msra.mxu1 %v9100_v8 }
 0x63f   :  { %5964 = vmatprep.subr.bf16.mxu0 %v9101_v44  ;;  %6028 = vmatprep.subr.bf16.mxu1 %v9102_v47  ;;  %v9141_v44 = vld [vmem:[#allocation19_spill] sm:$0xff] }
 0x640   :  { %v2660_v47 = vrot.slane %v2643_v14, %v9141_v44 }
 0x642   :  { %5966 = vmatpush1.bf16.msra.mxu0 %v9103_v53  ;;  %6030 = vmatpush1.bf16.msra.mxu1 %v9104_v37  ;;  %v2656_v53 = vrot.slane %v2643_v14, %v7164_v40  ;;  %v3385_v14 = vld [vmem:[#allocation8 + $0x18] sm:$0xff] }
 0x643   :  { %5968 = vmatprep.subr.bf16.mxu0 %v9105_v55  ;;  %6032 = vmatprep.subr.bf16.mxu1 %v9106_v36  ;;  %v2882_v55 = vld [vmem:[%s8614_s3] sm:$0x7] }
 0x646   :  { %5970 = vmatpush1.bf16.msra.mxu0 %v9107_v0  ;;  %6034 = vmatpush1.bf16.msra.mxu1 %v9108_v42 }
 0x647   :  { %5972 = vmatprep.subr.bf16.mxu0 %v9109_v7  ;;  %6036 = vmatprep.subr.bf16.mxu1 %v9110_v28  ;;  %v2887_v28 = vrot.slane %v2882_v55, %v8928_v25 }
 0x64a   :  { %5974 = vmatpush1.bf16.msra.mxu0 %v9111_v4  ;;  %6038 = vmatpush1.bf16.msra.mxu1 %v9112_v15  ;;  %v2891_v4 = vrot.slane %v2882_v55, %v8929_v52 }
 0x64b   :  { %5976 = vmatprep.subr.bf16.mxu0 %v9113_v60  ;;  %6040 = vmatprep.subr.bf16.mxu1 %v9114_v6  ;;  %v2830_v60 = vld [vmem:[#allocation3 + $0x78] sm:$0xff] }
 0x64e   :  { %5978 = vmatpush1.bf16.msra.mxu0 %v9115_v61  ;;  %6042 = vmatpush1.bf16.msra.mxu1 %v9116_v58 }
 0x64f   :  { %5980 = vmatprep.subr.bf16.mxu0 %v9117_v35  ;;  %6044 = vmatprep.subr.bf16.mxu1 %v9118_v20 }
 0x652   :  { %5982 = vmatpush1.bf16.msra.mxu0 %v9119_v13  ;;  %6046 = vmatpush1.bf16.msra.mxu1 %v9120_v9 }
 0x653   :  { %5984 = vmatprep.subr.bf16.mxu0 %v9121_v5  ;;  %6048 = vmatprep.subr.bf16.mxu1 %v9122_v32  ;;  %v2831_v5 = vld [vmem:[#allocation3 + $0x80] sm:$0xff] }
 0x656   :  { %5986 = vmatpush1.bf16.msra.mxu0 %v9123_v31  ;;  %6050 = vmatpush1.bf16.msra.mxu1 %v9124_v57 }
 0x657   :  { %5988 = vmatprep.subr.bf16.mxu0 %v9125_v41  ;;  %6052 = vmatprep.subr.bf16.mxu1 %v9126_v19 }
 0x65a   :  { %5990 = vmatpush1.bf16.msra.mxu0 %v9127_v54  ;;  %6054 = vmatpush1.bf16.msra.mxu1 %v9128_v49 }
 0x65b   :  { %5992 = vmatprep.subr.bf16.mxu0 %v9129_v21  ;;  %6056 = vmatprep.subr.bf16.mxu1 %v9130_v30 }
 0x65e   :  { %5994 = vmatpush1.bf16.msra.mxu0 %v9131_v56  ;;  %6058 = vmatpush1.bf16.msra.mxu1 %v9132_v29 }
 0x65f   :  { %5996 = vmatprep.subr.bf16.mxu0 %v9133_v38  ;;  %6060 = vmatprep.subr.bf16.mxu1 %v9134_v23  ;;  %v2895_v23 = vrot.slane %v2882_v55, %v7164_v40  ;;  %v3398_v55 = vld [vmem:[#allocation8 + $0x80] sm:$0xff] }
 0x662   :  { %5998 = vmatpush1.bf16.msra.mxu0 %v9135_v43  ;;  %6062 = vmatpush1.bf16.msra.mxu1 %v9136_v45 }
 0x663   :  { %6000 = vmatprep.subr.bf16.mxu0 %v9137_v34  ;;  %6064 = vmatprep.subr.bf16.mxu1 %v9138_v22  ;;  %v2832_v22 = vld [vmem:[#allocation3 + $0x88] sm:$0xff] }
 0x666   :  { %6002 = vmatpush1.bf16.msra.mxu0 %v9139_v33  ;;  %6066 = vmatpush1.bf16.msra.mxu1 %v9140_v51 }
 0x667   :  { %6099 = vmatprep.subr.bf16.mxu1 %v8879_v48  ;;  %6068 = vmatprep.subr.bf16.mxu0 %v8127_v2 }
 0x6dc   :  { %v2731_v50 = vpop.f32.mrb[18].mxu0  ;;  %v2802_v63 = vpop.f32.mrb[18].mxu1 }
 0x6dd   :  { %v2732_v39 = vadd.f32 %v2731_v50, %v2648_v59  ;;  %v2733_v27 = vpop.f32.mrb[19].mxu0  ;;  %v2804_v11 = vpop.f32.mrb[19].mxu1  ;;  %v2803_v42 = vadd.f32 %v2802_v63, %v2656_v53  ;;  %v3384_v59 = vld [vmem:[#allocation8 + $0x10] sm:$0xff]  ;;  %v3387_v50 = vld [vmem:[#allocation8 + $0x28] sm:$0xff]  ;;  %v3393_v53 = vld [vmem:[#allocation8 + $0x58] sm:$0xff] }
 0x6de   :  { %v2734_v24 = vadd.f32 %v2733_v27, %v2652_v12  ;;  %v2805_v36 = vadd.f32 %v2804_v11, %v2660_v47  ;;  %v3389_v12 = vld [vmem:[#allocation8 + $0x38] sm:$0xff]  ;;  %v3390_v47 = vld [vmem:[#allocation8 + $0x40] sm:$0xff] }
 0x6df   :  { %v4533_v18 = vmul.f32 -1.442695, %v2732_v39  ;;  %v3392_v39 = vld [vmem:[#allocation8 + $0x50] sm:$0xff] }
 0x6e0   :  { %v4534_v26 = vmul.f32 -1.442695, %v2734_v24  ;;  %v8152_v24 = vpack.c.bf16 %v3387_v50, %v3384_v59  ;;  %v3421_v50 = vld [vmem:[#allocation8 + $0x138] sm:$0xff] }
 0x6e1   :  { %6540 = vpow2.f32 %v4533_v18  ;;  %v8150_v18 = vpack.c.bf16 %v3385_v14, %v3382_v46  ;;  %v3418_v14 = vld [vmem:[#allocation8 + $0x120] sm:$0xff] }
 0x6e2   :  { %6542 = vpow2.f32 %v4534_v26  ;;  %v3388_v26 = vld [vmem:[#allocation8 + $0x30] sm:$0xff] }
 0x6eb   :  { %v6541_v17 = vpop.eup %6540 }
 0x6ec   :  { %v2810_v62 = vadd.f32 1.0, %v6541_v17  ;;  %v6543_v8 = vpop.eup %6542 }
 0x6ed   :  { %v2816_v37 = vadd.f32 1.0, %v6543_v8  ;;  %v3391_v8 = vld [vmem:[#allocation8 + $0x48] sm:$0xff] }
 0x6ee   :  { %6544 = vrcp.f32 %v2810_v62  ;;  %v8156_v62 = vpack.c.bf16 %v3392_v39, %v3389_v12  ;;  %v3423_v12 = vld [vmem:[#allocation8 + $0x148] sm:$0xff]  ;;  %v3425_v39 = vld [vmem:[#allocation8 + $0x158] sm:$0xff] }
 0x6ef   :  { %6546 = vrcp.f32 %v2816_v37  ;;  %v3395_v37 = vld [vmem:[#allocation8 + $0x68] sm:$0xff] }
 0x6f8   :  { %v6545_v0 = vpop.eup %6544 }
 0x6f9   :  { %v2819_v7 = vmul.f32 %v6545_v0, %v2805_v36  ;;  %v6547_v57 = vpop.eup %6546  ;;  %v8164_v36 = vpack.c.bf16 %v3393_v53, %v3390_v47  ;;  %v3394_v0 = vld [vmem:[#allocation8 + $0x60] sm:$0xff]  ;;  %v3427_v53 = vld [vmem:[#allocation8 + $0x168] sm:$0xff] }
 0x6fa   :  { %v2822_v19 = vsub.f32 1.0, %v6547_v57  ;;  %v2824_v21 = vmul.f32 %v6547_v57, %v8016_v1 }
 0x6fb   :  { %v2820_v15 = vadd.f32 %v2819_v7, %v2803_v42  ;;  %v8168_v42 = vpack.c.bf16 %v3398_v55, %v3395_v37  ;;  %v3397_v7 = vld [vmem:[#allocation8 + $0x78] sm:$0xff]  ;;  %v3426_v37 = vld [vmem:[#allocation8 + $0x160] sm:$0xff] }
 0x6fc   :  { %v2965_v6 = vpop.f32.mrb[20].mxu0  ;;  %v3036_v61 = vpop.f32.mrb[20].mxu1  ;;  %v3429_v55 = vld [vmem:[#allocation8 + $0x178] sm:$0xff] }
 0x6fd   :  { %6548 = vtanh.f32 %v2820_v15  ;;  %v2966_v58 = vadd.f32 %v2965_v6, %v2887_v28  ;;  %v2967_v35 = vpop.f32.mrb[21].mxu0  ;;  %v4892_v20 = vpop.f32.mrb[21].mxu1  ;;  %v3037_v45 = vadd.f32 %v3036_v61, %v2895_v23  ;;  %v3396_v28 = vld [vmem:[#allocation8 + $0x70] sm:$0xff]  ;;  %v3401_v15 = vld [vmem:[#allocation8 + $0x98] sm:$0xff]  ;;  %v8175_v6 = vpack.c.bf16 %v3397_v7, %v3394_v0 }
 0x6fe   :  { %v2968_v13 = vadd.f32 %v2967_v35, %v2891_v4  ;;  %v3399_v4 = vld [vmem:[#allocation8 + $0x88] sm:$0xff]  ;;  %v8227_v7 = vpack.c.bf16 %v3429_v55, %v3426_v37  ;;  %v3631_v37 = vld [vmem:[#allocation9 + $0xa0] sm:$0xff] }
 0x6ff   :  { %v3040_v9 = vadd.f32 %v2966_v58, %v2830_v60  ;;  %v3404_v60 = vld [vmem:[#allocation8 + $0xb0] sm:$0xff]  ;;  %v8177_v61 = vpack.c.bf16 %v3399_v4, %v3396_v28  ;;  %v3403_v20 = vld [vmem:[#allocation8 + $0xa8] sm:$0xff] }
 0x700   :  { %v3047_v31 = vadd.f32 %v2968_v13, %v2831_v5  ;;  %v3400_v58 = vld [vmem:[#allocation8 + $0x90] sm:$0xff]  ;;  %v8181_v35 = vpack.c.bf16 %v3404_v60, %v3401_v15  ;;  %v3402_v13 = vld [vmem:[#allocation8 + $0xa0] sm:$0xff]  ;;  %v3407_v5 = vld [vmem:[#allocation8 + $0xc8] sm:$0xff] }
 0x701   :  { %v4535_v32 = vmul.f32 -1.442695, %v3040_v9  ;;  %v3405_v9 = vld [vmem:[#allocation8 + $0xb8] sm:$0xff]  ;;  %v3612_v28 = vld [vmem:[#allocation9 + $0x8] sm:$0xff] }
 0x702   :  { %v4536_v41 = vmul.f32 -1.442695, %v3047_v31  ;;  %v8185_v31 = vpack.c.bf16 %v3403_v20, %v3400_v58  ;;  %v8187_v57 = vpack.c.bf16 %v3405_v9, %v3402_v13  ;;  %v3616_v4 = vld [vmem:[#allocation9 + $0x28] sm:$0xff]  ;;  %v3614_v15 = vld [vmem:[#allocation9 + $0x18] sm:$0xff]  ;;  %v3611_v20 = vld [vmem:[#allocation9] sm:$0xff] }
 0x703   :  { %6550 = vpow2.f32 %v4535_v32  ;;  %v3410_v32 = vld [vmem:[#allocation8 + $0xe0] sm:$0xff]  ;;  %v8235_v60 = vpack.c.bf16 %v3616_v4, %v3612_v28  ;;  %v3618_v58 = vld [vmem:[#allocation9 + $0x38] sm:$0xff]  ;;  %v3629_v4 = vld [vmem:[#allocation9 + $0x90] sm:$0xff] }
 0x704   :  { %6552 = vpow2.f32 %v4536_v41  ;;  %v3406_v41 = vld [vmem:[#allocation8 + $0xc0] sm:$0xff]  ;;  %v8237_v9 = vpack.c.bf16 %v3618_v58, %v3614_v15  ;;  %v3633_v15 = vld [vmem:[#allocation9 + $0xb0] sm:$0xff] }
 0x705   :  { %v3615_v13 = vld [vmem:[#allocation9 + $0x20] sm:$0xff]  ;;  %v8266_v58 = vpack.c.bf16 %v3633_v15, %v3629_v4 }
 0x706   :  { %v3647_v15 = vld [vmem:[#allocation9 + $0x120] sm:$0xff] }
 0x707   :  { %v6549_v54 = vpop.eup %6548 }
 0x708   :  { %v2823_v49 = vmul.f32 %v6549_v54, %v2822_v19  ;;  %v8191_v19 = vpack.c.bf16 %v3410_v32, %v3407_v5  ;;  %v3409_v54 = vld [vmem:[#allocation8 + $0xd8] sm:$0xff]  ;;  %v8239_v5 = vpack.c.bf16 %v3615_v13, %v3611_v20  ;;  %v3613_v32 = vld [vmem:[#allocation9 + $0x10] sm:$0xff]  ;;  %v3636_v20 = vld [vmem:[#allocation9 + $0xc8] sm:$0xff] }
 0x709   :  { %v3640_v13 = vld [vmem:[#allocation9 + $0xe8] sm:$0xff] }
 0x70a   :  { %v8143_v30 = vadd.f32 %v2824_v21, %v2823_v49  ;;  %v3408_v49 = vld [vmem:[#allocation8 + $0xd0] sm:$0xff]  ;;  %v3411_v21 = vld [vmem:[#allocation8 + $0xe8] sm:$0xff] }
 0x70b   :  { %v8197_v23 = vpack.c.bf16 %v3411_v21, %v3408_v49  ;;  %v3620_v49 = vld [vmem:[#allocation9 + $0x48] sm:$0xff] }
 0x70c   :  { %2828 = vst [vmem:[#allocation11 + $0x20] sm:$0xff] %v8143_v30  ;;  %3277 = vmatprep.mubr.f32.mxu0 %v8143_v30  ;;  %3348 = vmatprep.mubr.f32.mxu1 %v8143_v30  ;;  %v3624_v21 = vld [vmem:[#allocation9 + $0x68] sm:$0xff] }
 0x70d   :  { %v6551_v56 = vpop.eup %6550 }
 0x70e   :  { %v3044_v29 = vadd.f32 1.0, %v6551_v56  ;;  %v6553_v38 = vpop.eup %6552  ;;  %v3413_v56 = vld [vmem:[#allocation8 + $0xf8] sm:$0xff] }
 0x70f   :  { %v3051_v43 = vadd.f32 1.0, %v6553_v38  ;;  %v8195_v38 = vpack.c.bf16 %v3409_v54, %v3406_v41  ;;  %v3617_v41 = vld [vmem:[#allocation9 + $0x30] sm:$0xff] }
 0x710   :  { %6554 = vrcp.f32 %v3044_v29  ;;  %v3416_v29 = vld [vmem:[#allocation8 + $0x110] sm:$0xff]  ;;  %v8242_v54 = vpack.c.bf16 %v3617_v41, %v3613_v32  ;;  %v3638_v32 = vld [vmem:[#allocation9 + $0xd8] sm:$0xff]  ;;  %v8271_v41 = vpack.c.bf16 %v3640_v13, %v3636_v20 }
 0x711   :  { %6556 = vrcp.f32 %v3051_v43  ;;  %v3412_v43 = vld [vmem:[#allocation8 + $0xf0] sm:$0xff] }
 0x712   :  { %9142 = vst [vmem:[#allocation20_spill] sm:$0xff] %v8271_v41  ;;  %v3645_v20 = vld [vmem:[#allocation9 + $0x110] sm:$0xff] }
 0x713   :  { %v3649_v13 = vld [vmem:[#allocation9 + $0x130] sm:$0xff] }
 0x71a   :  { %v6555_v34 = vpop.eup %6554 }
 0x71b   :  { %v3054_v1 = vmul.f32 %v6555_v34, %v3037_v45  ;;  %v6557_v51 = vpop.eup %6556  ;;  %v8201_v45 = vpack.c.bf16 %v3416_v29, %v3413_v56  ;;  %v3415_v34 = vld [vmem:[#allocation8 + $0x108] sm:$0xff]  ;;  %v3622_v56 = vld [vmem:[#allocation9 + $0x58] sm:$0xff]  ;;  %v8247_v29 = vpack.c.bf16 %v3624_v21, %v3620_v49  ;;  %v3635_v21 = vld [vmem:[#allocation9 + $0xc0] sm:$0xff] }
 0x71c   :  { %v3057_v10 = vsub.f32 1.0, %v6557_v51  ;;  %v3059_v11 = vmul.f32 %v6557_v51, %v8023_v16  ;;  %v8162_v16 = vpack.c.bf16 %v3391_v8, %v3388_v26  ;;  %v3422_v51 = vld [vmem:[#allocation8 + $0x140] sm:$0xff]  ;;  %v8205_v46 = vpack.c.bf16 %v3415_v34, %v3412_v43  ;;  %v3424_v8 = vld [vmem:[#allocation8 + $0x150] sm:$0xff]  ;;  %v3626_v43 = vld [vmem:[#allocation9 + $0x78] sm:$0xff] }
 0x71d   :  { %v3055_v33 = vadd.f32 %v3054_v1, %v2832_v22  ;;  %v3414_v22 = vld [vmem:[#allocation8 + $0x100] sm:$0xff]  ;;  %v3417_v1 = vld [vmem:[#allocation8 + $0x118] sm:$0xff]  ;;  %v8225_v0 = vpack.c.bf16 %v3427_v53, %v3424_v8 }
 0x71e   :  { %v3619_v34 = vld [vmem:[#allocation9 + $0x40] sm:$0xff]  ;;  %v3634_v8 = vld [vmem:[#allocation9 + $0xb8] sm:$0xff] }
 0x71f   :  { %6558 = vtanh.f32 %v3055_v33  ;;  %v3419_v33 = vld [vmem:[#allocation8 + $0x128] sm:$0xff]  ;;  %v3627_v53 = vld [vmem:[#allocation9 + $0x80] sm:$0xff]  ;;  %v3642_v49 = vld [vmem:[#allocation9 + $0xf8] sm:$0xff] }
 0x720   :  { %v8211_v59 = vpack.c.bf16 %v3422_v51, %v3419_v33  ;;  %v3621_v51 = vld [vmem:[#allocation9 + $0x50] sm:$0xff]  ;;  %v8263_v28 = vpack.c.bf16 %v3631_v37, %v3627_v53  ;;  %v3650_v53 = vld [vmem:[#allocation9 + $0x138] sm:$0xff]  ;;  %v3643_v37 = vld [vmem:[#allocation9 + $0x100] sm:$0xff] }
 0x729   :  { %v6559_v63 = vpop.eup %6558 }
 0x72a   :  { %v3058_v27 = vmul.f32 %v6559_v63, %v3057_v10  ;;  %v8207_v10 = vpack.c.bf16 %v3417_v1, %v3414_v22  ;;  %v3420_v63 = vld [vmem:[#allocation8 + $0x130] sm:$0xff]  ;;  %v3623_v22 = vld [vmem:[#allocation9 + $0x60] sm:$0xff]  ;;  %v8249_v1 = vpack.c.bf16 %v3626_v43, %v3622_v56  ;;  %v8273_v43 = vpack.c.bf16 %v3642_v49, %v3638_v32 }
 0x72b   :  { %v8217_v26 = vpack.c.bf16 %v3423_v12, %v3420_v63  ;;  %v8251_v33 = vpack.c.bf16 %v3623_v22, %v3619_v34  ;;  %v3628_v63 = vld [vmem:[#allocation9 + $0x88] sm:$0xff]  ;;  %v3639_v56 = vld [vmem:[#allocation9 + $0xe0] sm:$0xff]  ;;  %v3637_v22 = vld [vmem:[#allocation9 + $0xd0] sm:$0xff]  ;;  %v8288_v32 = vpack.c.bf16 %v3647_v15, %v3643_v37  ;;  %v8290_v49 = vpack.c.bf16 %v3649_v13, %v3645_v20 }
 0x72c   :  { %v8154_v17 = vadd.f32 %v3059_v11, %v3058_v27  ;;  %v3428_v27 = vld [vmem:[#allocation8 + $0x170] sm:$0xff]  ;;  %v8215_v11 = vpack.c.bf16 %v3421_v50, %v3418_v14  ;;  %v3632_v12 = vld [vmem:[#allocation9 + $0xa8] sm:$0xff]  ;;  %9143 = vst [vmem:[#allocation21_spill] sm:$0xff] %v8273_v43  ;;  %v8275_v34 = vpack.c.bf16 %v3639_v56, %v3635_v21 }
 0x72d   :  { %v8221_v47 = vpack.c.bf16 %v3428_v27, %v3425_v39  ;;  %v3625_v14 = vld [vmem:[#allocation9 + $0x70] sm:$0xff]  ;;  %v3630_v39 = vld [vmem:[#allocation9 + $0x98] sm:$0xff]  ;;  %v8259_v27 = vpack.c.bf16 %v3632_v12, %v3628_v63  ;;  %v3644_v63 = vld [vmem:[#allocation9 + $0x108] sm:$0xff]  ;;  %9148 = vst [vmem:[#allocation26_spill] sm:$0xff] %v8288_v32 }
 0x72e   :  { %3278 = vmatmul.mubr.f32.vlgmr.msra.gmra.mrb[22].mxu0 %v8154_v17  ;;  %3349 = vmatmul.mubr.f32.vlgmr.msra.gmra.mrb[22].mxu1 %v8154_v17  ;;  %v8254_v50 = vpack.c.bf16 %v3625_v14, %v3621_v51  ;;  %v8261_v55 = vpack.c.bf16 %v3634_v8, %v3630_v39  ;;  %9144 = vst [vmem:[#allocation22_spill] sm:$0xff] %v8275_v34  ;;  %v3641_v51 = vld [vmem:[#allocation9 + $0xf0] sm:$0xff]  ;;  %v3648_v12 = vld [vmem:[#allocation9 + $0x128] sm:$0xff]  ;;  %v3646_v8 = vld [vmem:[#allocation9 + $0x118] sm:$0xff] }
 0x72f   :  { %6070 = vmatpush1.bf16.msra.mxu0 %v8150_v18  ;;  %6101 = vmatpush3.bf16.msra.mxu1 %v8152_v24  ;;  %v8278_v14 = vpack.c.bf16 %v3641_v51, %v3637_v22  ;;  %v8283_v39 = vpack.c.bf16 %v3648_v12, %v3644_v63  ;;  %v8285_v4 = vpack.c.bf16 %v3650_v53, %v3646_v8  ;;  %v3652_v21 = vld [vmem:[#allocation9 + $0x148] sm:$0xff]  ;;  %v3654_v22 = vld [vmem:[#allocation9 + $0x158] sm:$0xff]  ;;  %v3651_v12 = vld [vmem:[#allocation9 + $0x140] sm:$0xff] }
 0x730   :  { %6072 = vmatprep.subr.bf16.mxu0 %v8156_v62  ;;  %6102 = vmatprep.subr.bf16.mxu1 %v8879_v48  ;;  %9149 = vst [vmem:[#allocation27_spill] sm:$0xff] %v8290_v49  ;;  %v3656_v56 = vld [vmem:[#allocation9 + $0x168] sm:$0xff]  ;;  %v3658_v63 = vld [vmem:[#allocation9 + $0x178] sm:$0xff]  ;;  %v3655_v53 = vld [vmem:[#allocation9 + $0x160] sm:$0xff] }
 0x731   :  { %3511 = vmatprep.mubr.f32.mxu0 %v8882_v3  ;;  %4925 = vmatprep.mubr.msk.f32.mxu1 %vm6764_vm0, %v8882_v3  ;;  %9145 = vst [vmem:[#allocation23_spill] sm:$0xff] %v8278_v14  ;;  %9146 = vst [vmem:[#allocation24_spill] sm:$0xff] %v8283_v39  ;;  %v8295_v51 = vpack.c.bf16 %v3656_v56, %v3652_v21  ;;  %v8297_v8 = vpack.c.bf16 %v3658_v63, %v3654_v22  ;;  %v3653_v37 = vld [vmem:[#allocation9 + $0x150] sm:$0xff]  ;;  %v3666_v56 = vld [vmem:[#allocation9 + $0x1b8] sm:$0xff] }
 0x732   :  { %9147 = vst [vmem:[#allocation25_spill] sm:$0xff] %v8285_v4  ;;  %v3657_v15 = vld [vmem:[#allocation9 + $0x170] sm:$0xff]  ;;  %v8300_v20 = vpack.c.bf16 %v3655_v53, %v3651_v12  ;;  %v3659_v22 = vld [vmem:[#allocation9 + $0x180] sm:$0xff] }
 0x733   :  { %6074 = vmatpush1.bf16.msra.mxu0 %v8162_v16  ;;  %6104 = vmatpush3.bf16.msra.mxu1 %v8164_v36  ;;  %9150 = vst [vmem:[#allocation28_spill] sm:$0xff] %v8295_v51  ;;  %9151 = vst [vmem:[#allocation29_spill] sm:$0xff] %v8297_v8  ;;  %v8302_v13 = vpack.c.bf16 %v3657_v15, %v3653_v37  ;;  %v3663_v63 = vld [vmem:[#allocation9 + $0x1a0] sm:$0xff]  ;;  %v3661_v53 = vld [vmem:[#allocation9 + $0x190] sm:$0xff] }
 0x734   :  { %6076 = vmatprep.subr.bf16.mxu0 %v8168_v42  ;;  %6105 = vmatprep.subr.bf16.mxu1 %v8879_v48  ;;  %9152 = vst [vmem:[#allocation30_spill] sm:$0xff] %v8300_v20  ;;  %v8311_v12 = vpack.c.bf16 %v3663_v63, %v3659_v22  ;;  %v3665_v37 = vld [vmem:[#allocation9 + $0x1b0] sm:$0xff] }
 0x735   :  { %9153 = vst [vmem:[#allocation31_spill] sm:$0xff] %v8302_v13  ;;  %v8314_v15 = vpack.c.bf16 %v3665_v37, %v3661_v53  ;;  %v3669_v53 = vld [vmem:[#allocation9 + $0x1d0] sm:$0xff] }
 0x736   :  { %9156 = vst [vmem:[#allocation34_spill] sm:$0xff] %v8311_v12  ;;  %v3673_v37 = vld [vmem:[#allocation9 + $0x1f0] sm:$0xff] }
 0x737   :  { %6078 = vmatpush1.bf16.msra.mxu0 %v8175_v6  ;;  %6107 = vmatpush3.bf16.msra.mxu1 %v8177_v61  ;;  %9157 = vst [vmem:[#allocation35_spill] sm:$0xff] %v8314_v15 }
 0x738   :  { %6080 = vmatprep.subr.bf16.mxu0 %v8181_v35  ;;  %6108 = vmatprep.subr.bf16.mxu1 %v8879_v48 }
 0x73b   :  { %6082 = vmatpush1.bf16.msra.mxu0 %v8185_v31  ;;  %6110 = vmatpush3.bf16.msra.mxu1 %v8187_v57 }
 0x73c   :  { %6084 = vmatprep.subr.bf16.mxu0 %v8191_v19  ;;  %6111 = vmatprep.subr.bf16.mxu1 %v8879_v48 }
 0x73f   :  { %6086 = vmatpush1.bf16.msra.mxu0 %v8195_v38  ;;  %6113 = vmatpush3.bf16.msra.mxu1 %v8197_v23 }
 0x740   :  { %6088 = vmatprep.subr.bf16.mxu0 %v8201_v45  ;;  %6114 = vmatprep.subr.bf16.mxu1 %v8879_v48 }
 0x743   :  { %6090 = vmatpush1.bf16.msra.mxu0 %v8205_v46  ;;  %6116 = vmatpush3.bf16.msra.mxu1 %v8207_v10 }
 0x744   :  { %6092 = vmatprep.subr.bf16.mxu0 %v8211_v59  ;;  %6117 = vmatprep.subr.bf16.mxu1 %v8879_v48 }
 0x747   :  { %6094 = vmatpush1.bf16.msra.mxu0 %v8215_v11  ;;  %6119 = vmatpush3.bf16.msra.mxu1 %v8217_v26 }
 0x748   :  { %6096 = vmatprep.subr.bf16.mxu0 %v8221_v47  ;;  %6120 = vmatprep.subr.bf16.mxu1 %v8879_v48 }
 0x74b   :  { %6098 = vmatpush1.bf16.msra.mxu0 %v8225_v0  ;;  %6122 = vmatpush3.bf16.msra.mxu1 %v8227_v7 }
 0x74c   :  { %6124 = vmatprep.subr.bf16.mxu0 %v8235_v60  ;;  %6188 = vmatprep.subr.bf16.mxu1 %v8237_v9 }
 0x74e   :  { %3512 = vmatmul.mubr.f32.vlgmr.msra.gmra.mrb[24].mxu0 %v8154_v17  ;;  %4926 = vmatmul.mubr.f32.vlgmr.msra.gmra.mrb[24].mxu1 %v8154_v17 }
 0x74f   :  { %6126 = vmatpush1.bf16.msra.mxu0 %v8239_v5  ;;  %6190 = vmatpush1.bf16.msra.mxu1 %v8242_v54 }
 0x750   :  { %6128 = vmatprep.subr.bf16.mxu0 %v8247_v29  ;;  %6192 = vmatprep.subr.bf16.mxu1 %v8249_v1 }
 0x753   :  { %6130 = vmatpush1.bf16.msra.mxu0 %v8251_v33  ;;  %6194 = vmatpush1.bf16.msra.mxu1 %v8254_v50 }
 0x754   :  { %6132 = vmatprep.subr.bf16.mxu0 %v8259_v27  ;;  %6196 = vmatprep.subr.bf16.mxu1 %v8261_v55 }
 0x757   :  { %6134 = vmatpush1.bf16.msra.mxu0 %v8263_v28  ;;  %6198 = vmatpush1.bf16.msra.mxu1 %v8266_v58 }
 0x758   :  { %6136 = vmatprep.subr.bf16.mxu0 %v8271_v41  ;;  %6200 = vmatprep.subr.bf16.mxu1 %v8273_v43  ;;  %v3379_v41 = vld [vmem:[#allocation3 + $0x98] sm:$0xff] }
 0x75b   :  { %6138 = vmatpush1.bf16.msra.mxu0 %v8275_v34  ;;  %6202 = vmatpush1.bf16.msra.mxu1 %v8278_v14  ;;  %v3730_v14 = vld [vmem:[#allocation9 + $0x3b8] sm:$0xff] }
 0x75c   :  { %6140 = vmatprep.subr.bf16.mxu0 %v8283_v39  ;;  %6204 = vmatprep.subr.bf16.mxu1 %v8285_v4  ;;  %v3664_v4 = vld [vmem:[#allocation9 + $0x1a8] sm:$0xff] }
 0x75f   :  { %6142 = vmatpush1.bf16.msra.mxu0 %v8288_v32  ;;  %6206 = vmatpush1.bf16.msra.mxu1 %v8290_v49  ;;  %v3660_v32 = vld [vmem:[#allocation9 + $0x188] sm:$0xff]  ;;  %v3662_v49 = vld [vmem:[#allocation9 + $0x198] sm:$0xff] }
 0x760   :  { %6144 = vmatprep.subr.bf16.mxu0 %v8295_v51  ;;  %6208 = vmatprep.subr.bf16.mxu1 %v8297_v8  ;;  %v8307_v21 = vpack.c.bf16 %v3664_v4, %v3660_v32  ;;  %v8309_v39 = vpack.c.bf16 %v3666_v56, %v3662_v49  ;;  %v3672_v8 = vld [vmem:[#allocation9 + $0x1e8] sm:$0xff]  ;;  %v3674_v32 = vld [vmem:[#allocation9 + $0x1f8] sm:$0xff]  ;;  %v3667_v49 = vld [vmem:[#allocation9 + $0x1c0] sm:$0xff] }
 0x761   :  { %v3671_v56 = vld [vmem:[#allocation9 + $0x1e0] sm:$0xff]  ;;  %v3728_v51 = vld [vmem:[#allocation9 + $0x3a8] sm:$0xff] }
 0x762   :  { %9154 = vst [vmem:[#allocation32_spill] sm:$0xff] %v8307_v21  ;;  %9155 = vst [vmem:[#allocation33_spill] sm:$0xff] %v8309_v39  ;;  %v8323_v63 = vpack.c.bf16 %v3671_v56, %v3667_v49 }
 0x763   :  { %6146 = vmatpush1.bf16.msra.mxu0 %v8300_v20  ;;  %6210 = vmatpush1.bf16.msra.mxu1 %v8302_v13  ;;  %v3668_v20 = vld [vmem:[#allocation9 + $0x1c8] sm:$0xff]  ;;  %v3670_v13 = vld [vmem:[#allocation9 + $0x1d8] sm:$0xff] }
 0x764   :  { %6148 = vmatprep.subr.bf16.mxu0 %v8307_v21  ;;  %6212 = vmatprep.subr.bf16.mxu1 %v8309_v39  ;;  %v8319_v4 = vpack.c.bf16 %v3672_v8, %v3668_v20  ;;  %v8321_v22 = vpack.c.bf16 %v3674_v32, %v3670_v13  ;;  %9160 = vst [vmem:[#allocation38_spill] sm:$0xff] %v8323_v63  ;;  %v3680_v21 = vld [vmem:[#allocation9 + $0x228] sm:$0xff]  ;;  %v3682_v20 = vld [vmem:[#allocation9 + $0x238] sm:$0xff]  ;;  %v3675_v13 = vld [vmem:[#allocation9 + $0x200] sm:$0xff] }
 0x765   :  { %v8326_v39 = vpack.c.bf16 %v3673_v37, %v3669_v53  ;;  %v3679_v32 = vld [vmem:[#allocation9 + $0x220] sm:$0xff]  ;;  %v3677_v53 = vld [vmem:[#allocation9 + $0x210] sm:$0xff] }
 0x766   :  { %9158 = vst [vmem:[#allocation36_spill] sm:$0xff] %v8319_v4  ;;  %9159 = vst [vmem:[#allocation37_spill] sm:$0xff] %v8321_v22  ;;  %v8335_v56 = vpack.c.bf16 %v3679_v32, %v3675_v13  ;;  %v3681_v37 = vld [vmem:[#allocation9 + $0x230] sm:$0xff] }
 0x767   :  { %6150 = vmatpush1.bf16.msra.mxu0 %v8311_v12  ;;  %6214 = vmatpush1.bf16.msra.mxu1 %v8314_v15  ;;  %9161 = vst [vmem:[#allocation39_spill] sm:$0xff] %v8326_v39  ;;  %v3676_v12 = vld [vmem:[#allocation9 + $0x208] sm:$0xff]  ;;  %v3678_v15 = vld [vmem:[#allocation9 + $0x218] sm:$0xff] }
 0x768   :  { %6152 = vmatprep.subr.bf16.mxu0 %v8319_v4  ;;  %6216 = vmatprep.subr.bf16.mxu1 %v8321_v22  ;;  %v8331_v8 = vpack.c.bf16 %v3680_v21, %v3676_v12  ;;  %v8333_v49 = vpack.c.bf16 %v3682_v20, %v3678_v15  ;;  %9164 = vst [vmem:[#allocation42_spill] sm:$0xff] %v8335_v56  ;;  %v3688_v4 = vld [vmem:[#allocation9 + $0x268] sm:$0xff]  ;;  %v3690_v12 = vld [vmem:[#allocation9 + $0x278] sm:$0xff]  ;;  %v3683_v15 = vld [vmem:[#allocation9 + $0x240] sm:$0xff] }
 0x769   :  { %v8338_v22 = vpack.c.bf16 %v3681_v37, %v3677_v53  ;;  %v3687_v20 = vld [vmem:[#allocation9 + $0x260] sm:$0xff]  ;;  %v3685_v53 = vld [vmem:[#allocation9 + $0x250] sm:$0xff] }
 0x76a   :  { %9162 = vst [vmem:[#allocation40_spill] sm:$0xff] %v8331_v8  ;;  %9163 = vst [vmem:[#allocation41_spill] sm:$0xff] %v8333_v49  ;;  %v8347_v32 = vpack.c.bf16 %v3687_v20, %v3683_v15  ;;  %v3689_v37 = vld [vmem:[#allocation9 + $0x270] sm:$0xff] }
 0x76b   :  { %6154 = vmatpush1.bf16.msra.mxu0 %v8323_v63  ;;  %6218 = vmatpush1.bf16.msra.mxu1 %v8326_v39  ;;  %9165 = vst [vmem:[#allocation43_spill] sm:$0xff] %v8338_v22  ;;  %v3684_v63 = vld [vmem:[#allocation9 + $0x248] sm:$0xff]  ;;  %v3686_v39 = vld [vmem:[#allocation9 + $0x258] sm:$0xff] }
 0x76c   :  { %6156 = vmatprep.subr.bf16.mxu0 %v8331_v8  ;;  %6220 = vmatprep.subr.bf16.mxu1 %v8333_v49  ;;  %v8343_v21 = vpack.c.bf16 %v3688_v4, %v3684_v63  ;;  %v8345_v13 = vpack.c.bf16 %v3690_v12, %v3686_v39  ;;  %9168 = vst [vmem:[#allocation46_spill] sm:$0xff] %v8347_v32  ;;  %v3696_v8 = vld [vmem:[#allocation9 + $0x2a8] sm:$0xff]  ;;  %v3698_v39 = vld [vmem:[#allocation9 + $0x2b8] sm:$0xff]  ;;  %v3691_v63 = vld [vmem:[#allocation9 + $0x280] sm:$0xff] }
 0x76d   :  { %v8350_v49 = vpack.c.bf16 %v3689_v37, %v3685_v53  ;;  %v3695_v12 = vld [vmem:[#allocation9 + $0x2a0] sm:$0xff]  ;;  %v3693_v53 = vld [vmem:[#allocation9 + $0x290] sm:$0xff] }
 0x76e   :  { %9166 = vst [vmem:[#allocation44_spill] sm:$0xff] %v8343_v21  ;;  %9167 = vst [vmem:[#allocation45_spill] sm:$0xff] %v8345_v13  ;;  %v8359_v20 = vpack.c.bf16 %v3695_v12, %v3691_v63  ;;  %v3697_v37 = vld [vmem:[#allocation9 + $0x2b0] sm:$0xff] }
 0x76f   :  { %6158 = vmatpush1.bf16.msra.mxu0 %v8335_v56  ;;  %6222 = vmatpush1.bf16.msra.mxu1 %v8338_v22  ;;  %9169 = vst [vmem:[#allocation47_spill] sm:$0xff] %v8350_v49  ;;  %v3692_v56 = vld [vmem:[#allocation9 + $0x288] sm:$0xff]  ;;  %v3694_v22 = vld [vmem:[#allocation9 + $0x298] sm:$0xff] }
 0x770   :  { %6160 = vmatprep.subr.bf16.mxu0 %v8343_v21  ;;  %6224 = vmatprep.subr.bf16.mxu1 %v8345_v13  ;;  %v8355_v4 = vpack.c.bf16 %v3696_v8, %v3692_v56  ;;  %v8357_v15 = vpack.c.bf16 %v3698_v39, %v3694_v22  ;;  %9172 = vst [vmem:[#allocation50_spill] sm:$0xff] %v8359_v20  ;;  %v3704_v21 = vld [vmem:[#allocation9 + $0x2e8] sm:$0xff]  ;;  %v3706_v22 = vld [vmem:[#allocation9 + $0x2f8] sm:$0xff]  ;;  %v3699_v56 = vld [vmem:[#allocation9 + $0x2c0] sm:$0xff] }
 0x771   :  { %v8362_v13 = vpack.c.bf16 %v3697_v37, %v3693_v53  ;;  %v3703_v39 = vld [vmem:[#allocation9 + $0x2e0] sm:$0xff]  ;;  %v3701_v53 = vld [vmem:[#allocation9 + $0x2d0] sm:$0xff] }
 0x772   :  { %9170 = vst [vmem:[#allocation48_spill] sm:$0xff] %v8355_v4  ;;  %9171 = vst [vmem:[#allocation49_spill] sm:$0xff] %v8357_v15  ;;  %v8371_v12 = vpack.c.bf16 %v3703_v39, %v3699_v56  ;;  %v3705_v37 = vld [vmem:[#allocation9 + $0x2f0] sm:$0xff] }
 0x773   :  { %6162 = vmatpush1.bf16.msra.mxu0 %v8347_v32  ;;  %6226 = vmatpush1.bf16.msra.mxu1 %v8350_v49  ;;  %9173 = vst [vmem:[#allocation51_spill] sm:$0xff] %v8362_v13  ;;  %v3700_v32 = vld [vmem:[#allocation9 + $0x2c8] sm:$0xff]  ;;  %v3702_v49 = vld [vmem:[#allocation9 + $0x2d8] sm:$0xff] }
 0x774   :  { %6164 = vmatprep.subr.bf16.mxu0 %v8355_v4  ;;  %6228 = vmatprep.subr.bf16.mxu1 %v8357_v15  ;;  %v8367_v8 = vpack.c.bf16 %v3704_v21, %v3700_v32  ;;  %v8369_v63 = vpack.c.bf16 %v3706_v22, %v3702_v49  ;;  %9176 = vst [vmem:[#allocation54_spill] sm:$0xff] %v8371_v12  ;;  %v3712_v4 = vld [vmem:[#allocation9 + $0x328] sm:$0xff]  ;;  %v3714_v49 = vld [vmem:[#allocation9 + $0x338] sm:$0xff]  ;;  %v3707_v32 = vld [vmem:[#allocation9 + $0x300] sm:$0xff] }
 0x775   :  { %v8374_v15 = vpack.c.bf16 %v3705_v37, %v3701_v53  ;;  %v3711_v22 = vld [vmem:[#allocation9 + $0x320] sm:$0xff]  ;;  %v3709_v53 = vld [vmem:[#allocation9 + $0x310] sm:$0xff] }
 0x776   :  { %9174 = vst [vmem:[#allocation52_spill] sm:$0xff] %v8367_v8  ;;  %9175 = vst [vmem:[#allocation53_spill] sm:$0xff] %v8369_v63  ;;  %v8383_v39 = vpack.c.bf16 %v3711_v22, %v3707_v32  ;;  %v3713_v37 = vld [vmem:[#allocation9 + $0x330] sm:$0xff] }
 0x777   :  { %6166 = vmatpush1.bf16.msra.mxu0 %v8359_v20  ;;  %6230 = vmatpush1.bf16.msra.mxu1 %v8362_v13  ;;  %9177 = vst [vmem:[#allocation55_spill] sm:$0xff] %v8374_v15  ;;  %v3708_v20 = vld [vmem:[#allocation9 + $0x308] sm:$0xff]  ;;  %v3710_v13 = vld [vmem:[#allocation9 + $0x318] sm:$0xff] }
 0x778   :  { %6168 = vmatprep.subr.bf16.mxu0 %v8367_v8  ;;  %6232 = vmatprep.subr.bf16.mxu1 %v8369_v63  ;;  %v8379_v21 = vpack.c.bf16 %v3712_v4, %v3708_v20  ;;  %v8381_v56 = vpack.c.bf16 %v3714_v49, %v3710_v13  ;;  %9180 = vst [vmem:[#allocation58_spill] sm:$0xff] %v8383_v39  ;;  %v3720_v8 = vld [vmem:[#allocation9 + $0x368] sm:$0xff]  ;;  %v3722_v13 = vld [vmem:[#allocation9 + $0x378] sm:$0xff]  ;;  %v3715_v20 = vld [vmem:[#allocation9 + $0x340] sm:$0xff] }
 0x779   :  { %v8386_v63 = vpack.c.bf16 %v3713_v37, %v3709_v53  ;;  %v3719_v49 = vld [vmem:[#allocation9 + $0x360] sm:$0xff]  ;;  %v3717_v53 = vld [vmem:[#allocation9 + $0x350] sm:$0xff] }
 0x77a   :  { %9178 = vst [vmem:[#allocation56_spill] sm:$0xff] %v8379_v21  ;;  %9179 = vst [vmem:[#allocation57_spill] sm:$0xff] %v8381_v56  ;;  %v8395_v22 = vpack.c.bf16 %v3719_v49, %v3715_v20  ;;  %v3721_v37 = vld [vmem:[#allocation9 + $0x370] sm:$0xff] }
 0x77b   :  { %6170 = vmatpush1.bf16.msra.mxu0 %v8371_v12  ;;  %6234 = vmatpush1.bf16.msra.mxu1 %v8374_v15  ;;  %9181 = vst [vmem:[#allocation59_spill] sm:$0xff] %v8386_v63  ;;  %v3716_v12 = vld [vmem:[#allocation9 + $0x348] sm:$0xff]  ;;  %v3718_v15 = vld [vmem:[#allocation9 + $0x358] sm:$0xff]  ;;  %v3725_v20 = vld [vmem:[#allocation9 + $0x390] sm:$0xff] }
 0x77c   :  { %6172 = vmatprep.subr.bf16.mxu0 %v8379_v21  ;;  %6236 = vmatprep.subr.bf16.mxu1 %v8381_v56  ;;  %v8391_v4 = vpack.c.bf16 %v3720_v8, %v3716_v12  ;;  %v8393_v32 = vpack.c.bf16 %v3722_v13, %v3718_v15  ;;  %9184 = vst [vmem:[#allocation63_spill] sm:$0xff] %v8395_v22  ;;  %v3724_v21 = vld [vmem:[#allocation9 + $0x388] sm:$0xff]  ;;  %v3723_v15 = vld [vmem:[#allocation9 + $0x380] sm:$0xff] }
 0x77d   :  { %v8398_v56 = vpack.c.bf16 %v3721_v37, %v3717_v53  ;;  %v8401_v8 = vpack.c.bf16 %v3728_v51, %v3724_v21  ;;  %v3727_v13 = vld [vmem:[#allocation9 + $0x3a0] sm:$0xff]  ;;  %v3729_v53 = vld [vmem:[#allocation9 + $0x3b0] sm:$0xff]  ;;  %v3732_v37 = vld [vmem:[#allocation9 + $0x3c8] sm:$0xff] }
 0x77e   :  { %9182 = vst [vmem:[#allocation60_spill] sm:$0xff] %v8391_v4  ;;  %9183 = vst [vmem:[#allocation61_spill] sm:$0xff] %v8393_v32  ;;  %v8407_v49 = vpack.c.bf16 %v3727_v13, %v3723_v15  ;;  %v8411_v51 = vpack.c.bf16 %v3729_v53, %v3725_v20  ;;  %v3734_v21 = vld [vmem:[#allocation9 + $0x3d8] sm:$0xff]  ;;  %v3737_v15 = vld [vmem:[#allocation9 + $0x3f0] sm:$0xff] }
 0x77f   :  { %6174 = vmatpush1.bf16.msra.mxu0 %v8383_v39  ;;  %6238 = vmatpush1.bf16.msra.mxu1 %v8386_v63  ;;  %9185 = vst [vmem:[#allocation64_spill] sm:$0xff] %v8398_v56  ;;  %v3726_v39 = vld [vmem:[#allocation9 + $0x398] sm:$0xff]  ;;  %9186 = vst [vmem:[#allocation65_spill] sm:$0xff] %v8401_v8 }
 0x780   :  { %6176 = vmatprep.subr.bf16.mxu0 %v8391_v4  ;;  %6240 = vmatprep.subr.bf16.mxu1 %v8393_v32  ;;  %v8403_v12 = vpack.c.bf16 %v3730_v14, %v3726_v39  ;;  %9188 = vst [vmem:[#allocation62_spill] sm:$0xff] %v8407_v49  ;;  %v3736_v4 = vld [vmem:[#allocation9 + $0x3e8] sm:$0xff]  ;;  %9189 = vst [vmem:[#allocation67_spill] sm:$0xff] %v8411_v51  ;;  %v3738_v39 = vld [vmem:[#allocation9 + $0x3f8] sm:$0xff] }
 0x781   :  { %v8413_v14 = vpack.c.bf16 %v3736_v4, %v3732_v37  ;;  %v3731_v32 = vld [vmem:[#allocation9 + $0x3c0] sm:$0xff]  ;;  %v8415_v63 = vpack.c.bf16 %v3738_v39, %v3734_v21  ;;  %v3191_v4 = vld [vmem:[%s8616_s5] sm:$0xf] }
 0x782   :  { %9187 = vst [vmem:[#allocation66_spill] sm:$0xff] %v8403_v12  ;;  %v3200_v20 = vrot.slane %v3191_v4, %v8929_v52 }
 0x783   :  { %6178 = vmatpush1.bf16.msra.mxu0 %v8395_v22  ;;  %6242 = vmatpush1.bf16.msra.mxu1 %v8398_v56  ;;  %9190 = vst [vmem:[#allocation68_spill] sm:$0xff] %v8413_v14  ;;  %9191 = vst [vmem:[#allocation69_spill] sm:$0xff] %v8415_v63  ;;  %v3735_v22 = vld [vmem:[#allocation9 + $0x3e0] sm:$0xff]  ;;  %v3733_v56 = vld [vmem:[#allocation9 + $0x3d0] sm:$0xff] }
 0x784   :  { %6180 = vmatprep.subr.bf16.mxu0 %v8401_v8  ;;  %6244 = vmatprep.subr.bf16.mxu1 %v8403_v12  ;;  %v8419_v13 = vpack.c.bf16 %v3735_v22, %v3731_v32  ;;  %v8421_v8 = vpack.c.bf16 %v3737_v15, %v3733_v56  ;;  %v3196_v32 = vrot.slane %v3191_v4, %v8928_v25 }
 0x786   :  { %9192 = vst [vmem:[#allocation70_spill] sm:$0xff] %v8419_v13  ;;  %9193 = vst [vmem:[#allocation71_spill] sm:$0xff] %v8421_v8 }
 0x787   :  { %6182 = vmatpush1.bf16.msra.mxu0 %v8407_v49  ;;  %6246 = vmatpush1.bf16.msra.mxu1 %v8411_v51  ;;  %v3204_v51 = vrot.slane %v3191_v4, %v7164_v40 }
 0x788   :  { %6184 = vmatprep.subr.bf16.mxu0 %v8413_v14  ;;  %6248 = vmatprep.subr.bf16.mxu1 %v8415_v63  ;;  %v3208_v14 = vrot.slane %v3191_v4, %v9141_v44 }
 0x78b   :  { %6186 = vmatpush1.bf16.msra.mxu0 %v8419_v13  ;;  %6250 = vmatpush1.bf16.msra.mxu1 %v8421_v8 }
 0x78c   :  { %6252 = vmatprep.subr.bf16.mxu0 %v8127_v2  ;;  %6283 = vmatprep.subr.bf16.mxu1 %v8879_v48 }
 0x801   :  { %v3279_v56 = vpop.f32.mrb[22].mxu0  ;;  %v3350_v22 = vpop.f32.mrb[22].mxu1 }
 0x802   :  { %v3280_v53 = vadd.f32 %v3279_v56, %v3196_v32  ;;  %v3281_v37 = vpop.f32.mrb[23].mxu0  ;;  %v3352_v21 = vpop.f32.mrb[23].mxu1  ;;  %v3430_v32 = vld [vmem:[%s8614_s3] sm:$0x7] }
 0x803   :  { %v3282_v15 = vadd.f32 %v3281_v37, %v3200_v20  ;;  %v3353_v56 = vadd.f32 %v3352_v21, %v3208_v14  ;;  %v3439_v37 = vrot.slane %v3430_v32, %v8929_v52 }
 0x804   :  { %v4537_v39 = vmul.f32 -1.442695, %v3280_v53  ;;  %v3351_v53 = vadd.f32 %v3350_v22, %v3204_v51 }
 0x805   :  { %v4538_v8 = vmul.f32 -1.442695, %v3282_v15 }
 0x806   :  { %6560 = vpow2.f32 %v4537_v39  ;;  %v3378_v39 = vld [vmem:[#allocation3 + $0x90] sm:$0xff] }
 0x807   :  { %6562 = vpow2.f32 %v4538_v8  ;;  %v3435_v8 = vrot.slane %v3430_v32, %v8928_v25 }
 0x810   :  { %v6561_v2 = vpop.eup %6560 }
 0x811   :  { %v3358_v13 = vadd.f32 1.0, %v6561_v2  ;;  %v6563_v63 = vpop.eup %6562 }
 0x812   :  { %v3364_v49 = vadd.f32 1.0, %v6563_v63 }
 0x813   :  { %6564 = vrcp.f32 %v3358_v13 }
 0x814   :  { %6566 = vrcp.f32 %v3364_v49 }
 0x81d   :  { %v6565_v12 = vpop.eup %6564 }
 0x81e   :  { %v3367_v20 = vmul.f32 %v6565_v12, %v3353_v56  ;;  %v6567_v51 = vpop.eup %6566 }
 0x81f   :  { %v3370_v49 = vsub.f32 1.0, %v6567_v51 }
 0x820   :  { %v3368_v13 = vadd.f32 %v3367_v20, %v3351_v53  ;;  %v3372_v53 = vmul.f32 %v6567_v51, %v8143_v30 }
 0x821   :  { %v3513_v15 = vpop.f32.mrb[24].mxu0  ;;  %v3584_v2 = vpop.f32.mrb[24].mxu1 }
 0x822   :  { %6568 = vtanh.f32 %v3368_v13  ;;  %v3514_v4 = vadd.f32 %v3513_v15, %v3435_v8  ;;  %v3515_v63 = vpop.f32.mrb[25].mxu0  ;;  %v4927_v44 = vpop.f32.mrb[25].mxu1 }
 0x823   :  { %v3516_v34 = vadd.f32 %v3515_v63, %v3439_v37 }
 0x824   :  { %v3588_v43 = vadd.f32 %v3514_v4, %v3378_v39  ;;  %v3380_v39 = vld [vmem:[#allocation3 + $0xa0] sm:$0xff] }
 0x825   :  { %v3595_v21 = vadd.f32 %v3516_v34, %v3379_v41  ;;  %v3443_v34 = vrot.slane %v3430_v32, %v7164_v40  ;;  %v9232_v32 = vld [vmem:[#allocation58_spill] sm:$0xff] }
 0x826   :  { %v4539_v14 = vmul.f32 -1.442695, %v3588_v43 }
 0x827   :  { %v4540_v12 = vmul.f32 -1.442695, %v3595_v21  ;;  %v3585_v37 = vadd.f32 %v3584_v2, %v3443_v34  ;;  %v9233_v2 = vld [vmem:[#allocation59_spill] sm:$0xff] }
 0x828   :  { %6570 = vpow2.f32 %v4539_v14  ;;  %v9241_v34 = vld [vmem:[#allocation67_spill] sm:$0xff] }
 0x829   :  { %6572 = vpow2.f32 %v4540_v12 }
 0x82c   :  { %v6569_v22 = vpop.eup %6568 }
 0x82d   :  { %v3371_v56 = vmul.f32 %v6569_v22, %v3370_v49  ;;  %v9234_v49 = vld [vmem:[#allocation60_spill] sm:$0xff]  ;;  %v9235_v22 = vld [vmem:[#allocation61_spill] sm:$0xff] }
 0x82f   :  { %v8442_v20 = vadd.f32 %v3372_v53, %v3371_v56  ;;  %v9236_v56 = vld [vmem:[#allocation63_spill] sm:$0xff]  ;;  %v9237_v53 = vld [vmem:[#allocation64_spill] sm:$0xff] }
 0x831   :  { %3376 = vst [vmem:[#allocation11 + $0x28] sm:$0xff] %v8442_v20  ;;  %3825 = vmatprep.mubr.f32.mxu0 %v8442_v20  ;;  %3896 = vmatprep.mubr.f32.mxu1 %v8442_v20 }
 0x832   :  { %v6571_v44 = vpop.eup %6570 }
 0x833   :  { %v3592_v43 = vadd.f32 1.0, %v6571_v44  ;;  %v6573_v41 = vpop.eup %6572  ;;  %v9238_v44 = vld [vmem:[#allocation65_spill] sm:$0xff] }
 0x834   :  { %v3599_v8 = vadd.f32 1.0, %v6573_v41  ;;  %v9240_v41 = vld [vmem:[#allocation62_spill] sm:$0xff] }
 0x835   :  { %6574 = vrcp.f32 %v3592_v43  ;;  %v9239_v43 = vld [vmem:[#allocation66_spill] sm:$0xff] }
 0x836   :  { %6576 = vrcp.f32 %v3599_v8  ;;  %v9242_v8 = vld [vmem:[#allocation68_spill] sm:$0xff] }
 0x83f   :  { %v6575_v13 = vpop.eup %6574 }
 0x840   :  { %v3602_v30 = vmul.f32 %v6575_v13, %v3585_v37  ;;  %v6577_v4 = vpop.eup %6576  ;;  %v9243_v37 = vld [vmem:[#allocation69_spill] sm:$0xff]  ;;  %v9244_v13 = vld [vmem:[#allocation70_spill] sm:$0xff] }
 0x841   :  { %v3605_v63 = vsub.f32 1.0, %v6577_v4  ;;  %v3607_v51 = vmul.f32 %v6577_v4, %v8154_v17  ;;  %v9198_v17 = vld [vmem:[#allocation24_spill] sm:$0xff] }
 0x842   :  { %v3603_v15 = vadd.f32 %v3602_v30, %v3380_v39  ;;  %v9245_v39 = vld [vmem:[#allocation71_spill] sm:$0xff] }
 0x843   :  { %v3739_v30 = vld [vmem:[%s8616_s5] sm:$0xf] }
 0x844   :  { %6578 = vtanh.f32 %v3603_v15  ;;  %v3744_v15 = vrot.slane %v3739_v30, %v8928_v25 }
 0x84e   :  { %v6579_v14 = vpop.eup %6578 }
 0x84f   :  { %v3606_v21 = vmul.f32 %v6579_v14, %v3605_v63  ;;  %v3748_v14 = vrot.slane %v3739_v30, %v8929_v52 }
 0x851   :  { %v8449_v12 = vadd.f32 %v3607_v51, %v3606_v21 }
 0x853   :  { %3826 = vmatmul.mubr.f32.vlgmr.msra.gmra.mrb[26].mxu0 %v8449_v12  ;;  %3897 = vmatmul.mubr.f32.vlgmr.msra.gmra.mrb[26].mxu1 %v8449_v12 }
 0x854   :  { %6254 = vmatpush1.bf16.msra.mxu0 %v8150_v18  ;;  %6285 = vmatpush3.bf16.msra.mxu1 %v8152_v24  ;;  %v9196_v18 = vld [vmem:[#allocation22_spill] sm:$0xff]  ;;  %v9197_v24 = vld [vmem:[#allocation23_spill] sm:$0xff] }
 0x855   :  { %6256 = vmatprep.subr.bf16.mxu0 %v8156_v62  ;;  %6286 = vmatprep.subr.bf16.mxu1 %v8879_v48  ;;  %v9199_v62 = vld [vmem:[#allocation25_spill] sm:$0xff] }
 0x856   :  { %4059 = vmatprep.mubr.f32.mxu0 %v8882_v3  ;;  %4960 = vmatprep.mubr.msk.f32.mxu1 %vm6764_vm0, %v8882_v3  ;;  %v9195_v3 = vld [vmem:[#allocation21_spill] sm:$0xff] }
 0x858   :  { %6258 = vmatpush1.bf16.msra.mxu0 %v8162_v16  ;;  %6288 = vmatpush3.bf16.msra.mxu1 %v8164_v36  ;;  %v9200_v16 = vld [vmem:[#allocation26_spill] sm:$0xff]  ;;  %v9201_v36 = vld [vmem:[#allocation27_spill] sm:$0xff] }
 0x859   :  { %6260 = vmatprep.subr.bf16.mxu0 %v8168_v42  ;;  %6289 = vmatprep.subr.bf16.mxu1 %v8879_v48  ;;  %v9202_v42 = vld [vmem:[#allocation28_spill] sm:$0xff] }
 0x85c   :  { %6262 = vmatpush1.bf16.msra.mxu0 %v8175_v6  ;;  %6291 = vmatpush3.bf16.msra.mxu1 %v8177_v61  ;;  %v9203_v6 = vld [vmem:[#allocation29_spill] sm:$0xff]  ;;  %v9204_v61 = vld [vmem:[#allocation30_spill] sm:$0xff] }
 0x85d   :  { %6264 = vmatprep.subr.bf16.mxu0 %v8181_v35  ;;  %6292 = vmatprep.subr.bf16.mxu1 %v8879_v48  ;;  %v9205_v35 = vld [vmem:[#allocation31_spill] sm:$0xff] }
 0x860   :  { %6266 = vmatpush1.bf16.msra.mxu0 %v8185_v31  ;;  %6294 = vmatpush3.bf16.msra.mxu1 %v8187_v57  ;;  %v9206_v31 = vld [vmem:[#allocation32_spill] sm:$0xff]  ;;  %v9207_v57 = vld [vmem:[#allocation33_spill] sm:$0xff] }
 0x861   :  { %6268 = vmatprep.subr.bf16.mxu0 %v8191_v19  ;;  %6295 = vmatprep.subr.bf16.mxu1 %v8879_v48  ;;  %v9208_v19 = vld [vmem:[#allocation34_spill] sm:$0xff] }
 0x864   :  { %6270 = vmatpush1.bf16.msra.mxu0 %v8195_v38  ;;  %6297 = vmatpush3.bf16.msra.mxu1 %v8197_v23  ;;  %v9209_v38 = vld [vmem:[#allocation35_spill] sm:$0xff]  ;;  %v9210_v23 = vld [vmem:[#allocation36_spill] sm:$0xff] }
 0x865   :  { %6272 = vmatprep.subr.bf16.mxu0 %v8201_v45  ;;  %6298 = vmatprep.subr.bf16.mxu1 %v8879_v48  ;;  %v9211_v45 = vld [vmem:[#allocation37_spill] sm:$0xff] }
 0x868   :  { %6274 = vmatpush1.bf16.msra.mxu0 %v8205_v46  ;;  %6300 = vmatpush3.bf16.msra.mxu1 %v8207_v10  ;;  %v9212_v46 = vld [vmem:[#allocation38_spill] sm:$0xff]  ;;  %v9213_v10 = vld [vmem:[#allocation39_spill] sm:$0xff] }
 0x869   :  { %6276 = vmatprep.subr.bf16.mxu0 %v8211_v59  ;;  %6301 = vmatprep.subr.bf16.mxu1 %v8879_v48  ;;  %v9214_v59 = vld [vmem:[#allocation40_spill] sm:$0xff] }
 0x86c   :  { %6278 = vmatpush1.bf16.msra.mxu0 %v8215_v11  ;;  %6303 = vmatpush3.bf16.msra.mxu1 %v8217_v26  ;;  %v9215_v11 = vld [vmem:[#allocation41_spill] sm:$0xff]  ;;  %v9216_v26 = vld [vmem:[#allocation42_spill] sm:$0xff] }
 0x86d   :  { %6280 = vmatprep.subr.bf16.mxu0 %v8221_v47  ;;  %6304 = vmatprep.subr.bf16.mxu1 %v8879_v48  ;;  %v9194_v48 = vld [vmem:[#allocation20_spill] sm:$0xff]  ;;  %v9217_v47 = vld [vmem:[#allocation43_spill] sm:$0xff] }
 0x870   :  { %6282 = vmatpush1.bf16.msra.mxu0 %v8225_v0  ;;  %6306 = vmatpush3.bf16.msra.mxu1 %v8227_v7  ;;  %v9218_v0 = vld [vmem:[#allocation44_spill] sm:$0xff]  ;;  %v9219_v7 = vld [vmem:[#allocation45_spill] sm:$0xff] }
 0x871   :  { %6308 = vmatprep.subr.bf16.mxu0 %v8235_v60  ;;  %6372 = vmatprep.subr.bf16.mxu1 %v8237_v9  ;;  %v9220_v60 = vld [vmem:[#allocation46_spill] sm:$0xff]  ;;  %v9221_v9 = vld [vmem:[#allocation47_spill] sm:$0xff] }
 0x873   :  { %4060 = vmatmul.mubr.f32.vlgmr.msra.gmra.mrb[28].mxu0 %v8449_v12  ;;  %4961 = vmatmul.mubr.f32.vlgmr.msra.gmra.mrb[28].mxu1 %v8449_v12 }
 0x874   :  { %6310 = vmatpush1.bf16.msra.mxu0 %v8239_v5  ;;  %6374 = vmatpush1.bf16.msra.mxu1 %v8242_v54  ;;  %v9222_v5 = vld [vmem:[#allocation48_spill] sm:$0xff]  ;;  %v9223_v54 = vld [vmem:[#allocation49_spill] sm:$0xff] }
 0x875   :  { %6312 = vmatprep.subr.bf16.mxu0 %v8247_v29  ;;  %6376 = vmatprep.subr.bf16.mxu1 %v8249_v1  ;;  %v9224_v29 = vld [vmem:[#allocation50_spill] sm:$0xff]  ;;  %v9225_v1 = vld [vmem:[#allocation51_spill] sm:$0xff] }
 0x878   :  { %6314 = vmatpush1.bf16.msra.mxu0 %v8251_v33  ;;  %6378 = vmatpush1.bf16.msra.mxu1 %v8254_v50  ;;  %v9226_v33 = vld [vmem:[#allocation52_spill] sm:$0xff]  ;;  %v9227_v50 = vld [vmem:[#allocation53_spill] sm:$0xff] }
 0x879   :  { %6316 = vmatprep.subr.bf16.mxu0 %v8259_v27  ;;  %6380 = vmatprep.subr.bf16.mxu1 %v8261_v55  ;;  %v9228_v27 = vld [vmem:[#allocation54_spill] sm:$0xff]  ;;  %v9229_v55 = vld [vmem:[#allocation55_spill] sm:$0xff] }
 0x87c   :  { %6318 = vmatpush1.bf16.msra.mxu0 %v8263_v28  ;;  %6382 = vmatpush1.bf16.msra.mxu1 %v8266_v58  ;;  %v9230_v28 = vld [vmem:[#allocation56_spill] sm:$0xff]  ;;  %v9231_v58 = vld [vmem:[#allocation57_spill] sm:$0xff] }
 0x87d   :  { %6320 = vmatprep.subr.bf16.mxu0 %v9194_v48  ;;  %6384 = vmatprep.subr.bf16.mxu1 %v9195_v3 }
 0x880   :  { %6322 = vmatpush1.bf16.msra.mxu0 %v9196_v18  ;;  %6386 = vmatpush1.bf16.msra.mxu1 %v9197_v24 }
 0x881   :  { %6324 = vmatprep.subr.bf16.mxu0 %v9198_v17  ;;  %6388 = vmatprep.subr.bf16.mxu1 %v9199_v62 }
 0x884   :  { %6326 = vmatpush1.bf16.msra.mxu0 %v9200_v16  ;;  %6390 = vmatpush1.bf16.msra.mxu1 %v9201_v36  ;;  %v9246_v36 = vld [vmem:[#allocation19_spill] sm:$0xff] }
 0x885   :  { %6328 = vmatprep.subr.bf16.mxu0 %v9202_v42  ;;  %6392 = vmatprep.subr.bf16.mxu1 %v9203_v6  ;;  %v3756_v42 = vrot.slane %v3739_v30, %v9246_v36  ;;  %v3752_v6 = vrot.slane %v3739_v30, %v7164_v40  ;;  %v4287_v30 = vld [vmem:[%s8616_s5] sm:$0xf]  ;;  %s6765_s5 = smov [#allocation11]  }
 0x886   :  { %s4485_s14 = sshll.u32 %s6765_s5, 4  ;;  %s4486_s14 = int_to_ptr.vmem [resolvable:$true] %s4485_s14 }
 0x887   :  { %s6698_s18 = scalar_lea.vmem %s4486_s14, 1024  ;;  %p6703_p5 = scmp.lt.s32.totalorder %s4486_s14, %s4486_s14 }
 0x888   :  { %6330 = vmatpush1.bf16.msra.mxu0 %v9204_v61  ;;  %6394 = vmatpush1.bf16.msra.mxu1 %v9205_v35  ;;  %v3978_v35 = vld [vmem:[%s8614_s3] sm:$0x7]  ;;  %p6699_p4 = scmp.ne.s32.totalorder %s4486_s14, %s6698_s18  ;;  %p6704_p6 = scmp.lt.s32.totalorder %s6698_s18, %s6698_s18 }
 0x889   :  { %6332 = vmatprep.subr.bf16.mxu0 %v9206_v31  ;;  %6396 = vmatprep.subr.bf16.mxu1 %v9207_v57 }
 0x88a   :  { %p6705_p7 = por %p6704_p6, %p6703_p5 }
 0x88c   :  { %6334 = vmatpush1.bf16.msra.mxu0 %v9208_v19  ;;  %6398 = vmatpush1.bf16.msra.mxu1 %v9209_v38  ;;  %p6706_p8 = pnand %p6705_p7, %p6699_p4 }
 0x88d   :  { %6336 = vmatprep.subr.bf16.mxu0 %v9210_v23  ;;  %6400 = vmatprep.subr.bf16.mxu1 %v9211_v45  ;;  %v3983_v23 = vrot.slane %v3978_v35, %v8928_v25  ;;  %v3987_v45 = vrot.slane %v3978_v35, %v8929_v52 }
 0x890   :  { %6338 = vmatpush1.bf16.msra.mxu0 %v9212_v46  ;;  %6402 = vmatpush1.bf16.msra.mxu1 %v9213_v10  ;;  %v3926_v10 = vld [vmem:[#allocation3 + $0xa8] sm:$0xff] }
 0x891   :  { %6340 = vmatprep.subr.bf16.mxu0 %v9214_v59  ;;  %6404 = vmatprep.subr.bf16.mxu1 %v9215_v11 }
 0x894   :  { %6342 = vmatpush1.bf16.msra.mxu0 %v9216_v26  ;;  %6406 = vmatpush1.bf16.msra.mxu1 %v9217_v47 }
 0x895   :  { %6344 = vmatprep.subr.bf16.mxu0 %v9218_v0  ;;  %6408 = vmatprep.subr.bf16.mxu1 %v9219_v7 }
 0x898   :  { %6346 = vmatpush1.bf16.msra.mxu0 %v9220_v60  ;;  %6410 = vmatpush1.bf16.msra.mxu1 %v9221_v9  ;;  %v3927_v9 = vld [vmem:[#allocation3 + $0xb0] sm:$0xff] }
 0x899   :  { %6348 = vmatprep.subr.bf16.mxu0 %v9222_v5  ;;  %6412 = vmatprep.subr.bf16.mxu1 %v9223_v54 }
 0x89c   :  { %6350 = vmatpush1.bf16.msra.mxu0 %v9224_v29  ;;  %6414 = vmatpush1.bf16.msra.mxu1 %v9225_v1 }
 0x89d   :  { %6352 = vmatprep.subr.bf16.mxu0 %v9226_v33  ;;  %6416 = vmatprep.subr.bf16.mxu1 %v9227_v50 }
 0x8a0   :  { %6354 = vmatpush1.bf16.msra.mxu0 %v9228_v27  ;;  %6418 = vmatpush1.bf16.msra.mxu1 %v9229_v55 }
 0x8a1   :  { %6356 = vmatprep.subr.bf16.mxu0 %v9230_v28  ;;  %6420 = vmatprep.subr.bf16.mxu1 %v9231_v58 }
 0x8a4   :  { %6358 = vmatpush1.bf16.msra.mxu0 %v9232_v32  ;;  %6422 = vmatpush1.bf16.msra.mxu1 %v9233_v2 }
 0x8a5   :  { %6360 = vmatprep.subr.bf16.mxu0 %v9234_v49  ;;  %6424 = vmatprep.subr.bf16.mxu1 %v9235_v22  ;;  %v3991_v49 = vrot.slane %v3978_v35, %v7164_v40 }
 0x8a8   :  { %6362 = vmatpush1.bf16.msra.mxu0 %v9236_v56  ;;  %6426 = vmatpush1.bf16.msra.mxu1 %v9237_v53 }
 0x8a9   :  { %6364 = vmatprep.subr.bf16.mxu0 %v9238_v44  ;;  %6428 = vmatprep.subr.bf16.mxu1 %v9239_v43  ;;  %v3928_v44 = vld [vmem:[#allocation3 + $0xb8] sm:$0xff] }
 0x8ac   :  { %6366 = vmatpush1.bf16.msra.mxu0 %v9240_v41  ;;  %6430 = vmatpush1.bf16.msra.mxu1 %v9241_v34 }
 0x8ad   :  { %6368 = vmatprep.subr.bf16.mxu0 %v9242_v8  ;;  %6432 = vmatprep.subr.bf16.mxu1 %v9243_v37 }
 0x8b0   :  { %6370 = vmatpush1.bf16.msra.mxu0 %v9244_v13  ;;  %6434 = vmatpush1.bf16.msra.mxu1 %v9245_v39 }
 0x926   :  { %v3827_v4 = vpop.f32.mrb[26].mxu0  ;;  %v3898_v63 = vpop.f32.mrb[26].mxu1 }
 0x927   :  { %v3828_v21 = vadd.f32 %v3827_v4, %v3744_v15  ;;  %v3829_v51 = vpop.f32.mrb[27].mxu0  ;;  %v3900_v48 = vpop.f32.mrb[27].mxu1  ;;  %v3899_v19 = vadd.f32 %v3898_v63, %v3752_v6  ;;  %v4292_v15 = vrot.slane %v4287_v30, %v8928_v25  ;;  %v4300_v25 = vrot.slane %v4287_v30, %v7164_v40 }
 0x928   :  { %v3830_v18 = vadd.f32 %v3829_v51, %v3748_v14  ;;  %v3901_v31 = vadd.f32 %v3900_v48, %v3756_v42  ;;  %v4296_v14 = vrot.slane %v4287_v30, %v8929_v52 }
 0x929   :  { %v4541_v3 = vmul.f32 -1.442695, %v3828_v21 }
 0x92a   :  { %v4542_v24 = vmul.f32 -1.442695, %v3830_v18 }
 0x92b   :  { %6580 = vpow2.f32 %v4541_v3 }
 0x92c   :  { %6582 = vpow2.f32 %v4542_v24 }
 0x935   :  { %v6581_v17 = vpop.eup %6580 }
 0x936   :  { %v3906_v62 = vadd.f32 1.0, %v6581_v17  ;;  %v6583_v16 = vpop.eup %6582 }
 0x937   :  { %v3912_v61 = vadd.f32 1.0, %v6583_v16  ;;  %v4304_v16 = vrot.slane %v4287_v30, %v9246_v36 }
 0x938   :  { %6584 = vrcp.f32 %v3906_v62 }
 0x939   :  { %6586 = vrcp.f32 %v3912_v61 }
 0x942   :  { %v6585_v57 = vpop.eup %6584 }
 0x943   :  { %v3915_v38 = vmul.f32 %v6585_v57, %v3901_v31  ;;  %v6587_v29 = vpop.eup %6586 }
 0x944   :  { %v3918_v33 = vsub.f32 1.0, %v6587_v29  ;;  %v3920_v55 = vmul.f32 %v6587_v29, %v8442_v20 }
 0x945   :  { %v3916_v46 = vadd.f32 %v3915_v38, %v3899_v19 }
 0x946   :  { %v4061_v59 = vpop.f32.mrb[28].mxu0  ;;  %v4132_v11 = vpop.f32.mrb[28].mxu1 }
 0x947   :  { %6588 = vtanh.f32 %v3916_v46  ;;  %v4062_v26 = vadd.f32 %v4061_v59, %v3983_v23  ;;  %v4063_v47 = vpop.f32.mrb[29].mxu0  ;;  %v4962_v0 = vpop.f32.mrb[29].mxu1  ;;  %v4133_v56 = vadd.f32 %v4132_v11, %v3991_v49 }
 0x948   :  { %v4064_v7 = vadd.f32 %v4063_v47, %v3987_v45 }
 0x949   :  { %v4136_v60 = vadd.f32 %v4062_v26, %v3926_v10 }
 0x94a   :  { %v4143_v54 = vadd.f32 %v4064_v7, %v3927_v9 }
 0x94b   :  { %v4543_v5 = vmul.f32 -1.442695, %v4136_v60 }
 0x94c   :  { %v4544_v1 = vmul.f32 -1.442695, %v4143_v54 }
 0x94d   :  { %6590 = vpow2.f32 %v4543_v5 }
 0x94e   :  { %6592 = vpow2.f32 %v4544_v1 }
 0x951   :  { %v6589_v50 = vpop.eup %6588 }
 0x952   :  { %v3919_v27 = vmul.f32 %v6589_v50, %v3918_v33 }
 0x954   :  { %v3921_v28 = vadd.f32 %v3920_v55, %v3919_v27 }
 0x956   :  { %3924 = vst [vmem:[#allocation11 + $0x30] sm:$0xff] %v3921_v28  ;;  %4373 = vmatprep.mubr.f32.mxu0 %v3921_v28  ;;  %4444 = vmatprep.mubr.f32.mxu1 %v3921_v28 }
 0x957   :  { %v6591_v58 = vpop.eup %6590 }
 0x958   :  { %v4140_v32 = vadd.f32 1.0, %v6591_v58  ;;  %v6593_v2 = vpop.eup %6592 }
 0x959   :  { %v4147_v22 = vadd.f32 1.0, %v6593_v2 }
 0x95a   :  { %6594 = vrcp.f32 %v4140_v32 }
 0x95b   :  { %6596 = vrcp.f32 %v4147_v22 }
 0x964   :  { %v6595_v53 = vpop.eup %6594 }
 0x965   :  { %v4150_v43 = vmul.f32 %v6595_v53, %v4133_v56  ;;  %v6597_v20 = vpop.eup %6596 }
 0x966   :  { %v4153_v34 = vsub.f32 1.0, %v6597_v20  ;;  %v4155_v13 = vmul.f32 %v6597_v20, %v8449_v12 }
 0x967   :  { %v4151_v41 = vadd.f32 %v4150_v43, %v3928_v44 }
 0x969   :  { %6598 = vtanh.f32 %v4151_v41 }
 0x973   :  { %v6599_v8 = vpop.eup %6598 }
 0x974   :  { %v4154_v37 = vmul.f32 %v6599_v8, %v4153_v34 }
 0x976   :  { %v4156_v39 = vadd.f32 %v4155_v13, %v4154_v37 }
 0x978   :  { %4374 = vmatmul.mubr.f32.vlgmr.msra.gmra.mrb[30].mxu0 %v4156_v39  ;;  %4478 = vst [vmem:[#allocation12] sm:$0xff] %v4156_v39  ;;  %4445 = vmatmul.mubr.f32.vlgmr.msra.gmra.mrb[30].mxu1 %v4156_v39 }
 0xa4b   :  { %v4375_v4 = vpop.f32.mrb[30].mxu0  ;;  %v4446_v63 = vpop.f32.mrb[30].mxu1 }
 0xa4c   :  { %v4376_v21 = vadd.f32 %v4375_v4, %v4292_v15  ;;  %v4377_v51 = vpop.f32.mrb[31].mxu0  ;;  %v4448_v48 = vpop.f32.mrb[31].mxu1  ;;  %v4447_v52 = vadd.f32 %v4446_v63, %v4300_v25 }
 0xa4d   :  { %v4378_v18 = vadd.f32 %v4377_v51, %v4296_v14  ;;  %v4449_v6 = vadd.f32 %v4448_v48, %v4304_v16 }
 0xa4e   :  { %v4545_v3 = vmul.f32 -1.442695, %v4376_v21 }
 0xa4f   :  { %v4546_v12 = vmul.f32 -1.442695, %v4378_v18 }
 0xa50   :  { %6600 = vpow2.f32 %v4545_v3 }
 0xa51   :  { %6602 = vpow2.f32 %v4546_v12 }
 0xa5a   :  { %v6601_v24 = vpop.eup %6600 }
 0xa5b   :  { %v4454_v17 = vadd.f32 1.0, %v6601_v24  ;;  %v6603_v62 = vpop.eup %6602 }
 0xa5c   :  { %v4460_v42 = vadd.f32 1.0, %v6603_v62 }
 0xa5d   :  { %6604 = vrcp.f32 %v4454_v17 }
 0xa5e   :  { %6606 = vrcp.f32 %v4460_v42 }
 0xa67   :  { %v6605_v61 = vpop.eup %6604 }
 0xa68   :  { %v4463_v35 = vmul.f32 %v6605_v61, %v4449_v6  ;;  %v6607_v57 = vpop.eup %6606 }
 0xa69   :  { %v4466_v19 = vsub.f32 1.0, %v6607_v57  ;;  %v4468_v23 = vmul.f32 %v6607_v57, %v3921_v28 }
 0xa6a   :  { %v4464_v31 = vadd.f32 %v4463_v35, %v4447_v52 }
 0xa6c   :  { %6608 = vtanh.f32 %v4464_v31 }
 0xa76   :  { %v6609_v38 = vpop.eup %6608 }
 0xa77   :  { %v4467_v45 = vmul.f32 %v6609_v38, %v4466_v19 }
 0xa79   :  { %v4469_v36 = vadd.f32 %v4468_v23, %v4467_v45 }
 0xa7b   :  { %4472 = vst [vmem:[#allocation11 + $0x38] sm:$0xff] %v4469_v36  ;;  %4479 = vst [vmem:[#allocation12 + $0x8] sm:$0xff] %v4469_v36 }
 0xa7c   :  { %6709 = shalt.err (!%p6706_p8)
}
 0xa7d   :  { %s6710_s19 = scalar_lea.hbm %s8617_s6, 1024 }
 0xa7e   :  { %p6711_p9 = scmp.ne.s32.totalorder %s8617_s6, %s6710_s19  ;;  %p6714_p10 = scmp.lt.u32.totalorder %s6710_s19, %s8617_s6 }
 0xa80   :  { %p6716_p11 = pnand %p6714_p10, %p6711_p9 }
 0xa82   :  { %6719 = shalt.err (!%p6716_p11)
}
 0xa83   :  { %4491 = dma.vmem_to_hbm [thread:$0]  %s4486_s14, 1024, %s8617_s6, [#allocation5], %s6753_s11, %s6753_s11, %s6754_s12  }
 0xa84   :  { %s6720_s27 = scalar_lea.vmem %s8574_s17, 256  ;;  %p6725_p13 = scmp.lt.s32.totalorder %s8574_s17, %s8574_s17 }
 0xa85   :  { %p6721_p12 = scmp.ne.s32.totalorder %s8574_s17, %s6720_s27  ;;  %p6726_p0 = scmp.lt.s32.totalorder %s6720_s27, %s6720_s27 }
 0xa87   :  { %p6727_p1 = por %p6726_p0, %p6725_p13 }
 0xa89   :  { %p6728_p2 = pnand %p6727_p1, %p6721_p12 }
 0xa8b   :  { %6731 = shalt.err (!%p6728_p2)
}
 0xa8c   :  { %s6732_s1 = scalar_lea.hbm %s8618_s7, 256 }
 0xa8d   :  { %p6733_p3 = scmp.ne.s32.totalorder %s8618_s7, %s6732_s1  ;;  %p6736_p4 = scmp.lt.u32.totalorder %s6732_s1, %s8618_s7 }
 0xa8f   :  { %p6738_p5 = pnand %p6736_p4, %p6733_p3 }
 0xa91   :  { %6741 = shalt.err (!%p6738_p5)
}
 0xa92   :  { %4503 = dma.vmem_to_hbm [thread:$0]  %s8574_s17, 256, %s8618_s7, [#allocation13], %s6753_s11, %s6753_s11, %s6754_s12  }
 0xa93   :  { %6748 = dma.done.wait [#allocation5], 1024  }
 0xa94   :  { %6749 = vsyncadd [#allocation5], 4294966272 }
 0xa95   :  { %6750 = dma.done.wait [#allocation13], 256  }
 0xa96   :  { %6751 = vsyncadd [#allocation13], 4294967040 }
 0xa97   :  { %4510 = vsyncpa [#allocation4], 1 }
 0xa98   :  { %4511 = vsyncpa [#allocation7], 1 }
 0xa99   :  { %4512 = vsyncpa [#allocation10], 1 }
 0xa9a   :  { %4513 = vsyncpa [#allocation5], 1 }
 0xa9b   :  { %4514 = vsyncpa [#allocation13], 1 }

</bundles_post_ra>
